<compile_context>
chip_gen: v7x
topology: tpu7x:2x2x1
jax: 0.10.0
libtpu: 0.0.40
codegen_flags: <defaults>
</compile_context>

<pallas_src>
import math
import functools

import jax
import jax.numpy as jnp
from jax import lax
from jax.experimental import pallas as pl
from jax.experimental.pallas import tpu as pltpu

NEG = -1.0e30      # finite stand-in for the reference -inf (exp(NEG - x) == 0.0 in f32)


def _logaddexp(a, b):
    m = jnp.maximum(a, b)
    return m + jnp.log(jnp.exp(a - m) + jnp.exp(b - m))


def _round_up(x, m):
    return ((x + m - 1) // m) * m


def _vmem_capacity_bytes():
    try:
        info = pltpu.get_tpu_info()
        cap = getattr(info, "vmem_capacity_bytes", None)
        if cap:
            return int(cap)
    except Exception:
        pass
    return 64 * 1024 * 1024          # conservative fallback (safe on every generation)


def _pick_sub_tile(bt, seq_len, embed_dim, num_heads):
    """Attention sub-tile (words per inner step): bounds the f32 q/k/v + score temporaries."""
    if bt <= 8:
        return bt
    per_word = seq_len * (4 * embed_dim + num_heads * seq_len) * 4
    for cand in (32, 16, 8):
        if bt % cand == 0 and (cand == 8 or cand * per_word <= (4 << 20)):
            return cand
    return 8


def _segmenter_kernel(lens_ref, x_ref,
                      wq_ref, wk_ref, wv_ref, bq_ref, bk_ref, bv_ref,
                      wo_ref, bo_ref,
                      wseg_ref, bseg_ref,
                      wt1_ref, bt1_ref, wt2_ref, bt2_ref,
                      wc1_ref, bc1_ref, wc2_ref, bc2_ref,
                      mask_tm_ref, count_ref, tau_ref, segp_ref,
                      xa_ref, alpha_ref, logp_ref, lognp_ref,
                      *, seq_len, embed_dim, num_heads, fixed_k, batch_tile, sub_tile):
    S, D, K, BT, H, SB = seq_len, embed_dim, fixed_k, batch_tile, num_heads, sub_tile
    hd = D // H
    f32 = jnp.float32
    scale = 1.0 / math.sqrt(hd)

    # ---------------- self-attention + residual, processed in batch sub-tiles -----------
    wq = wq_ref[...]
    wk = wk_ref[...]
    wv = wv_ref[...]
    bq = bq_ref[...]
    bk = bk_ref[...]
    bv = bv_ref[...]
    bo = bo_ref[...]
    wo_heads = [wo_ref[h] for h in range(H)]                 # (hd, D) row blocks of W_o

    def attn_tile(t, carry):
        off = pl.multiple_of(t * SB, SB)
        xs2 = x_ref[pl.ds(off, SB)].reshape(SB * S, D)       # (SB*S, D), bf16/f32 input
        q = jnp.dot(xs2, wq, preferred_element_type=f32) + bq
        k = jnp.dot(xs2, wk, preferred_element_type=f32) + bk
        v = jnp.dot(xs2, wv, preferred_element_type=f32) + bv
        out = jnp.zeros((SB * S, D), f32)
        for h in range(H):
            sl = slice(h * hd, (h + 1) * hd)
            qh = q[:, sl].reshape(SB, S, hd)
            kh = k[:, sl].reshape(SB, S, hd)
            vh = v[:, sl].reshape(SB, S, hd)
            s = jnp.einsum('bqd,bkd->bqk', qh, kh,
                           preferred_element_type=f32) * scale
            s = s - jnp.max(s, axis=-1, keepdims=True)
            e = jnp.exp(s)
            inv = pl.reciprocal(jnp.sum(e, axis=-1, keepdims=True), approx=True)
            hv = jnp.einsum('bqk,bkd->bqd', e, vh,
                            preferred_element_type=f32) * inv        # normalize after PV
            # ctx @ Wo == sum_h head_h @ Wo[h*hd:(h+1)*hd, :]  (no lane-axis concat)
            out = out + jnp.dot(hv.reshape(SB * S, hd), wo_heads[h],
                                preferred_element_type=f32)
        xa_ref[pl.ds(off, SB)] = (xs2.astype(f32) + out + bo).reshape(SB, S, D)
        return carry

    lax.fori_loop(0, BT // SB, attn_tile, 0)

    xa = xa_ref[...]                                         # (BT, S, D) post-attention f32

    # ---------------- segmentation probabilities, time-major (S, BT) --------------------
    seg_logit = jnp.sum(xa * wseg_ref[...], axis=-1) + bseg_ref[...]   # (BT, S)
    logit_t = seg_logit.T                                              # (S, BT)
    log1pe = jnp.log1p(jnp.exp(-jnp.abs(logit_t)))
    log_p_raw = jnp.minimum(logit_t, 0.0) - log1pe           # log sigmoid(z)
    log_np_raw = jnp.minimum(-logit_t, 0.0) - log1pe         # log sigmoid(-z) = log(1-p)
    p_t = jnp.exp(log_p_raw)                                 # == sigmoid(z)
    segp_ref[...] = p_t                                      # lane-dense time-major store

    L_row = lens_ref[...]                                    # (1, BT) int32
    pos = lax.broadcasted_iota(jnp.int32, (S, BT), 0)
    valid = pos < L_row
    logp_ref[...] = jnp.where(valid, log_p_raw, NEG)
    lognp_ref[...] = jnp.where(valid, log_np_raw, 0.0)

    # ---------------- adaptive threshold + morpheme count -------------------------------
    inv_S = 1.0 / S
    z_mean = jnp.sum(xa, axis=1) * inv_S                     # (BT, D)
    z_max = jnp.max(xa, axis=1)
    z_sq = jnp.sum(xa * xa, axis=1) * inv_S
    var_scale = float(S) / float(max(S - 1, 1))              # torch.var is unbiased
    z_var = jnp.maximum(z_sq - z_mean * z_mean, 0.0) * var_scale
    h1 = (jnp.dot(z_max, wt1_ref[0:D, :], preferred_element_type=f32)
          + jnp.dot(z_mean, wt1_ref[D:2 * D, :], preferred_element_type=f32)
          + jnp.dot(z_var, wt1_ref[2 * D:3 * D, :], preferred_element_type=f32)
          + bt1_ref[...])
    h1 = jnp.maximum(h1, 0.0)
    tau_logit = jnp.dot(h1, wt2_ref[...], preferred_element_type=f32) + bt2_ref[...]
    tau = 1.0 / (1.0 + jnp.exp(-tau_logit))                  # (BT, 1)
    h2 = jnp.maximum(jnp.dot(z_mean, wc1_ref[...], preferred_element_type=f32)
                     + bc1_ref[...], 0.0)
    c_logit = jnp.dot(h2, wc2_ref[...], preferred_element_type=f32) + bc2_ref[...]
    count = jnp.maximum(c_logit, 0.0) + jnp.log1p(jnp.exp(-jnp.abs(c_logit)))  # softplus
    tau_ref[...] = tau.T                                     # lane-dense (1, BT) rows
    count_ref[...] = count.T

    # ---------------- structured marginals: lane-packed forward-backward ----------------
    sub_j = lax.broadcasted_iota(jnp.int32, (8, BT), 0)      # segment count on sublanes
    dp_unroll = True if S <= 64 else 8

    alpha0 = jnp.where(sub_j == 0, 0.0, NEG).astype(f32)
    alpha_ref[0] = alpha0

    def fwd_body(i, prev):                                   # prev == alpha[i-1] (carried)
        lp = logp_ref[pl.ds(i - 1, 1), :]                    # (1, BT)
        lnp = lognp_ref[pl.ds(i - 1, 1), :]
        shifted = jnp.where(sub_j == 0, NEG, pltpu.roll(prev, 1, 0))  # shifted[j]=prev[j-1]
        new = _logaddexp(prev + lnp, shifted + lp)
        new = jnp.where((sub_j < i) & (sub_j <= K), new, NEG)         # j < min(i, K+1)
        alpha_ref[i] = new                                   # kept for the backward pass
        return new

    alpha_last = lax.fori_loop(1, S + 1, fwd_body, alpha0, unroll=dp_unroll)

    # alpha[S, K] == alpha[L, K] per lane (log(1-p)=0 / log p = NEG past L-1).
    Z_row = alpha_last[K:K + 1, :]                           # (1, BT)
    z_ok = Z_row > 0.5 * NEG                                 # L <= K would make the ref NaN
    negZ = jnp.where(z_ok, -Z_row, 0.0)

    beta0 = jnp.where(sub_j == K, 0.0, NEG).astype(f32)

    def bwd_body(t, beta_next):                              # beta_next == beta[i+1]
        i = S - 1 - t
        lp = logp_ref[pl.ds(i, 1), :]
        lnp = lognp_ref[pl.ds(i, 1), :]

        # marginal[i] = exp(log p_i + logsumexp_{1<=j<=K}(alpha[i, j-1] + beta[i+1, j]) - Z)
        a_row = alpha_ref[i]
        sa = jnp.where(sub_j == 0, NEG, pltpu.roll(a_row, 1, 0))      # sa[j] = alpha[i, j-1]
        terms = jnp.where((sub_j >= 1) & (sub_j <= K), sa + beta_next, NEG)
        m = jnp.max(terms, axis=0, keepdims=True)
        lse = m + jnp.log(jnp.sum(jnp.exp(terms - m), axis=0, keepdims=True))
        log_marg = lp + lse + negZ
        marg = jnp.where((i < L_row) & z_ok,
                         jnp.exp(jnp.minimum(log_marg, 0.0)), 0.0)    # marginal <= 1
        mask_tm_ref[pl.ds(i, 1), :] = marg                   # direct lane-dense row store

        # beta[i, j] = logaddexp(beta[i+1, j] + log(1-p_i), beta[i+1, j+1] + log p_i)
        shifted_b = jnp.where(sub_j == 7, NEG, pltpu.roll(beta_next, 7, 0))
        new_beta = _logaddexp(beta_next + lnp, shifted_b + lp)
        keep = (sub_j <= K) & ((sub_j <= i) | (i >= L_row))  # j < min(i+1, K+1) when i < L
        return jnp.where(keep, new_beta, NEG)

    lax.fori_loop(0, S, bwd_body, beta0, unroll=dp_unroll)
    # TODO(synk): make_mask_2d / make_mask_3d are external utilities in the reference; with
    # "True for valid positions" semantics they are no-ops here (padding already zeroed).


def init_params(key, embed_dim, num_heads=4):
    D = embed_dim
    H2 = D // 2
    hd = D // num_heads
    ks = jax.random.split(key, 18)

    def lin(kk, fan_in, shape):
        bound = 1.0 / math.sqrt(fan_in)
        return jax.random.uniform(kk, shape, jnp.float32, -bound, bound)

    return dict(
        wq=lin(ks[0], D, (D, D)), wk=lin(ks[1], D, (D, D)), wv=lin(ks[2], D, (D, D)),
        bq=lin(ks[3], D, (1, D)), bk=lin(ks[4], D, (1, D)), bv=lin(ks[5], D, (1, D)),
        wo=lin(ks[6], D, (D, D)).reshape(num_heads, hd, D),   # per-head row blocks of W_o
        bo=lin(ks[7], D, (1, D)),
        wseg=lin(ks[8], D, (1, D)), bseg=lin(ks[9], D, (1, 1)),
        wt1=lin(ks[10], 3 * D, (3 * D, H2)), bt1=lin(ks[11], 3 * D, (1, H2)),
        wt2=lin(ks[12], H2, (H2, 1)), bt2=lin(ks[13], H2, (1, 1)),
        wc1=lin(ks[14], D, (D, H2)), bc1=lin(ks[15], D, (1, H2)),
        wc2=lin(ks[16], H2, (H2, 1)), bc2=lin(ks[17], H2, (1, 1)),
    )


_WEIGHT_ORDER = ['wq', 'wk', 'wv', 'bq', 'bk', 'bv', 'wo', 'bo',
                 'wseg', 'bseg', 'wt1', 'bt1', 'wt2', 'bt2',
                 'wc1', 'bc1', 'wc2', 'bc2']


def morpheme_segmenter_forward(encoder_outputs, word_lengths, params,
                               num_heads=4, fixed_k=5, batch_tile=128,
                               input_dtype=jnp.bfloat16):
    """input_dtype=jnp.bfloat16 (default) halves the input DMA and uses the bf16 MXU path;
    pass jnp.float32 for a full-precision run."""
    B, S, D = encoder_outputs.shape
    assert fixed_k + 1 <= 8, "segment-count axis must fit the 8 sublanes"
    assert D % num_heads == 0

    # (8,128) lane-tiling rule on the batch-on-lanes outputs: BT must equal the padded
    # batch (single grid step) or be a multiple of 128 (lane-full tiles).
    B8 = _round_up(B, 8)
    if B8 <= batch_tile:
        BT = B8
    else:
        BT = max(128, (batch_tile // 128) * 128)
    B_pad = _round_up(B, BT)
    SB = _pick_sub_tile(BT, S, D, num_heads)
    assert BT % SB == 0

    vmem_cap = _vmem_capacity_bytes()
    vmem_limit = int(vmem_cap * 3 // 4)        # ~48 MiB on v7x, ~96 MiB on v5e/v6e

    mm_dtype = jnp.bfloat16 if input_dtype == jnp.bfloat16 else jnp.float32
    x = encoder_outputs.astype(input_dtype)
    lens = word_lengths.astype(jnp.int32)
    if B_pad != B:
        x = jnp.pad(x, ((0, B_pad - B), (0, 0), (0, 0)))
        lens = jnp.pad(lens, (0, B_pad - B))    # padded lanes have L=0 -> marginals 0
    lens2d = lens.reshape(1, B_pad)

    w = dict(params)
    for name in ('wq', 'wk', 'wv', 'wo'):
        w[name] = w[name].astype(mm_dtype)      # MXU weights in bf16, accumulate in f32

    kernel = functools.partial(_segmenter_kernel, seq_len=S, embed_dim=D,
                               num_heads=num_heads, fixed_k=fixed_k,
                               batch_tile=BT, sub_tile=SB)

    def full_spec(arr):
        nd = arr.ndim
        return pl.BlockSpec(arr.shape, lambda b, _nd=nd: (0,) * _nd)

    in_specs = [pl.BlockSpec((1, BT), lambda b: (0, b)),        # word lengths, lane-packed
                pl.BlockSpec((BT, S, D), lambda b: (b, 0, 0))]  # encoder outputs
    in_specs += [full_spec(w[name]) for name in _WEIGHT_ORDER]

    out_specs = (
        pl.BlockSpec((S, BT), lambda b: (0, b)),   # marginals, time-major (lane-dense in B)
        pl.BlockSpec((1, BT), lambda b: (0, b)),   # morpheme count (lane-dense row)
        pl.BlockSpec((1, BT), lambda b: (0, b)),   # tau (lane-dense row)
        pl.BlockSpec((S, BT), lambda b: (0, b)),   # seg probs, time-major
    )
    out_shape = (
        jax.ShapeDtypeStruct((S, B_pad), jnp.float32),
        jax.ShapeDtypeStruct((1, B_pad), jnp.float32),
        jax.ShapeDtypeStruct((1, B_pad), jnp.float32),
        jax.ShapeDtypeStruct((S, B_pad), jnp.float32),
    )

    grid_spec = pltpu.PrefetchScalarGridSpec(
        num_scalar_prefetch=0,
        grid=(B_pad // BT,),
        in_specs=in_specs,
        out_specs=out_specs,
        scratch_shapes=[pltpu.VMEM((BT, S, D), jnp.float32),     # post-attention x
                        pltpu.VMEM((S + 1, 8, BT), jnp.float32),  # alpha DP table
                        pltpu.VMEM((S, BT), jnp.float32),         # log p   (time-major)
                        pltpu.VMEM((S, BT), jnp.float32)],        # log 1-p (time-major)
    )

    mask_tm, count_row, tau_row, segp_tm = pl.pallas_call(
        kernel,
        grid_spec=grid_spec,
        out_shape=out_shape,
        compiler_params=pltpu.CompilerParams(
            dimension_semantics=("parallel",),     # independent batch tiles
            vmem_limit_bytes=vmem_limit),
    )(lens2d, x, *[w[name] for name in _WEIGHT_ORDER])

    # wrapper-side layout plumbing only: transpose the time-major slabs once
    mask = mask_tm.T[:B]
    seg_probs = segp_tm.T[:B]
    count = count_row[0, :B][:, None]
    tau = tau_row[0, :B][:, None]
    return mask, count, tau, seg_probs


if __name__ == "__main__":
    key = jax.random.PRNGKey(0)
    k_x, k_p = jax.random.split(key)

    B, S, D = 2, 8, 32
    encoder_outputs = jax.random.normal(k_x, (B, S, D), dtype=jnp.float32)
    word_lengths = jnp.array([8, 6], dtype=jnp.int32)   # lengths > fixed_K so Z is finite
    params = init_params(k_p, D, num_heads=4)

    outs = morpheme_segmenter_forward(encoder_outputs, word_lengths, params,
                                      num_heads=4, fixed_k=5)
    outs = jax.block_until_ready(outs)
    seg_mask, morpheme_count, tau, seg_probs = outs

    assert seg_mask.shape == (B, S)
    assert morpheme_count.shape == (B, 1)
    assert tau.shape == (B, 1)
    assert seg_probs.shape == (B, S)
    for o in outs:
        assert bool(jnp.all(jnp.isfinite(o)))

    print("KERNEL_OK")
</pallas_src>

<mosaic_0001>
module attributes {stable_mosaic.version = 11 : i64} {
  func.func @_segmenter_kernel(%arg0: i32, %arg1: memref<1x8xi32, #tpu.memory_space<vmem>>, %arg2: memref<8x8x32xbf16, #tpu.memory_space<vmem>>, %arg3: memref<32x32xbf16, #tpu.memory_space<vmem>>, %arg4: memref<32x32xbf16, #tpu.memory_space<vmem>>, %arg5: memref<32x32xbf16, #tpu.memory_space<vmem>>, %arg6: memref<1x32xf32, #tpu.memory_space<vmem>>, %arg7: memref<1x32xf32, #tpu.memory_space<vmem>>, %arg8: memref<1x32xf32, #tpu.memory_space<vmem>>, %arg9: memref<4x8x32xbf16, #tpu.memory_space<vmem>>, %arg10: memref<1x32xf32, #tpu.memory_space<vmem>>, %arg11: memref<1x32xf32, #tpu.memory_space<vmem>>, %arg12: memref<1x1xf32, #tpu.memory_space<vmem>>, %arg13: memref<96x16xf32, #tpu.memory_space<vmem>>, %arg14: memref<1x16xf32, #tpu.memory_space<vmem>>, %arg15: memref<16x1xf32, #tpu.memory_space<vmem>>, %arg16: memref<1x1xf32, #tpu.memory_space<vmem>>, %arg17: memref<32x16xf32, #tpu.memory_space<vmem>>, %arg18: memref<1x16xf32, #tpu.memory_space<vmem>>, %arg19: memref<16x1xf32, #tpu.memory_space<vmem>>, %arg20: memref<1x1xf32, #tpu.memory_space<vmem>>, %arg21: memref<8x8xf32, #tpu.memory_space<vmem>>, %arg22: memref<1x8xf32, #tpu.memory_space<vmem>>, %arg23: memref<1x8xf32, #tpu.memory_space<vmem>>, %arg24: memref<8x8xf32, #tpu.memory_space<vmem>>, %arg25: memref<8x8x32xf32, #tpu.memory_space<vmem>>, %arg26: memref<9x8x8xf32, #tpu.memory_space<vmem>>, %arg27: memref<8x8xf32, #tpu.memory_space<vmem>>, %arg28: memref<8x8xf32, #tpu.memory_space<vmem>>) attributes {dimension_semantics = [#tpu.dimension_semantics<parallel>], iteration_bounds = array<i64: 1>, scalar_prefetch = 0 : i64, scratch_operands = 4 : i64, tpu.core_type = #tpu.core_type<tc>, window_params = [{transform_indices = @transform_0, window_bounds = array<i64: 1, 8>}, {transform_indices = @transform_1, window_bounds = array<i64: 8, 8, 32>}, {pipeline_mode = #tpu.pipeline_mode<synchronous>, transform_indices = @transform_2, window_bounds = array<i64: 32, 32>}, {pipeline_mode = #tpu.pipeline_mode<synchronous>, transform_indices = @transform_3, window_bounds = array<i64: 32, 32>}, {pipeline_mode = #tpu.pipeline_mode<synchronous>, transform_indices = @transform_4, window_bounds = array<i64: 32, 32>}, {pipeline_mode = #tpu.pipeline_mode<synchronous>, transform_indices = @transform_5, window_bounds = array<i64: 1, 32>}, {pipeline_mode = #tpu.pipeline_mode<synchronous>, transform_indices = @transform_6, window_bounds = array<i64: 1, 32>}, {pipeline_mode = #tpu.pipeline_mode<synchronous>, transform_indices = @transform_7, window_bounds = array<i64: 1, 32>}, {pipeline_mode = #tpu.pipeline_mode<synchronous>, transform_indices = @transform_8, window_bounds = array<i64: 4, 8, 32>}, {pipeline_mode = #tpu.pipeline_mode<synchronous>, transform_indices = @transform_9, window_bounds = array<i64: 1, 32>}, {pipeline_mode = #tpu.pipeline_mode<synchronous>, transform_indices = @transform_10, window_bounds = array<i64: 1, 32>}, {pipeline_mode = #tpu.pipeline_mode<synchronous>, transform_indices = @transform_11, window_bounds = array<i64: 1, 1>}, {pipeline_mode = #tpu.pipeline_mode<synchronous>, transform_indices = @transform_12, window_bounds = array<i64: 96, 16>}, {pipeline_mode = #tpu.pipeline_mode<synchronous>, transform_indices = @transform_13, window_bounds = array<i64: 1, 16>}, {pipeline_mode = #tpu.pipeline_mode<synchronous>, transform_indices = @transform_14, window_bounds = array<i64: 16, 1>}, {pipeline_mode = #tpu.pipeline_mode<synchronous>, transform_indices = @transform_15, window_bounds = array<i64: 1, 1>}, {pipeline_mode = #tpu.pipeline_mode<synchronous>, transform_indices = @transform_16, window_bounds = array<i64: 32, 16>}, {pipeline_mode = #tpu.pipeline_mode<synchronous>, transform_indices = @transform_17, window_bounds = array<i64: 1, 16>}, {pipeline_mode = #tpu.pipeline_mode<synchronous>, transform_indices = @transform_18, window_bounds = array<i64: 16, 1>}, {pipeline_mode = #tpu.pipeline_mode<synchronous>, transform_indices = @transform_19, window_bounds = array<i64: 1, 1>}, {transform_indices = @transform_20, window_bounds = array<i64: 8, 8>}, {transform_indices = @transform_21, window_bounds = array<i64: 1, 8>}, {transform_indices = @transform_22, window_bounds = array<i64: 1, 8>}, {transform_indices = @transform_23, window_bounds = array<i64: 8, 8>}]} {
    %c0 = arith.constant 0 : index
    %c0_0 = arith.constant 0 : index
    %0 = vector.load %arg3[%c0, %c0_0] : memref<32x32xbf16, #tpu.memory_space<vmem>>, vector<32x32xbf16>
    %c0_1 = arith.constant 0 : index
    %c0_2 = arith.constant 0 : index
    %1 = vector.load %arg4[%c0_1, %c0_2] : memref<32x32xbf16, #tpu.memory_space<vmem>>, vector<32x32xbf16>
    %c0_3 = arith.constant 0 : index
    %c0_4 = arith.constant 0 : index
    %2 = vector.load %arg5[%c0_3, %c0_4] : memref<32x32xbf16, #tpu.memory_space<vmem>>, vector<32x32xbf16>
    %c0_5 = arith.constant 0 : index
    %c0_6 = arith.constant 0 : index
    %3 = vector.load %arg6[%c0_5, %c0_6] : memref<1x32xf32, #tpu.memory_space<vmem>>, vector<1x32xf32>
    %c0_7 = arith.constant 0 : index
    %c0_8 = arith.constant 0 : index
    %4 = vector.load %arg7[%c0_7, %c0_8] : memref<1x32xf32, #tpu.memory_space<vmem>>, vector<1x32xf32>
    %c0_9 = arith.constant 0 : index
    %c0_10 = arith.constant 0 : index
    %5 = vector.load %arg8[%c0_9, %c0_10] : memref<1x32xf32, #tpu.memory_space<vmem>>, vector<1x32xf32>
    %c0_11 = arith.constant 0 : index
    %c0_12 = arith.constant 0 : index
    %6 = vector.load %arg10[%c0_11, %c0_12] : memref<1x32xf32, #tpu.memory_space<vmem>>, vector<1x32xf32>
    %c0_13 = arith.constant 0 : index
    %c0_14 = arith.constant 0 : index
    %c0_15 = arith.constant 0 : index
    %7 = vector.load %arg9[%c0_13, %c0_14, %c0_15] : memref<4x8x32xbf16, #tpu.memory_space<vmem>>, vector<1x8x32xbf16>
    %8 = vector.shape_cast %7 : vector<1x8x32xbf16> to vector<8x32xbf16>
    %c1 = arith.constant 1 : index
    %c0_16 = arith.constant 0 : index
    %c0_17 = arith.constant 0 : index
    %9 = vector.load %arg9[%c1, %c0_16, %c0_17] : memref<4x8x32xbf16, #tpu.memory_space<vmem>>, vector<1x8x32xbf16>
    %10 = vector.shape_cast %9 : vector<1x8x32xbf16> to vector<8x32xbf16>
    %c2 = arith.constant 2 : index
    %c0_18 = arith.constant 0 : index
    %c0_19 = arith.constant 0 : index
    %11 = vector.load %arg9[%c2, %c0_18, %c0_19] : memref<4x8x32xbf16, #tpu.memory_space<vmem>>, vector<1x8x32xbf16>
    %12 = vector.shape_cast %11 : vector<1x8x32xbf16> to vector<8x32xbf16>
    %c3 = arith.constant 3 : index
    %c0_20 = arith.constant 0 : index
    %c0_21 = arith.constant 0 : index
    %13 = vector.load %arg9[%c3, %c0_20, %c0_21] : memref<4x8x32xbf16, #tpu.memory_space<vmem>>, vector<1x8x32xbf16>
    %14 = vector.shape_cast %13 : vector<1x8x32xbf16> to vector<8x32xbf16>
    %c0_i32 = arith.constant 0 : i32
    %c8_i32 = arith.constant 8 : i32
    %15 = arith.muli %c0_i32, %c8_i32 : i32
    %16 = tpu.assume_multiple %15, 8 : i32
    %17 = arith.index_cast %16 : i32 to index
    %c0_22 = arith.constant 0 : index
    %c0_23 = arith.constant 0 : index
    %18 = vector.load %arg2[%17, %c0_22, %c0_23] : memref<8x8x32xbf16, #tpu.memory_space<vmem>>, vector<8x8x32xbf16>
    %19 = vector.shape_cast %18 : vector<8x8x32xbf16> to vector<64x32xbf16>
    %cst = arith.constant dense<0.000000e+00> : vector<64x32xf32>
    %20 = tpu.matmul %19, %0, %cst {dimension_numbers = #tpu.dot_dimension_numbers<[1], [0], [0], [1], [0, 0, 1, 1], [], []>} : vector<64x32xbf16>, vector<32x32xbf16>, vector<64x32xf32> -> vector<64x32xf32>
    %21 = vector.broadcast %3 : vector<1x32xf32> to vector<64x32xf32>
    %22 = arith.addf %20, %21 : vector<64x32xf32>
    %cst_24 = arith.constant dense<0.000000e+00> : vector<64x32xf32>
    %23 = tpu.matmul %19, %1, %cst_24 {dimension_numbers = #tpu.dot_dimension_numbers<[1], [0], [0], [1], [0, 0, 1, 1], [], []>} : vector<64x32xbf16>, vector<32x32xbf16>, vector<64x32xf32> -> vector<64x32xf32>
    %24 = vector.broadcast %4 : vector<1x32xf32> to vector<64x32xf32>
    %25 = arith.addf %23, %24 : vector<64x32xf32>
    %cst_25 = arith.constant dense<0.000000e+00> : vector<64x32xf32>
    %26 = tpu.matmul %19, %2, %cst_25 {dimension_numbers = #tpu.dot_dimension_numbers<[1], [0], [0], [1], [0, 0, 1, 1], [], []>} : vector<64x32xbf16>, vector<32x32xbf16>, vector<64x32xf32> -> vector<64x32xf32>
    %27 = vector.broadcast %5 : vector<1x32xf32> to vector<64x32xf32>
    %28 = arith.addf %26, %27 : vector<64x32xf32>
    %cst_26 = arith.constant 0.000000e+00 : f32
    %29 = vector.broadcast %cst_26 : f32 to vector<64x32xf32>
    %30 = vector.extract_strided_slice %22 {offsets = [0, 0], sizes = [64, 8], strides = [1, 1]} : vector<64x32xf32> to vector<64x8xf32>
    %31 = vector.shape_cast %30 : vector<64x8xf32> to vector<8x8x8xf32>
    %32 = vector.extract_strided_slice %25 {offsets = [0, 0], sizes = [64, 8], strides = [1, 1]} : vector<64x32xf32> to vector<64x8xf32>
    %33 = vector.shape_cast %32 : vector<64x8xf32> to vector<8x8x8xf32>
    %34 = vector.extract_strided_slice %28 {offsets = [0, 0], sizes = [64, 8], strides = [1, 1]} : vector<64x32xf32> to vector<64x8xf32>
    %35 = vector.shape_cast %34 : vector<64x8xf32> to vector<8x8x8xf32>
    "tpu.trace_start"() <{level = 10 : i32, message = "bqd,bkd->bqk"}> : () -> ()
    %cst_27 = arith.constant dense<0.000000e+00> : vector<8x8x8xf32>
    %36 = tpu.matmul %31, %33, %cst_27 {dimension_numbers = #tpu.dot_dimension_numbers<[2], [2], [1], [1], [0, 0, 0, 1, 1, 1], [0], [0]>} : vector<8x8x8xf32>, vector<8x8x8xf32>, vector<8x8x8xf32> -> vector<8x8x8xf32>
    "tpu.trace_stop"() : () -> ()
    %cst_28 = arith.constant 0.353553385 : f32
    %37 = vector.broadcast %cst_28 : f32 to vector<8x8x8xf32>
    %38 = arith.mulf %36, %37 : vector<8x8x8xf32>
    %cst_29 = arith.constant dense<0xFF800000> : vector<8x8xf32>
    %39 = vector.multi_reduction <maximumf>, %38, %cst_29 [2] : vector<8x8x8xf32> to vector<8x8xf32>
    %40 = vector.shape_cast %39 : vector<8x8xf32> to vector<8x8x1xf32>
    %41 = vector.broadcast %40 : vector<8x8x1xf32> to vector<8x8x8xf32>
    %42 = arith.subf %38, %41 : vector<8x8x8xf32>
    %43 = math.exp %42 : vector<8x8x8xf32>
    %cst_30 = arith.constant dense<0.000000e+00> : vector<8x8xf32>
    %44 = vector.multi_reduction <add>, %43, %cst_30 [2] : vector<8x8x8xf32> to vector<8x8xf32>
    %45 = vector.shape_cast %44 : vector<8x8xf32> to vector<8x8x1xf32>
    %46 = tpu.reciprocal %45 {approx = true} : vector<8x8x1xf32> -> vector<8x8x1xf32>
    "tpu.trace_start"() <{level = 10 : i32, message = "bqk,bkd->bqd"}> : () -> ()
    %cst_31 = arith.constant dense<0.000000e+00> : vector<8x8x8xf32>
    %47 = tpu.matmul %43, %35, %cst_31 {dimension_numbers = #tpu.dot_dimension_numbers<[2], [1], [1], [2], [0, 0, 0, 1, 1, 2], [0], [0]>} : vector<8x8x8xf32>, vector<8x8x8xf32>, vector<8x8x8xf32> -> vector<8x8x8xf32>
    "tpu.trace_stop"() : () -> ()
    %48 = vector.broadcast %46 : vector<8x8x1xf32> to vector<8x8x8xf32>
    %49 = arith.mulf %47, %48 : vector<8x8x8xf32>
    %50 = vector.shape_cast %49 : vector<8x8x8xf32> to vector<64x8xf32>
    %cst_32 = arith.constant dense<0.000000e+00> : vector<64x32xf32>
    %51 = tpu.matmul %50, %8, %cst_32 {dimension_numbers = #tpu.dot_dimension_numbers<[1], [0], [0], [1], [0, 0, 1, 1], [], []>} : vector<64x8xf32>, vector<8x32xbf16>, vector<64x32xf32> -> vector<64x32xf32>
    %52 = arith.addf %29, %51 : vector<64x32xf32>
    %53 = vector.extract_strided_slice %22 {offsets = [0, 8], sizes = [64, 8], strides = [1, 1]} : vector<64x32xf32> to vector<64x8xf32>
    %54 = vector.shape_cast %53 : vector<64x8xf32> to vector<8x8x8xf32>
    %55 = vector.extract_strided_slice %25 {offsets = [0, 8], sizes = [64, 8], strides = [1, 1]} : vector<64x32xf32> to vector<64x8xf32>
    %56 = vector.shape_cast %55 : vector<64x8xf32> to vector<8x8x8xf32>
    %57 = vector.extract_strided_slice %28 {offsets = [0, 8], sizes = [64, 8], strides = [1, 1]} : vector<64x32xf32> to vector<64x8xf32>
    %58 = vector.shape_cast %57 : vector<64x8xf32> to vector<8x8x8xf32>
    "tpu.trace_start"() <{level = 10 : i32, message = "bqd,bkd->bqk"}> : () -> ()
    %cst_33 = arith.constant dense<0.000000e+00> : vector<8x8x8xf32>
    %59 = tpu.matmul %54, %56, %cst_33 {dimension_numbers = #tpu.dot_dimension_numbers<[2], [2], [1], [1], [0, 0, 0, 1, 1, 1], [0], [0]>} : vector<8x8x8xf32>, vector<8x8x8xf32>, vector<8x8x8xf32> -> vector<8x8x8xf32>
    "tpu.trace_stop"() : () -> ()
    %cst_34 = arith.constant 0.353553385 : f32
    %60 = vector.broadcast %cst_34 : f32 to vector<8x8x8xf32>
    %61 = arith.mulf %59, %60 : vector<8x8x8xf32>
    %cst_35 = arith.constant dense<0xFF800000> : vector<8x8xf32>
    %62 = vector.multi_reduction <maximumf>, %61, %cst_35 [2] : vector<8x8x8xf32> to vector<8x8xf32>
    %63 = vector.shape_cast %62 : vector<8x8xf32> to vector<8x8x1xf32>
    %64 = vector.broadcast %63 : vector<8x8x1xf32> to vector<8x8x8xf32>
    %65 = arith.subf %61, %64 : vector<8x8x8xf32>
    %66 = math.exp %65 : vector<8x8x8xf32>
    %cst_36 = arith.constant dense<0.000000e+00> : vector<8x8xf32>
    %67 = vector.multi_reduction <add>, %66, %cst_36 [2] : vector<8x8x8xf32> to vector<8x8xf32>
    %68 = vector.shape_cast %67 : vector<8x8xf32> to vector<8x8x1xf32>
    %69 = tpu.reciprocal %68 {approx = true} : vector<8x8x1xf32> -> vector<8x8x1xf32>
    "tpu.trace_start"() <{level = 10 : i32, message = "bqk,bkd->bqd"}> : () -> ()
    %cst_37 = arith.constant dense<0.000000e+00> : vector<8x8x8xf32>
    %70 = tpu.matmul %66, %58, %cst_37 {dimension_numbers = #tpu.dot_dimension_numbers<[2], [1], [1], [2], [0, 0, 0, 1, 1, 2], [0], [0]>} : vector<8x8x8xf32>, vector<8x8x8xf32>, vector<8x8x8xf32> -> vector<8x8x8xf32>
    "tpu.trace_stop"() : () -> ()
    %71 = vector.broadcast %69 : vector<8x8x1xf32> to vector<8x8x8xf32>
    %72 = arith.mulf %70, %71 : vector<8x8x8xf32>
    %73 = vector.shape_cast %72 : vector<8x8x8xf32> to vector<64x8xf32>
    %cst_38 = arith.constant dense<0.000000e+00> : vector<64x32xf32>
    %74 = tpu.matmul %73, %10, %cst_38 {dimension_numbers = #tpu.dot_dimension_numbers<[1], [0], [0], [1], [0, 0, 1, 1], [], []>} : vector<64x8xf32>, vector<8x32xbf16>, vector<64x32xf32> -> vector<64x32xf32>
    %75 = arith.addf %52, %74 : vector<64x32xf32>
    %76 = vector.extract_strided_slice %22 {offsets = [0, 16], sizes = [64, 8], strides = [1, 1]} : vector<64x32xf32> to vector<64x8xf32>
    %77 = vector.shape_cast %76 : vector<64x8xf32> to vector<8x8x8xf32>
    %78 = vector.extract_strided_slice %25 {offsets = [0, 16], sizes = [64, 8], strides = [1, 1]} : vector<64x32xf32> to vector<64x8xf32>
    %79 = vector.shape_cast %78 : vector<64x8xf32> to vector<8x8x8xf32>
    %80 = vector.extract_strided_slice %28 {offsets = [0, 16], sizes = [64, 8], strides = [1, 1]} : vector<64x32xf32> to vector<64x8xf32>
    %81 = vector.shape_cast %80 : vector<64x8xf32> to vector<8x8x8xf32>
    "tpu.trace_start"() <{level = 10 : i32, message = "bqd,bkd->bqk"}> : () -> ()
    %cst_39 = arith.constant dense<0.000000e+00> : vector<8x8x8xf32>
    %82 = tpu.matmul %77, %79, %cst_39 {dimension_numbers = #tpu.dot_dimension_numbers<[2], [2], [1], [1], [0, 0, 0, 1, 1, 1], [0], [0]>} : vector<8x8x8xf32>, vector<8x8x8xf32>, vector<8x8x8xf32> -> vector<8x8x8xf32>
    "tpu.trace_stop"() : () -> ()
    %cst_40 = arith.constant 0.353553385 : f32
    %83 = vector.broadcast %cst_40 : f32 to vector<8x8x8xf32>
    %84 = arith.mulf %82, %83 : vector<8x8x8xf32>
    %cst_41 = arith.constant dense<0xFF800000> : vector<8x8xf32>
    %85 = vector.multi_reduction <maximumf>, %84, %cst_41 [2] : vector<8x8x8xf32> to vector<8x8xf32>
    %86 = vector.shape_cast %85 : vector<8x8xf32> to vector<8x8x1xf32>
    %87 = vector.broadcast %86 : vector<8x8x1xf32> to vector<8x8x8xf32>
    %88 = arith.subf %84, %87 : vector<8x8x8xf32>
    %89 = math.exp %88 : vector<8x8x8xf32>
    %cst_42 = arith.constant dense<0.000000e+00> : vector<8x8xf32>
    %90 = vector.multi_reduction <add>, %89, %cst_42 [2] : vector<8x8x8xf32> to vector<8x8xf32>
    %91 = vector.shape_cast %90 : vector<8x8xf32> to vector<8x8x1xf32>
    %92 = tpu.reciprocal %91 {approx = true} : vector<8x8x1xf32> -> vector<8x8x1xf32>
    "tpu.trace_start"() <{level = 10 : i32, message = "bqk,bkd->bqd"}> : () -> ()
    %cst_43 = arith.constant dense<0.000000e+00> : vector<8x8x8xf32>
    %93 = tpu.matmul %89, %81, %cst_43 {dimension_numbers = #tpu.dot_dimension_numbers<[2], [1], [1], [2], [0, 0, 0, 1, 1, 2], [0], [0]>} : vector<8x8x8xf32>, vector<8x8x8xf32>, vector<8x8x8xf32> -> vector<8x8x8xf32>
    "tpu.trace_stop"() : () -> ()
    %94 = vector.broadcast %92 : vector<8x8x1xf32> to vector<8x8x8xf32>
    %95 = arith.mulf %93, %94 : vector<8x8x8xf32>
    %96 = vector.shape_cast %95 : vector<8x8x8xf32> to vector<64x8xf32>
    %cst_44 = arith.constant dense<0.000000e+00> : vector<64x32xf32>
    %97 = tpu.matmul %96, %12, %cst_44 {dimension_numbers = #tpu.dot_dimension_numbers<[1], [0], [0], [1], [0, 0, 1, 1], [], []>} : vector<64x8xf32>, vector<8x32xbf16>, vector<64x32xf32> -> vector<64x32xf32>
    %98 = arith.addf %75, %97 : vector<64x32xf32>
    %99 = vector.extract_strided_slice %22 {offsets = [0, 24], sizes = [64, 8], strides = [1, 1]} : vector<64x32xf32> to vector<64x8xf32>
    %100 = vector.shape_cast %99 : vector<64x8xf32> to vector<8x8x8xf32>
    %101 = vector.extract_strided_slice %25 {offsets = [0, 24], sizes = [64, 8], strides = [1, 1]} : vector<64x32xf32> to vector<64x8xf32>
    %102 = vector.shape_cast %101 : vector<64x8xf32> to vector<8x8x8xf32>
    %103 = vector.extract_strided_slice %28 {offsets = [0, 24], sizes = [64, 8], strides = [1, 1]} : vector<64x32xf32> to vector<64x8xf32>
    %104 = vector.shape_cast %103 : vector<64x8xf32> to vector<8x8x8xf32>
    "tpu.trace_start"() <{level = 10 : i32, message = "bqd,bkd->bqk"}> : () -> ()
    %cst_45 = arith.constant dense<0.000000e+00> : vector<8x8x8xf32>
    %105 = tpu.matmul %100, %102, %cst_45 {dimension_numbers = #tpu.dot_dimension_numbers<[2], [2], [1], [1], [0, 0, 0, 1, 1, 1], [0], [0]>} : vector<8x8x8xf32>, vector<8x8x8xf32>, vector<8x8x8xf32> -> vector<8x8x8xf32>
    "tpu.trace_stop"() : () -> ()
    %cst_46 = arith.constant 0.353553385 : f32
    %106 = vector.broadcast %cst_46 : f32 to vector<8x8x8xf32>
    %107 = arith.mulf %105, %106 : vector<8x8x8xf32>
    %cst_47 = arith.constant dense<0xFF800000> : vector<8x8xf32>
    %108 = vector.multi_reduction <maximumf>, %107, %cst_47 [2] : vector<8x8x8xf32> to vector<8x8xf32>
    %109 = vector.shape_cast %108 : vector<8x8xf32> to vector<8x8x1xf32>
    %110 = vector.broadcast %109 : vector<8x8x1xf32> to vector<8x8x8xf32>
    %111 = arith.subf %107, %110 : vector<8x8x8xf32>
    %112 = math.exp %111 : vector<8x8x8xf32>
    %cst_48 = arith.constant dense<0.000000e+00> : vector<8x8xf32>
    %113 = vector.multi_reduction <add>, %112, %cst_48 [2] : vector<8x8x8xf32> to vector<8x8xf32>
    %114 = vector.shape_cast %113 : vector<8x8xf32> to vector<8x8x1xf32>
    %115 = tpu.reciprocal %114 {approx = true} : vector<8x8x1xf32> -> vector<8x8x1xf32>
    "tpu.trace_start"() <{level = 10 : i32, message = "bqk,bkd->bqd"}> : () -> ()
    %cst_49 = arith.constant dense<0.000000e+00> : vector<8x8x8xf32>
    %116 = tpu.matmul %112, %104, %cst_49 {dimension_numbers = #tpu.dot_dimension_numbers<[2], [1], [1], [2], [0, 0, 0, 1, 1, 2], [0], [0]>} : vector<8x8x8xf32>, vector<8x8x8xf32>, vector<8x8x8xf32> -> vector<8x8x8xf32>
    "tpu.trace_stop"() : () -> ()
    %117 = vector.broadcast %115 : vector<8x8x1xf32> to vector<8x8x8xf32>
    %118 = arith.mulf %116, %117 : vector<8x8x8xf32>
    %119 = vector.shape_cast %118 : vector<8x8x8xf32> to vector<64x8xf32>
    %cst_50 = arith.constant dense<0.000000e+00> : vector<64x32xf32>
    %120 = tpu.matmul %119, %14, %cst_50 {dimension_numbers = #tpu.dot_dimension_numbers<[1], [0], [0], [1], [0, 0, 1, 1], [], []>} : vector<64x8xf32>, vector<8x32xbf16>, vector<64x32xf32> -> vector<64x32xf32>
    %121 = arith.addf %98, %120 : vector<64x32xf32>
    %122 = arith.extf %19 : vector<64x32xbf16> to vector<64x32xf32>
    %123 = arith.addf %122, %121 : vector<64x32xf32>
    %124 = vector.broadcast %6 : vector<1x32xf32> to vector<64x32xf32>
    %125 = arith.addf %123, %124 : vector<64x32xf32>
    %126 = vector.shape_cast %125 : vector<64x32xf32> to vector<8x8x32xf32>
    %127 = arith.index_cast %16 : i32 to index
    %c0_51 = arith.constant 0 : index
    %c0_52 = arith.constant 0 : index
    %128 = vector.load %arg25[%127, %c0_51, %c0_52] : memref<8x8x32xf32, #tpu.memory_space<vmem>>, vector<8x8x32xf32>
    tpu.vector_store %arg25[%127, %c0_51, %c0_52], %126 {strides = array<i32>} : memref<8x8x32xf32, #tpu.memory_space<vmem>>, vector<8x8x32xf32>,
    %c1_i32 = arith.constant 1 : i32
    %c0_53 = arith.constant 0 : index
    %c0_54 = arith.constant 0 : index
    %c0_55 = arith.constant 0 : index
    %129 = vector.load %arg25[%c0_53, %c0_54, %c0_55] : memref<8x8x32xf32, #tpu.memory_space<vmem>>, vector<8x8x32xf32>
    %c0_56 = arith.constant 0 : index
    %c0_57 = arith.constant 0 : index
    %130 = vector.load %arg11[%c0_56, %c0_57] : memref<1x32xf32, #tpu.memory_space<vmem>>, vector<1x32xf32>
    %131 = vector.shape_cast %130 : vector<1x32xf32> to vector<1x1x32xf32>
    %132 = vector.broadcast %131 : vector<1x1x32xf32> to vector<8x8x32xf32>
    %133 = arith.mulf %129, %132 : vector<8x8x32xf32>
    %cst_58 = arith.constant dense<0.000000e+00> : vector<8x8xf32>
    %134 = vector.multi_reduction <add>, %133, %cst_58 [2] : vector<8x8x32xf32> to vector<8x8xf32>
    %c0_59 = arith.constant 0 : index
    %c0_60 = arith.constant 0 : index
    %135 = vector.load %arg12[%c0_59, %c0_60] : memref<1x1xf32, #tpu.memory_space<vmem>>, vector<1x1xf32>
    %136 = vector.broadcast %135 : vector<1x1xf32> to vector<8x8xf32>
    %137 = arith.addf %134, %136 : vector<8x8xf32>
    %138 = tpu.transpose %137, [1, 0] : vector<8x8xf32> -> vector<8x8xf32>
    %139 = math.absf %138 : vector<8x8xf32>
    %cst_61 = arith.constant 0.000000e+00 : f32
    %140 = vector.broadcast %cst_61 : f32 to vector<8x8xf32>
    %141 = arith.subf %140, %139 : vector<8x8xf32>
    %142 = math.exp %141 : vector<8x8xf32>
    %143 = math.log1p %142 : vector<8x8xf32>
    %cst_62 = arith.constant 0.000000e+00 : f32
    %144 = vector.broadcast %cst_62 : f32 to vector<8x8xf32>
    %145 = arith.minimumf %138, %144 : vector<8x8xf32>
    %146 = arith.subf %145, %143 : vector<8x8xf32>
    %cst_63 = arith.constant 0.000000e+00 : f32
    %147 = vector.broadcast %cst_63 : f32 to vector<8x8xf32>
    %148 = arith.subf %147, %138 : vector<8x8xf32>
    %cst_64 = arith.constant 0.000000e+00 : f32
    %149 = vector.broadcast %cst_64 : f32 to vector<8x8xf32>
    %150 = arith.minimumf %148, %149 : vector<8x8xf32>
    %151 = arith.subf %150, %143 : vector<8x8xf32>
    %152 = math.exp %146 : vector<8x8xf32>
    %c0_65 = arith.constant 0 : index
    %c0_66 = arith.constant 0 : index
    %153 = vector.load %arg24[%c0_65, %c0_66] : memref<8x8xf32, #tpu.memory_space<vmem>>, vector<8x8xf32>
    tpu.vector_store %arg24[%c0_65, %c0_66], %152 {strides = array<i32>} : memref<8x8xf32, #tpu.memory_space<vmem>>, vector<8x8xf32>,
    %c0_67 = arith.constant 0 : index
    %c0_68 = arith.constant 0 : index
    %154 = vector.load %arg1[%c0_67, %c0_68] : memref<1x8xi32, #tpu.memory_space<vmem>>, vector<1x8xi32>
    %155 = tpu.iota {dimensions = array<i32: 0>} : vector<8x8xi32>
    %156 = vector.broadcast %154 : vector<1x8xi32> to vector<8x8xi32>
    %157 = arith.cmpi slt, %155, %156 : vector<8x8xi32>
    %cst_69 = arith.constant -1.000000e+30 : f32
    %158 = vector.broadcast %cst_69 : f32 to vector<8x8xf32>
    %159 = arith.select %157, %146, %158 : vector<8x8xi1>, vector<8x8xf32>
    %c0_70 = arith.constant 0 : index
    %c0_71 = arith.constant 0 : index
    %160 = vector.load %arg27[%c0_70, %c0_71] : memref<8x8xf32, #tpu.memory_space<vmem>>, vector<8x8xf32>
    tpu.vector_store %arg27[%c0_70, %c0_71], %159 {strides = array<i32>} : memref<8x8xf32, #tpu.memory_space<vmem>>, vector<8x8xf32>,
    %cst_72 = arith.constant 0.000000e+00 : f32
    %161 = vector.broadcast %cst_72 : f32 to vector<8x8xf32>
    %162 = arith.select %157, %151, %161 : vector<8x8xi1>, vector<8x8xf32>
    %c0_73 = arith.constant 0 : index
    %c0_74 = arith.constant 0 : index
    %163 = vector.load %arg28[%c0_73, %c0_74] : memref<8x8xf32, #tpu.memory_space<vmem>>, vector<8x8xf32>
    tpu.vector_store %arg28[%c0_73, %c0_74], %162 {strides = array<i32>} : memref<8x8xf32, #tpu.memory_space<vmem>>, vector<8x8xf32>,
    %cst_75 = arith.constant dense<0.000000e+00> : vector<8x32xf32>
    %164 = vector.multi_reduction <add>, %129, %cst_75 [1] : vector<8x8x32xf32> to vector<8x32xf32>
    %cst_76 = arith.constant 1.250000e-01 : f32
    %165 = vector.broadcast %cst_76 : f32 to vector<8x32xf32>
    %166 = arith.mulf %164, %165 : vector<8x32xf32>
    %cst_77 = arith.constant dense<0xFF800000> : vector<8x32xf32>
    %167 = vector.multi_reduction <maximumf>, %129, %cst_77 [1] : vector<8x8x32xf32> to vector<8x32xf32>
    %168 = arith.mulf %129, %129 : vector<8x8x32xf32>
    %cst_78 = arith.constant dense<0.000000e+00> : vector<8x32xf32>
    %169 = vector.multi_reduction <add>, %168, %cst_78 [1] : vector<8x8x32xf32> to vector<8x32xf32>
    %cst_79 = arith.constant 1.250000e-01 : f32
    %170 = vector.broadcast %cst_79 : f32 to vector<8x32xf32>
    %171 = arith.mulf %169, %170 : vector<8x32xf32>
    %172 = arith.mulf %166, %166 : vector<8x32xf32>
    %173 = arith.subf %171, %172 : vector<8x32xf32>
    %cst_80 = arith.constant 0.000000e+00 : f32
    %174 = vector.broadcast %cst_80 : f32 to vector<8x32xf32>
    %175 = arith.maximumf %173, %174 : vector<8x32xf32>
    %cst_81 = arith.constant 1.14285719 : f32
    %176 = vector.broadcast %cst_81 : f32 to vector<8x32xf32>
    %177 = arith.mulf %175, %176 : vector<8x32xf32>
    %c0_82 = arith.constant 0 : index
    %c0_83 = arith.constant 0 : index
    %178 = vector.load %arg13[%c0_82, %c0_83] : memref<96x16xf32, #tpu.memory_space<vmem>>, vector<32x16xf32>
    %cst_84 = arith.constant dense<0.000000e+00> : vector<8x16xf32>
    %179 = tpu.matmul %167, %178, %cst_84 {dimension_numbers = #tpu.dot_dimension_numbers<[1], [0], [0], [1], [0, 0, 1, 1], [], []>} : vector<8x32xf32>, vector<32x16xf32>, vector<8x16xf32> -> vector<8x16xf32>
    %c32 = arith.constant 32 : index
    %c0_85 = arith.constant 0 : index
    %180 = vector.load %arg13[%c32, %c0_85] : memref<96x16xf32, #tpu.memory_space<vmem>>, vector<32x16xf32>
    %cst_86 = arith.constant dense<0.000000e+00> : vector<8x16xf32>
    %181 = tpu.matmul %166, %180, %cst_86 {dimension_numbers = #tpu.dot_dimension_numbers<[1], [0], [0], [1], [0, 0, 1, 1], [], []>} : vector<8x32xf32>, vector<32x16xf32>, vector<8x16xf32> -> vector<8x16xf32>
    %182 = arith.addf %179, %181 : vector<8x16xf32>
    %c64 = arith.constant 64 : index
    %c0_87 = arith.constant 0 : index
    %183 = vector.load %arg13[%c64, %c0_87] : memref<96x16xf32, #tpu.memory_space<vmem>>, vector<32x16xf32>
    %cst_88 = arith.constant dense<0.000000e+00> : vector<8x16xf32>
    %184 = tpu.matmul %177, %183, %cst_88 {dimension_numbers = #tpu.dot_dimension_numbers<[1], [0], [0], [1], [0, 0, 1, 1], [], []>} : vector<8x32xf32>, vector<32x16xf32>, vector<8x16xf32> -> vector<8x16xf32>
    %185 = arith.addf %182, %184 : vector<8x16xf32>
    %c0_89 = arith.constant 0 : index
    %c0_90 = arith.constant 0 : index
    %186 = vector.load %arg14[%c0_89, %c0_90] : memref<1x16xf32, #tpu.memory_space<vmem>>, vector<1x16xf32>
    %187 = vector.broadcast %186 : vector<1x16xf32> to vector<8x16xf32>
    %188 = arith.addf %185, %187 : vector<8x16xf32>
    %cst_91 = arith.constant 0.000000e+00 : f32
    %189 = vector.broadcast %cst_91 : f32 to vector<8x16xf32>
    %190 = arith.maximumf %188, %189 : vector<8x16xf32>
    %c0_92 = arith.constant 0 : index
    %c0_93 = arith.constant 0 : index
    %191 = vector.load %arg15[%c0_92, %c0_93] : memref<16x1xf32, #tpu.memory_space<vmem>>, vector<16x1xf32>
    %cst_94 = arith.constant dense<0.000000e+00> : vector<8x1xf32>
    %192 = tpu.matmul %190, %191, %cst_94 {dimension_numbers = #tpu.dot_dimension_numbers<[1], [0], [0], [1], [0, 0, 1, 1], [], []>} : vector<8x16xf32>, vector<16x1xf32>, vector<8x1xf32> -> vector<8x1xf32>
    %c0_95 = arith.constant 0 : index
    %c0_96 = arith.constant 0 : index
    %193 = vector.load %arg16[%c0_95, %c0_96] : memref<1x1xf32, #tpu.memory_space<vmem>>, vector<1x1xf32>
    %194 = vector.broadcast %193 : vector<1x1xf32> to vector<8x1xf32>
    %195 = arith.addf %192, %194 : vector<8x1xf32>
    %cst_97 = arith.constant 0.000000e+00 : f32
    %196 = vector.broadcast %cst_97 : f32 to vector<8x1xf32>
    %197 = arith.subf %196, %195 : vector<8x1xf32>
    %198 = math.exp %197 : vector<8x1xf32>
    %cst_98 = arith.constant 1.000000e+00 : f32
    %199 = vector.broadcast %cst_98 : f32 to vector<8x1xf32>
    %200 = arith.addf %199, %198 : vector<8x1xf32>
    %cst_99 = arith.constant 1.000000e+00 : f32
    %201 = vector.broadcast %cst_99 : f32 to vector<8x1xf32>
    %202 = arith.divf %201, %200 : vector<8x1xf32>
    %c0_100 = arith.constant 0 : index
    %c0_101 = arith.constant 0 : index
    %203 = vector.load %arg17[%c0_100, %c0_101] : memref<32x16xf32, #tpu.memory_space<vmem>>, vector<32x16xf32>
    %cst_102 = arith.constant dense<0.000000e+00> : vector<8x16xf32>
    %204 = tpu.matmul %166, %203, %cst_102 {dimension_numbers = #tpu.dot_dimension_numbers<[1], [0], [0], [1], [0, 0, 1, 1], [], []>} : vector<8x32xf32>, vector<32x16xf32>, vector<8x16xf32> -> vector<8x16xf32>
    %c0_103 = arith.constant 0 : index
    %c0_104 = arith.constant 0 : index
    %205 = vector.load %arg18[%c0_103, %c0_104] : memref<1x16xf32, #tpu.memory_space<vmem>>, vector<1x16xf32>
    %206 = vector.broadcast %205 : vector<1x16xf32> to vector<8x16xf32>
    %207 = arith.addf %204, %206 : vector<8x16xf32>
    %cst_105 = arith.constant 0.000000e+00 : f32
    %208 = vector.broadcast %cst_105 : f32 to vector<8x16xf32>
    %209 = arith.maximumf %207, %208 : vector<8x16xf32>
    %c0_106 = arith.constant 0 : index
    %c0_107 = arith.constant 0 : index
    %210 = vector.load %arg19[%c0_106, %c0_107] : memref<16x1xf32, #tpu.memory_space<vmem>>, vector<16x1xf32>
    %cst_108 = arith.constant dense<0.000000e+00> : vector<8x1xf32>
    %211 = tpu.matmul %209, %210, %cst_108 {dimension_numbers = #tpu.dot_dimension_numbers<[1], [0], [0], [1], [0, 0, 1, 1], [], []>} : vector<8x16xf32>, vector<16x1xf32>, vector<8x1xf32> -> vector<8x1xf32>
    %c0_109 = arith.constant 0 : index
    %c0_110 = arith.constant 0 : index
    %212 = vector.load %arg20[%c0_109, %c0_110] : memref<1x1xf32, #tpu.memory_space<vmem>>, vector<1x1xf32>
    %213 = vector.broadcast %212 : vector<1x1xf32> to vector<8x1xf32>
    %214 = arith.addf %211, %213 : vector<8x1xf32>
    %cst_111 = arith.constant 0.000000e+00 : f32
    %215 = vector.broadcast %cst_111 : f32 to vector<8x1xf32>
    %216 = arith.maximumf %214, %215 : vector<8x1xf32>
    %217 = math.absf %214 : vector<8x1xf32>
    %cst_112 = arith.constant 0.000000e+00 : f32
    %218 = vector.broadcast %cst_112 : f32 to vector<8x1xf32>
    %219 = arith.subf %218, %217 : vector<8x1xf32>
    %220 = math.exp %219 : vector<8x1xf32>
    %221 = math.log1p %220 : vector<8x1xf32>
    %222 = arith.addf %216, %221 : vector<8x1xf32>
    %223 = tpu.transpose %202, [1, 0] : vector<8x1xf32> -> vector<1x8xf32>
    %c0_113 = arith.constant 0 : index
    %c0_114 = arith.constant 0 : index
    %224 = vector.load %arg23[%c0_113, %c0_114] : memref<1x8xf32, #tpu.memory_space<vmem>>, vector<1x8xf32>
    tpu.vector_store %arg23[%c0_113, %c0_114], %223 {strides = array<i32>} : memref<1x8xf32, #tpu.memory_space<vmem>>, vector<1x8xf32>,
    %225 = tpu.transpose %222, [1, 0] : vector<8x1xf32> -> vector<1x8xf32>
    %c0_115 = arith.constant 0 : index
    %c0_116 = arith.constant 0 : index
    %226 = vector.load %arg22[%c0_115, %c0_116] : memref<1x8xf32, #tpu.memory_space<vmem>>, vector<1x8xf32>
    tpu.vector_store %arg22[%c0_115, %c0_116], %225 {strides = array<i32>} : memref<1x8xf32, #tpu.memory_space<vmem>>, vector<1x8xf32>,
    %227 = tpu.iota {dimensions = array<i32: 0>} : vector<8x8xi32>
    %c0_i32_117 = arith.constant 0 : i32
    %228 = vector.broadcast %c0_i32_117 : i32 to vector<8x8xi32>
    %229 = arith.cmpi eq, %227, %228 : vector<8x8xi32>
    %cst_118 = arith.constant 0.000000e+00 : f32
    %cst_119 = arith.constant -1.000000e+30 : f32
    %230 = vector.broadcast %cst_118 : f32 to vector<8x8xf32>
    %231 = vector.broadcast %cst_119 : f32 to vector<8x8xf32>
    %232 = arith.select %229, %230, %231 : vector<8x8xi1>, vector<8x8xf32>
    %c0_120 = arith.constant 0 : index
    %c0_121 = arith.constant 0 : index
    %c0_122 = arith.constant 0 : index
    %233 = vector.load %arg26[%c0_120, %c0_121, %c0_122] : memref<9x8x8xf32, #tpu.memory_space<vmem>>, vector<1x8x8xf32>
    %234 = vector.shape_cast %233 : vector<1x8x8xf32> to vector<8x8xf32>
    %235 = vector.shape_cast %232 : vector<8x8xf32> to vector<1x8x8xf32>
    tpu.vector_store %arg26[%c0_120, %c0_121, %c0_122], %235 {strides = array<i32>} : memref<9x8x8xf32, #tpu.memory_space<vmem>>, vector<1x8x8xf32>,
    %c1_i32_123 = arith.constant 1 : i32
    %c1_i32_124 = arith.constant 1 : i32
    %236 = arith.subi %c1_i32_123, %c1_i32_124 : i32
    %237 = arith.index_cast %236 : i32 to index
    %c0_125 = arith.constant 0 : index
    %238 = vector.load %arg27[%237, %c0_125] : memref<8x8xf32, #tpu.memory_space<vmem>>, vector<1x8xf32>
    %c1_i32_126 = arith.constant 1 : i32
    %239 = arith.subi %c1_i32_123, %c1_i32_126 : i32
    %240 = arith.index_cast %239 : i32 to index
    %c0_127 = arith.constant 0 : index
    %241 = vector.load %arg28[%240, %c0_127] : memref<8x8xf32, #tpu.memory_space<vmem>>, vector<1x8xf32>
    %c0_i32_128 = arith.constant 0 : i32
    %242 = vector.broadcast %c0_i32_128 : i32 to vector<8x8xi32>
    %243 = arith.cmpi eq, %227, %242 : vector<8x8xi32>
    %c1_i32_129 = arith.constant 1 : i32
    %244 = tpu.dynamic_rotate %232 by %c1_i32_129 dim 0 : vector<8x8xf32>, i32 -> vector<8x8xf32>
    %cst_130 = arith.constant -1.000000e+30 : f32
    %245 = vector.broadcast %cst_130 : f32 to vector<8x8xf32>
    %246 = arith.select %243, %245, %244 : vector<8x8xi1>, vector<8x8xf32>
    %247 = vector.broadcast %241 : vector<1x8xf32> to vector<8x8xf32>
    %248 = arith.addf %232, %247 : vector<8x8xf32>
    %249 = vector.broadcast %238 : vector<1x8xf32> to vector<8x8xf32>
    %250 = arith.addf %246, %249 : vector<8x8xf32>
    %251 = arith.maximumf %248, %250 : vector<8x8xf32>
    %252 = arith.subf %248, %251 : vector<8x8xf32>
    %253 = math.exp %252 : vector<8x8xf32>
    %254 = arith.subf %250, %251 : vector<8x8xf32>
    %255 = math.exp %254 : vector<8x8xf32>
    %256 = arith.addf %253, %255 : vector<8x8xf32>
    %257 = math.log %256 : vector<8x8xf32>
    %258 = arith.addf %251, %257 : vector<8x8xf32>
    %259 = vector.broadcast %c1_i32_123 : i32 to vector<8x8xi32>
    %260 = arith.cmpi slt, %227, %259 : vector<8x8xi32>
    %c5_i32 = arith.constant 5 : i32
    %261 = vector.broadcast %c5_i32 : i32 to vector<8x8xi32>
    %262 = arith.cmpi sle, %227, %261 : vector<8x8xi32>
    %263 = arith.andi %260, %262 : vector<8x8xi1>
    %cst_131 = arith.constant -1.000000e+30 : f32
    %264 = vector.broadcast %cst_131 : f32 to vector<8x8xf32>
    %265 = arith.select %263, %258, %264 : vector<8x8xi1>, vector<8x8xf32>
    %266 = arith.index_cast %c1_i32_123 : i32 to index
    %c0_132 = arith.constant 0 : index
    %c0_133 = arith.constant 0 : index
    %267 = vector.load %arg26[%266, %c0_132, %c0_133] : memref<9x8x8xf32, #tpu.memory_space<vmem>>, vector<1x8x8xf32>
    %268 = vector.shape_cast %267 : vector<1x8x8xf32> to vector<8x8xf32>
    %269 = vector.shape_cast %265 : vector<8x8xf32> to vector<1x8x8xf32>
    tpu.vector_store %arg26[%266, %c0_132, %c0_133], %269 {strides = array<i32>} : memref<9x8x8xf32, #tpu.memory_space<vmem>>, vector<1x8x8xf32>,
    %c2_i32 = arith.constant 2 : i32
    %c1_i32_134 = arith.constant 1 : i32
    %270 = arith.subi %c2_i32, %c1_i32_134 : i32
    %271 = arith.index_cast %270 : i32 to index
    %c0_135 = arith.constant 0 : index
    %272 = vector.load %arg27[%271, %c0_135] : memref<8x8xf32, #tpu.memory_space<vmem>>, vector<1x8xf32>
    %c1_i32_136 = arith.constant 1 : i32
    %273 = arith.subi %c2_i32, %c1_i32_136 : i32
    %274 = arith.index_cast %273 : i32 to index
    %c0_137 = arith.constant 0 : index
    %275 = vector.load %arg28[%274, %c0_137] : memref<8x8xf32, #tpu.memory_space<vmem>>, vector<1x8xf32>
    %c0_i32_138 = arith.constant 0 : i32
    %276 = vector.broadcast %c0_i32_138 : i32 to vector<8x8xi32>
    %277 = arith.cmpi eq, %227, %276 : vector<8x8xi32>
    %c1_i32_139 = arith.constant 1 : i32
    %278 = tpu.dynamic_rotate %265 by %c1_i32_139 dim 0 : vector<8x8xf32>, i32 -> vector<8x8xf32>
    %cst_140 = arith.constant -1.000000e+30 : f32
    %279 = vector.broadcast %cst_140 : f32 to vector<8x8xf32>
    %280 = arith.select %277, %279, %278 : vector<8x8xi1>, vector<8x8xf32>
    %281 = vector.broadcast %275 : vector<1x8xf32> to vector<8x8xf32>
    %282 = arith.addf %265, %281 : vector<8x8xf32>
    %283 = vector.broadcast %272 : vector<1x8xf32> to vector<8x8xf32>
    %284 = arith.addf %280, %283 : vector<8x8xf32>
    %285 = arith.maximumf %282, %284 : vector<8x8xf32>
    %286 = arith.subf %282, %285 : vector<8x8xf32>
    %287 = math.exp %286 : vector<8x8xf32>
    %288 = arith.subf %284, %285 : vector<8x8xf32>
    %289 = math.exp %288 : vector<8x8xf32>
    %290 = arith.addf %287, %289 : vector<8x8xf32>
    %291 = math.log %290 : vector<8x8xf32>
    %292 = arith.addf %285, %291 : vector<8x8xf32>
    %293 = vector.broadcast %c2_i32 : i32 to vector<8x8xi32>
    %294 = arith.cmpi slt, %227, %293 : vector<8x8xi32>
    %c5_i32_141 = arith.constant 5 : i32
    %295 = vector.broadcast %c5_i32_141 : i32 to vector<8x8xi32>
    %296 = arith.cmpi sle, %227, %295 : vector<8x8xi32>
    %297 = arith.andi %294, %296 : vector<8x8xi1>
    %cst_142 = arith.constant -1.000000e+30 : f32
    %298 = vector.broadcast %cst_142 : f32 to vector<8x8xf32>
    %299 = arith.select %297, %292, %298 : vector<8x8xi1>, vector<8x8xf32>
    %300 = arith.index_cast %c2_i32 : i32 to index
    %c0_143 = arith.constant 0 : index
    %c0_144 = arith.constant 0 : index
    %301 = vector.load %arg26[%300, %c0_143, %c0_144] : memref<9x8x8xf32, #tpu.memory_space<vmem>>, vector<1x8x8xf32>
    %302 = vector.shape_cast %301 : vector<1x8x8xf32> to vector<8x8xf32>
    %303 = vector.shape_cast %299 : vector<8x8xf32> to vector<1x8x8xf32>
    tpu.vector_store %arg26[%300, %c0_143, %c0_144], %303 {strides = array<i32>} : memref<9x8x8xf32, #tpu.memory_space<vmem>>, vector<1x8x8xf32>,
    %c3_i32 = arith.constant 3 : i32
    %c1_i32_145 = arith.constant 1 : i32
    %304 = arith.subi %c3_i32, %c1_i32_145 : i32
    %305 = arith.index_cast %304 : i32 to index
    %c0_146 = arith.constant 0 : index
    %306 = vector.load %arg27[%305, %c0_146] : memref<8x8xf32, #tpu.memory_space<vmem>>, vector<1x8xf32>
    %c1_i32_147 = arith.constant 1 : i32
    %307 = arith.subi %c3_i32, %c1_i32_147 : i32
    %308 = arith.index_cast %307 : i32 to index
    %c0_148 = arith.constant 0 : index
    %309 = vector.load %arg28[%308, %c0_148] : memref<8x8xf32, #tpu.memory_space<vmem>>, vector<1x8xf32>
    %c0_i32_149 = arith.constant 0 : i32
    %310 = vector.broadcast %c0_i32_149 : i32 to vector<8x8xi32>
    %311 = arith.cmpi eq, %227, %310 : vector<8x8xi32>
    %c1_i32_150 = arith.constant 1 : i32
    %312 = tpu.dynamic_rotate %299 by %c1_i32_150 dim 0 : vector<8x8xf32>, i32 -> vector<8x8xf32>
    %cst_151 = arith.constant -1.000000e+30 : f32
    %313 = vector.broadcast %cst_151 : f32 to vector<8x8xf32>
    %314 = arith.select %311, %313, %312 : vector<8x8xi1>, vector<8x8xf32>
    %315 = vector.broadcast %309 : vector<1x8xf32> to vector<8x8xf32>
    %316 = arith.addf %299, %315 : vector<8x8xf32>
    %317 = vector.broadcast %306 : vector<1x8xf32> to vector<8x8xf32>
    %318 = arith.addf %314, %317 : vector<8x8xf32>
    %319 = arith.maximumf %316, %318 : vector<8x8xf32>
    %320 = arith.subf %316, %319 : vector<8x8xf32>
    %321 = math.exp %320 : vector<8x8xf32>
    %322 = arith.subf %318, %319 : vector<8x8xf32>
    %323 = math.exp %322 : vector<8x8xf32>
    %324 = arith.addf %321, %323 : vector<8x8xf32>
    %325 = math.log %324 : vector<8x8xf32>
    %326 = arith.addf %319, %325 : vector<8x8xf32>
    %327 = vector.broadcast %c3_i32 : i32 to vector<8x8xi32>
    %328 = arith.cmpi slt, %227, %327 : vector<8x8xi32>
    %c5_i32_152 = arith.constant 5 : i32
    %329 = vector.broadcast %c5_i32_152 : i32 to vector<8x8xi32>
    %330 = arith.cmpi sle, %227, %329 : vector<8x8xi32>
    %331 = arith.andi %328, %330 : vector<8x8xi1>
    %cst_153 = arith.constant -1.000000e+30 : f32
    %332 = vector.broadcast %cst_153 : f32 to vector<8x8xf32>
    %333 = arith.select %331, %326, %332 : vector<8x8xi1>, vector<8x8xf32>
    %334 = arith.index_cast %c3_i32 : i32 to index
    %c0_154 = arith.constant 0 : index
    %c0_155 = arith.constant 0 : index
    %335 = vector.load %arg26[%334, %c0_154, %c0_155] : memref<9x8x8xf32, #tpu.memory_space<vmem>>, vector<1x8x8xf32>
    %336 = vector.shape_cast %335 : vector<1x8x8xf32> to vector<8x8xf32>
    %337 = vector.shape_cast %333 : vector<8x8xf32> to vector<1x8x8xf32>
    tpu.vector_store %arg26[%334, %c0_154, %c0_155], %337 {strides = array<i32>} : memref<9x8x8xf32, #tpu.memory_space<vmem>>, vector<1x8x8xf32>,
    %c4_i32 = arith.constant 4 : i32
    %c1_i32_156 = arith.constant 1 : i32
    %338 = arith.subi %c4_i32, %c1_i32_156 : i32
    %339 = arith.index_cast %338 : i32 to index
    %c0_157 = arith.constant 0 : index
    %340 = vector.load %arg27[%339, %c0_157] : memref<8x8xf32, #tpu.memory_space<vmem>>, vector<1x8xf32>
    %c1_i32_158 = arith.constant 1 : i32
    %341 = arith.subi %c4_i32, %c1_i32_158 : i32
    %342 = arith.index_cast %341 : i32 to index
    %c0_159 = arith.constant 0 : index
    %343 = vector.load %arg28[%342, %c0_159] : memref<8x8xf32, #tpu.memory_space<vmem>>, vector<1x8xf32>
    %c0_i32_160 = arith.constant 0 : i32
    %344 = vector.broadcast %c0_i32_160 : i32 to vector<8x8xi32>
    %345 = arith.cmpi eq, %227, %344 : vector<8x8xi32>
    %c1_i32_161 = arith.constant 1 : i32
    %346 = tpu.dynamic_rotate %333 by %c1_i32_161 dim 0 : vector<8x8xf32>, i32 -> vector<8x8xf32>
    %cst_162 = arith.constant -1.000000e+30 : f32
    %347 = vector.broadcast %cst_162 : f32 to vector<8x8xf32>
    %348 = arith.select %345, %347, %346 : vector<8x8xi1>, vector<8x8xf32>
    %349 = vector.broadcast %343 : vector<1x8xf32> to vector<8x8xf32>
    %350 = arith.addf %333, %349 : vector<8x8xf32>
    %351 = vector.broadcast %340 : vector<1x8xf32> to vector<8x8xf32>
    %352 = arith.addf %348, %351 : vector<8x8xf32>
    %353 = arith.maximumf %350, %352 : vector<8x8xf32>
    %354 = arith.subf %350, %353 : vector<8x8xf32>
    %355 = math.exp %354 : vector<8x8xf32>
    %356 = arith.subf %352, %353 : vector<8x8xf32>
    %357 = math.exp %356 : vector<8x8xf32>
    %358 = arith.addf %355, %357 : vector<8x8xf32>
    %359 = math.log %358 : vector<8x8xf32>
    %360 = arith.addf %353, %359 : vector<8x8xf32>
    %361 = vector.broadcast %c4_i32 : i32 to vector<8x8xi32>
    %362 = arith.cmpi slt, %227, %361 : vector<8x8xi32>
    %c5_i32_163 = arith.constant 5 : i32
    %363 = vector.broadcast %c5_i32_163 : i32 to vector<8x8xi32>
    %364 = arith.cmpi sle, %227, %363 : vector<8x8xi32>
    %365 = arith.andi %362, %364 : vector<8x8xi1>
    %cst_164 = arith.constant -1.000000e+30 : f32
    %366 = vector.broadcast %cst_164 : f32 to vector<8x8xf32>
    %367 = arith.select %365, %360, %366 : vector<8x8xi1>, vector<8x8xf32>
    %368 = arith.index_cast %c4_i32 : i32 to index
    %c0_165 = arith.constant 0 : index
    %c0_166 = arith.constant 0 : index
    %369 = vector.load %arg26[%368, %c0_165, %c0_166] : memref<9x8x8xf32, #tpu.memory_space<vmem>>, vector<1x8x8xf32>
    %370 = vector.shape_cast %369 : vector<1x8x8xf32> to vector<8x8xf32>
    %371 = vector.shape_cast %367 : vector<8x8xf32> to vector<1x8x8xf32>
    tpu.vector_store %arg26[%368, %c0_165, %c0_166], %371 {strides = array<i32>} : memref<9x8x8xf32, #tpu.memory_space<vmem>>, vector<1x8x8xf32>,
    %c5_i32_167 = arith.constant 5 : i32
    %c1_i32_168 = arith.constant 1 : i32
    %372 = arith.subi %c5_i32_167, %c1_i32_168 : i32
    %373 = arith.index_cast %372 : i32 to index
    %c0_169 = arith.constant 0 : index
    %374 = vector.load %arg27[%373, %c0_169] : memref<8x8xf32, #tpu.memory_space<vmem>>, vector<1x8xf32>
    %c1_i32_170 = arith.constant 1 : i32
    %375 = arith.subi %c5_i32_167, %c1_i32_170 : i32
    %376 = arith.index_cast %375 : i32 to index
    %c0_171 = arith.constant 0 : index
    %377 = vector.load %arg28[%376, %c0_171] : memref<8x8xf32, #tpu.memory_space<vmem>>, vector<1x8xf32>
    %c0_i32_172 = arith.constant 0 : i32
    %378 = vector.broadcast %c0_i32_172 : i32 to vector<8x8xi32>
    %379 = arith.cmpi eq, %227, %378 : vector<8x8xi32>
    %c1_i32_173 = arith.constant 1 : i32
    %380 = tpu.dynamic_rotate %367 by %c1_i32_173 dim 0 : vector<8x8xf32>, i32 -> vector<8x8xf32>
    %cst_174 = arith.constant -1.000000e+30 : f32
    %381 = vector.broadcast %cst_174 : f32 to vector<8x8xf32>
    %382 = arith.select %379, %381, %380 : vector<8x8xi1>, vector<8x8xf32>
    %383 = vector.broadcast %377 : vector<1x8xf32> to vector<8x8xf32>
    %384 = arith.addf %367, %383 : vector<8x8xf32>
    %385 = vector.broadcast %374 : vector<1x8xf32> to vector<8x8xf32>
    %386 = arith.addf %382, %385 : vector<8x8xf32>
    %387 = arith.maximumf %384, %386 : vector<8x8xf32>
    %388 = arith.subf %384, %387 : vector<8x8xf32>
    %389 = math.exp %388 : vector<8x8xf32>
    %390 = arith.subf %386, %387 : vector<8x8xf32>
    %391 = math.exp %390 : vector<8x8xf32>
    %392 = arith.addf %389, %391 : vector<8x8xf32>
    %393 = math.log %392 : vector<8x8xf32>
    %394 = arith.addf %387, %393 : vector<8x8xf32>
    %395 = vector.broadcast %c5_i32_167 : i32 to vector<8x8xi32>
    %396 = arith.cmpi slt, %227, %395 : vector<8x8xi32>
    %c5_i32_175 = arith.constant 5 : i32
    %397 = vector.broadcast %c5_i32_175 : i32 to vector<8x8xi32>
    %398 = arith.cmpi sle, %227, %397 : vector<8x8xi32>
    %399 = arith.andi %396, %398 : vector<8x8xi1>
    %cst_176 = arith.constant -1.000000e+30 : f32
    %400 = vector.broadcast %cst_176 : f32 to vector<8x8xf32>
    %401 = arith.select %399, %394, %400 : vector<8x8xi1>, vector<8x8xf32>
    %402 = arith.index_cast %c5_i32_167 : i32 to index
    %c0_177 = arith.constant 0 : index
    %c0_178 = arith.constant 0 : index
    %403 = vector.load %arg26[%402, %c0_177, %c0_178] : memref<9x8x8xf32, #tpu.memory_space<vmem>>, vector<1x8x8xf32>
    %404 = vector.shape_cast %403 : vector<1x8x8xf32> to vector<8x8xf32>
    %405 = vector.shape_cast %401 : vector<8x8xf32> to vector<1x8x8xf32>
    tpu.vector_store %arg26[%402, %c0_177, %c0_178], %405 {strides = array<i32>} : memref<9x8x8xf32, #tpu.memory_space<vmem>>, vector<1x8x8xf32>,
    %c6_i32 = arith.constant 6 : i32
    %c1_i32_179 = arith.constant 1 : i32
    %406 = arith.subi %c6_i32, %c1_i32_179 : i32
    %407 = arith.index_cast %406 : i32 to index
    %c0_180 = arith.constant 0 : index
    %408 = vector.load %arg27[%407, %c0_180] : memref<8x8xf32, #tpu.memory_space<vmem>>, vector<1x8xf32>
    %c1_i32_181 = arith.constant 1 : i32
    %409 = arith.subi %c6_i32, %c1_i32_181 : i32
    %410 = arith.index_cast %409 : i32 to index
    %c0_182 = arith.constant 0 : index
    %411 = vector.load %arg28[%410, %c0_182] : memref<8x8xf32, #tpu.memory_space<vmem>>, vector<1x8xf32>
    %c0_i32_183 = arith.constant 0 : i32
    %412 = vector.broadcast %c0_i32_183 : i32 to vector<8x8xi32>
    %413 = arith.cmpi eq, %227, %412 : vector<8x8xi32>
    %c1_i32_184 = arith.constant 1 : i32
    %414 = tpu.dynamic_rotate %401 by %c1_i32_184 dim 0 : vector<8x8xf32>, i32 -> vector<8x8xf32>
    %cst_185 = arith.constant -1.000000e+30 : f32
    %415 = vector.broadcast %cst_185 : f32 to vector<8x8xf32>
    %416 = arith.select %413, %415, %414 : vector<8x8xi1>, vector<8x8xf32>
    %417 = vector.broadcast %411 : vector<1x8xf32> to vector<8x8xf32>
    %418 = arith.addf %401, %417 : vector<8x8xf32>
    %419 = vector.broadcast %408 : vector<1x8xf32> to vector<8x8xf32>
    %420 = arith.addf %416, %419 : vector<8x8xf32>
    %421 = arith.maximumf %418, %420 : vector<8x8xf32>
    %422 = arith.subf %418, %421 : vector<8x8xf32>
    %423 = math.exp %422 : vector<8x8xf32>
    %424 = arith.subf %420, %421 : vector<8x8xf32>
    %425 = math.exp %424 : vector<8x8xf32>
    %426 = arith.addf %423, %425 : vector<8x8xf32>
    %427 = math.log %426 : vector<8x8xf32>
    %428 = arith.addf %421, %427 : vector<8x8xf32>
    %429 = vector.broadcast %c6_i32 : i32 to vector<8x8xi32>
    %430 = arith.cmpi slt, %227, %429 : vector<8x8xi32>
    %c5_i32_186 = arith.constant 5 : i32
    %431 = vector.broadcast %c5_i32_186 : i32 to vector<8x8xi32>
    %432 = arith.cmpi sle, %227, %431 : vector<8x8xi32>
    %433 = arith.andi %430, %432 : vector<8x8xi1>
    %cst_187 = arith.constant -1.000000e+30 : f32
    %434 = vector.broadcast %cst_187 : f32 to vector<8x8xf32>
    %435 = arith.select %433, %428, %434 : vector<8x8xi1>, vector<8x8xf32>
    %436 = arith.index_cast %c6_i32 : i32 to index
    %c0_188 = arith.constant 0 : index
    %c0_189 = arith.constant 0 : index
    %437 = vector.load %arg26[%436, %c0_188, %c0_189] : memref<9x8x8xf32, #tpu.memory_space<vmem>>, vector<1x8x8xf32>
    %438 = vector.shape_cast %437 : vector<1x8x8xf32> to vector<8x8xf32>
    %439 = vector.shape_cast %435 : vector<8x8xf32> to vector<1x8x8xf32>
    tpu.vector_store %arg26[%436, %c0_188, %c0_189], %439 {strides = array<i32>} : memref<9x8x8xf32, #tpu.memory_space<vmem>>, vector<1x8x8xf32>,
    %c7_i32 = arith.constant 7 : i32
    %c1_i32_190 = arith.constant 1 : i32
    %440 = arith.subi %c7_i32, %c1_i32_190 : i32
    %441 = arith.index_cast %440 : i32 to index
    %c0_191 = arith.constant 0 : index
    %442 = vector.load %arg27[%441, %c0_191] : memref<8x8xf32, #tpu.memory_space<vmem>>, vector<1x8xf32>
    %c1_i32_192 = arith.constant 1 : i32
    %443 = arith.subi %c7_i32, %c1_i32_192 : i32
    %444 = arith.index_cast %443 : i32 to index
    %c0_193 = arith.constant 0 : index
    %445 = vector.load %arg28[%444, %c0_193] : memref<8x8xf32, #tpu.memory_space<vmem>>, vector<1x8xf32>
    %c0_i32_194 = arith.constant 0 : i32
    %446 = vector.broadcast %c0_i32_194 : i32 to vector<8x8xi32>
    %447 = arith.cmpi eq, %227, %446 : vector<8x8xi32>
    %c1_i32_195 = arith.constant 1 : i32
    %448 = tpu.dynamic_rotate %435 by %c1_i32_195 dim 0 : vector<8x8xf32>, i32 -> vector<8x8xf32>
    %cst_196 = arith.constant -1.000000e+30 : f32
    %449 = vector.broadcast %cst_196 : f32 to vector<8x8xf32>
    %450 = arith.select %447, %449, %448 : vector<8x8xi1>, vector<8x8xf32>
    %451 = vector.broadcast %445 : vector<1x8xf32> to vector<8x8xf32>
    %452 = arith.addf %435, %451 : vector<8x8xf32>
    %453 = vector.broadcast %442 : vector<1x8xf32> to vector<8x8xf32>
    %454 = arith.addf %450, %453 : vector<8x8xf32>
    %455 = arith.maximumf %452, %454 : vector<8x8xf32>
    %456 = arith.subf %452, %455 : vector<8x8xf32>
    %457 = math.exp %456 : vector<8x8xf32>
    %458 = arith.subf %454, %455 : vector<8x8xf32>
    %459 = math.exp %458 : vector<8x8xf32>
    %460 = arith.addf %457, %459 : vector<8x8xf32>
    %461 = math.log %460 : vector<8x8xf32>
    %462 = arith.addf %455, %461 : vector<8x8xf32>
    %463 = vector.broadcast %c7_i32 : i32 to vector<8x8xi32>
    %464 = arith.cmpi slt, %227, %463 : vector<8x8xi32>
    %c5_i32_197 = arith.constant 5 : i32
    %465 = vector.broadcast %c5_i32_197 : i32 to vector<8x8xi32>
    %466 = arith.cmpi sle, %227, %465 : vector<8x8xi32>
    %467 = arith.andi %464, %466 : vector<8x8xi1>
    %cst_198 = arith.constant -1.000000e+30 : f32
    %468 = vector.broadcast %cst_198 : f32 to vector<8x8xf32>
    %469 = arith.select %467, %462, %468 : vector<8x8xi1>, vector<8x8xf32>
    %470 = arith.index_cast %c7_i32 : i32 to index
    %c0_199 = arith.constant 0 : index
    %c0_200 = arith.constant 0 : index
    %471 = vector.load %arg26[%470, %c0_199, %c0_200] : memref<9x8x8xf32, #tpu.memory_space<vmem>>, vector<1x8x8xf32>
    %472 = vector.shape_cast %471 : vector<1x8x8xf32> to vector<8x8xf32>
    %473 = vector.shape_cast %469 : vector<8x8xf32> to vector<1x8x8xf32>
    tpu.vector_store %arg26[%470, %c0_199, %c0_200], %473 {strides = array<i32>} : memref<9x8x8xf32, #tpu.memory_space<vmem>>, vector<1x8x8xf32>,
    %c8_i32_201 = arith.constant 8 : i32
    %c1_i32_202 = arith.constant 1 : i32
    %474 = arith.subi %c8_i32_201, %c1_i32_202 : i32
    %475 = arith.index_cast %474 : i32 to index
    %c0_203 = arith.constant 0 : index
    %476 = vector.load %arg27[%475, %c0_203] : memref<8x8xf32, #tpu.memory_space<vmem>>, vector<1x8xf32>
    %c1_i32_204 = arith.constant 1 : i32
    %477 = arith.subi %c8_i32_201, %c1_i32_204 : i32
    %478 = arith.index_cast %477 : i32 to index
    %c0_205 = arith.constant 0 : index
    %479 = vector.load %arg28[%478, %c0_205] : memref<8x8xf32, #tpu.memory_space<vmem>>, vector<1x8xf32>
    %c0_i32_206 = arith.constant 0 : i32
    %480 = vector.broadcast %c0_i32_206 : i32 to vector<8x8xi32>
    %481 = arith.cmpi eq, %227, %480 : vector<8x8xi32>
    %c1_i32_207 = arith.constant 1 : i32
    %482 = tpu.dynamic_rotate %469 by %c1_i32_207 dim 0 : vector<8x8xf32>, i32 -> vector<8x8xf32>
    %cst_208 = arith.constant -1.000000e+30 : f32
    %483 = vector.broadcast %cst_208 : f32 to vector<8x8xf32>
    %484 = arith.select %481, %483, %482 : vector<8x8xi1>, vector<8x8xf32>
    %485 = vector.broadcast %479 : vector<1x8xf32> to vector<8x8xf32>
    %486 = arith.addf %469, %485 : vector<8x8xf32>
    %487 = vector.broadcast %476 : vector<1x8xf32> to vector<8x8xf32>
    %488 = arith.addf %484, %487 : vector<8x8xf32>
    %489 = arith.maximumf %486, %488 : vector<8x8xf32>
    %490 = arith.subf %486, %489 : vector<8x8xf32>
    %491 = math.exp %490 : vector<8x8xf32>
    %492 = arith.subf %488, %489 : vector<8x8xf32>
    %493 = math.exp %492 : vector<8x8xf32>
    %494 = arith.addf %491, %493 : vector<8x8xf32>
    %495 = math.log %494 : vector<8x8xf32>
    %496 = arith.addf %489, %495 : vector<8x8xf32>
    %497 = vector.broadcast %c8_i32_201 : i32 to vector<8x8xi32>
    %498 = arith.cmpi slt, %227, %497 : vector<8x8xi32>
    %c5_i32_209 = arith.constant 5 : i32
    %499 = vector.broadcast %c5_i32_209 : i32 to vector<8x8xi32>
    %500 = arith.cmpi sle, %227, %499 : vector<8x8xi32>
    %501 = arith.andi %498, %500 : vector<8x8xi1>
    %cst_210 = arith.constant -1.000000e+30 : f32
    %502 = vector.broadcast %cst_210 : f32 to vector<8x8xf32>
    %503 = arith.select %501, %496, %502 : vector<8x8xi1>, vector<8x8xf32>
    %504 = arith.index_cast %c8_i32_201 : i32 to index
    %c0_211 = arith.constant 0 : index
    %c0_212 = arith.constant 0 : index
    %505 = vector.load %arg26[%504, %c0_211, %c0_212] : memref<9x8x8xf32, #tpu.memory_space<vmem>>, vector<1x8x8xf32>
    %506 = vector.shape_cast %505 : vector<1x8x8xf32> to vector<8x8xf32>
    %507 = vector.shape_cast %503 : vector<8x8xf32> to vector<1x8x8xf32>
    tpu.vector_store %arg26[%504, %c0_211, %c0_212], %507 {strides = array<i32>} : memref<9x8x8xf32, #tpu.memory_space<vmem>>, vector<1x8x8xf32>,
    %c8_i32_213 = arith.constant 8 : i32
    %508 = vector.extract_strided_slice %503 {offsets = [5, 0], sizes = [1, 8], strides = [1, 1]} : vector<8x8xf32> to vector<1x8xf32>
    %cst_214 = arith.constant -5.000000e+29 : f32
    %509 = vector.broadcast %cst_214 : f32 to vector<1x8xf32>
    %510 = arith.cmpf ogt, %508, %509 : vector<1x8xf32>
    %cst_215 = arith.constant 0.000000e+00 : f32
    %511 = vector.broadcast %cst_215 : f32 to vector<1x8xf32>
    %512 = arith.subf %511, %508 : vector<1x8xf32>
    %cst_216 = arith.constant 0.000000e+00 : f32
    %513 = vector.broadcast %cst_216 : f32 to vector<1x8xf32>
    %514 = arith.select %510, %512, %513 : vector<1x8xi1>, vector<1x8xf32>
    %c5_i32_217 = arith.constant 5 : i32
    %515 = vector.broadcast %c5_i32_217 : i32 to vector<8x8xi32>
    %516 = arith.cmpi eq, %227, %515 : vector<8x8xi32>
    %cst_218 = arith.constant 0.000000e+00 : f32
    %cst_219 = arith.constant -1.000000e+30 : f32
    %517 = vector.broadcast %cst_218 : f32 to vector<8x8xf32>
    %518 = vector.broadcast %cst_219 : f32 to vector<8x8xf32>
    %519 = arith.select %516, %517, %518 : vector<8x8xi1>, vector<8x8xf32>
    %c0_i32_220 = arith.constant 0 : i32
    %c7_i32_221 = arith.constant 7 : i32
    %520 = arith.subi %c7_i32_221, %c0_i32_220 : i32
    %521 = arith.index_cast %520 : i32 to index
    %c0_222 = arith.constant 0 : index
    %522 = vector.load %arg27[%521, %c0_222] : memref<8x8xf32, #tpu.memory_space<vmem>>, vector<1x8xf32>
    %523 = arith.index_cast %520 : i32 to index
    %c0_223 = arith.constant 0 : index
    %524 = vector.load %arg28[%523, %c0_223] : memref<8x8xf32, #tpu.memory_space<vmem>>, vector<1x8xf32>
    %525 = arith.index_cast %520 : i32 to index
    %c0_224 = arith.constant 0 : index
    %c0_225 = arith.constant 0 : index
    %526 = vector.load %arg26[%525, %c0_224, %c0_225] : memref<9x8x8xf32, #tpu.memory_space<vmem>>, vector<1x8x8xf32>
    %527 = vector.shape_cast %526 : vector<1x8x8xf32> to vector<8x8xf32>
    %c0_i32_226 = arith.constant 0 : i32
    %528 = vector.broadcast %c0_i32_226 : i32 to vector<8x8xi32>
    %529 = arith.cmpi eq, %227, %528 : vector<8x8xi32>
    %c1_i32_227 = arith.constant 1 : i32
    %530 = tpu.dynamic_rotate %527 by %c1_i32_227 dim 0 : vector<8x8xf32>, i32 -> vector<8x8xf32>
    %cst_228 = arith.constant -1.000000e+30 : f32
    %531 = vector.broadcast %cst_228 : f32 to vector<8x8xf32>
    %532 = arith.select %529, %531, %530 : vector<8x8xi1>, vector<8x8xf32>
    %c1_i32_229 = arith.constant 1 : i32
    %533 = vector.broadcast %c1_i32_229 : i32 to vector<8x8xi32>
    %534 = arith.cmpi sge, %227, %533 : vector<8x8xi32>
    %c5_i32_230 = arith.constant 5 : i32
    %535 = vector.broadcast %c5_i32_230 : i32 to vector<8x8xi32>
    %536 = arith.cmpi sle, %227, %535 : vector<8x8xi32>
    %537 = arith.andi %534, %536 : vector<8x8xi1>
    %538 = arith.addf %532, %519 : vector<8x8xf32>
    %cst_231 = arith.constant -1.000000e+30 : f32
    %539 = vector.broadcast %cst_231 : f32 to vector<8x8xf32>
    %540 = arith.select %537, %538, %539 : vector<8x8xi1>, vector<8x8xf32>
    %cst_232 = arith.constant dense<0xFF800000> : vector<8xf32>
    %541 = vector.multi_reduction <maximumf>, %540, %cst_232 [0] : vector<8x8xf32> to vector<8xf32>
    %542 = vector.shape_cast %541 : vector<8xf32> to vector<1x8xf32>
    %543 = vector.broadcast %542 : vector<1x8xf32> to vector<8x8xf32>
    %544 = arith.subf %540, %543 : vector<8x8xf32>
    %545 = math.exp %544 : vector<8x8xf32>
    %cst_233 = arith.constant dense<0.000000e+00> : vector<8xf32>
    %546 = vector.multi_reduction <add>, %545, %cst_233 [0] : vector<8x8xf32> to vector<8xf32>
    %547 = vector.shape_cast %546 : vector<8xf32> to vector<1x8xf32>
    %548 = math.log %547 : vector<1x8xf32>
    %549 = arith.addf %542, %548 : vector<1x8xf32>
    %550 = arith.addf %522, %549 : vector<1x8xf32>
    %551 = arith.addf %550, %514 : vector<1x8xf32>
    %552 = vector.broadcast %520 : i32 to vector<1x8xi32>
    %553 = arith.cmpi slt, %552, %154 : vector<1x8xi32>
    %554 = arith.andi %553, %510 : vector<1x8xi1>
    %cst_234 = arith.constant 0.000000e+00 : f32
    %555 = vector.broadcast %cst_234 : f32 to vector<1x8xf32>
    %556 = arith.minimumf %551, %555 : vector<1x8xf32>
    %557 = math.exp %556 : vector<1x8xf32>
    %cst_235 = arith.constant 0.000000e+00 : f32
    %558 = vector.broadcast %cst_235 : f32 to vector<1x8xf32>
    %559 = arith.select %554, %557, %558 : vector<1x8xi1>, vector<1x8xf32>
    %560 = arith.index_cast %520 : i32 to index
    %c0_236 = arith.constant 0 : index
    %561 = vector.load %arg21[%560, %c0_236] : memref<8x8xf32, #tpu.memory_space<vmem>>, vector<1x8xf32>
    tpu.vector_store %arg21[%560, %c0_236], %559 {strides = array<i32>} : memref<8x8xf32, #tpu.memory_space<vmem>>, vector<1x8xf32>,
    %c7_i32_237 = arith.constant 7 : i32
    %562 = vector.broadcast %c7_i32_237 : i32 to vector<8x8xi32>
    %563 = arith.cmpi eq, %227, %562 : vector<8x8xi32>
    %c7_i32_238 = arith.constant 7 : i32
    %564 = tpu.dynamic_rotate %519 by %c7_i32_238 dim 0 : vector<8x8xf32>, i32 -> vector<8x8xf32>
    %cst_239 = arith.constant -1.000000e+30 : f32
    %565 = vector.broadcast %cst_239 : f32 to vector<8x8xf32>
    %566 = arith.select %563, %565, %564 : vector<8x8xi1>, vector<8x8xf32>
    %567 = vector.broadcast %524 : vector<1x8xf32> to vector<8x8xf32>
    %568 = arith.addf %519, %567 : vector<8x8xf32>
    %569 = vector.broadcast %522 : vector<1x8xf32> to vector<8x8xf32>
    %570 = arith.addf %566, %569 : vector<8x8xf32>
    %571 = arith.maximumf %568, %570 : vector<8x8xf32>
    %572 = arith.subf %568, %571 : vector<8x8xf32>
    %573 = math.exp %572 : vector<8x8xf32>
    %574 = arith.subf %570, %571 : vector<8x8xf32>
    %575 = math.exp %574 : vector<8x8xf32>
    %576 = arith.addf %573, %575 : vector<8x8xf32>
    %577 = math.log %576 : vector<8x8xf32>
    %578 = arith.addf %571, %577 : vector<8x8xf32>
    %c5_i32_240 = arith.constant 5 : i32
    %579 = vector.broadcast %c5_i32_240 : i32 to vector<8x8xi32>
    %580 = arith.cmpi sle, %227, %579 : vector<8x8xi32>
    %581 = vector.broadcast %520 : i32 to vector<8x8xi32>
    %582 = arith.cmpi sle, %227, %581 : vector<8x8xi32>
    %583 = vector.broadcast %520 : i32 to vector<1x8xi32>
    %584 = arith.cmpi sge, %583, %154 : vector<1x8xi32>
    %585 = vector.broadcast %584 : vector<1x8xi1> to vector<8x8xi1>
    %586 = arith.ori %582, %585 : vector<8x8xi1>
    %587 = arith.andi %580, %586 : vector<8x8xi1>
    %cst_241 = arith.constant -1.000000e+30 : f32
    %588 = vector.broadcast %cst_241 : f32 to vector<8x8xf32>
    %589 = arith.select %587, %578, %588 : vector<8x8xi1>, vector<8x8xf32>
    %c1_i32_242 = arith.constant 1 : i32
    %c7_i32_243 = arith.constant 7 : i32
    %590 = arith.subi %c7_i32_243, %c1_i32_242 : i32
    %591 = arith.index_cast %590 : i32 to index
    %c0_244 = arith.constant 0 : index
    %592 = vector.load %arg27[%591, %c0_244] : memref<8x8xf32, #tpu.memory_space<vmem>>, vector<1x8xf32>
    %593 = arith.index_cast %590 : i32 to index
    %c0_245 = arith.constant 0 : index
    %594 = vector.load %arg28[%593, %c0_245] : memref<8x8xf32, #tpu.memory_space<vmem>>, vector<1x8xf32>
    %595 = arith.index_cast %590 : i32 to index
    %c0_246 = arith.constant 0 : index
    %c0_247 = arith.constant 0 : index
    %596 = vector.load %arg26[%595, %c0_246, %c0_247] : memref<9x8x8xf32, #tpu.memory_space<vmem>>, vector<1x8x8xf32>
    %597 = vector.shape_cast %596 : vector<1x8x8xf32> to vector<8x8xf32>
    %c0_i32_248 = arith.constant 0 : i32
    %598 = vector.broadcast %c0_i32_248 : i32 to vector<8x8xi32>
    %599 = arith.cmpi eq, %227, %598 : vector<8x8xi32>
    %c1_i32_249 = arith.constant 1 : i32
    %600 = tpu.dynamic_rotate %597 by %c1_i32_249 dim 0 : vector<8x8xf32>, i32 -> vector<8x8xf32>
    %cst_250 = arith.constant -1.000000e+30 : f32
    %601 = vector.broadcast %cst_250 : f32 to vector<8x8xf32>
    %602 = arith.select %599, %601, %600 : vector<8x8xi1>, vector<8x8xf32>
    %c1_i32_251 = arith.constant 1 : i32
    %603 = vector.broadcast %c1_i32_251 : i32 to vector<8x8xi32>
    %604 = arith.cmpi sge, %227, %603 : vector<8x8xi32>
    %c5_i32_252 = arith.constant 5 : i32
    %605 = vector.broadcast %c5_i32_252 : i32 to vector<8x8xi32>
    %606 = arith.cmpi sle, %227, %605 : vector<8x8xi32>
    %607 = arith.andi %604, %606 : vector<8x8xi1>
    %608 = arith.addf %602, %589 : vector<8x8xf32>
    %cst_253 = arith.constant -1.000000e+30 : f32
    %609 = vector.broadcast %cst_253 : f32 to vector<8x8xf32>
    %610 = arith.select %607, %608, %609 : vector<8x8xi1>, vector<8x8xf32>
    %cst_254 = arith.constant dense<0xFF800000> : vector<8xf32>
    %611 = vector.multi_reduction <maximumf>, %610, %cst_254 [0] : vector<8x8xf32> to vector<8xf32>
    %612 = vector.shape_cast %611 : vector<8xf32> to vector<1x8xf32>
    %613 = vector.broadcast %612 : vector<1x8xf32> to vector<8x8xf32>
    %614 = arith.subf %610, %613 : vector<8x8xf32>
    %615 = math.exp %614 : vector<8x8xf32>
    %cst_255 = arith.constant dense<0.000000e+00> : vector<8xf32>
    %616 = vector.multi_reduction <add>, %615, %cst_255 [0] : vector<8x8xf32> to vector<8xf32>
    %617 = vector.shape_cast %616 : vector<8xf32> to vector<1x8xf32>
    %618 = math.log %617 : vector<1x8xf32>
    %619 = arith.addf %612, %618 : vector<1x8xf32>
    %620 = arith.addf %592, %619 : vector<1x8xf32>
    %621 = arith.addf %620, %514 : vector<1x8xf32>
    %622 = vector.broadcast %590 : i32 to vector<1x8xi32>
    %623 = arith.cmpi slt, %622, %154 : vector<1x8xi32>
    %624 = arith.andi %623, %510 : vector<1x8xi1>
    %cst_256 = arith.constant 0.000000e+00 : f32
    %625 = vector.broadcast %cst_256 : f32 to vector<1x8xf32>
    %626 = arith.minimumf %621, %625 : vector<1x8xf32>
    %627 = math.exp %626 : vector<1x8xf32>
    %cst_257 = arith.constant 0.000000e+00 : f32
    %628 = vector.broadcast %cst_257 : f32 to vector<1x8xf32>
    %629 = arith.select %624, %627, %628 : vector<1x8xi1>, vector<1x8xf32>
    %630 = arith.index_cast %590 : i32 to index
    %c0_258 = arith.constant 0 : index
    %631 = vector.load %arg21[%630, %c0_258] : memref<8x8xf32, #tpu.memory_space<vmem>>, vector<1x8xf32>
    tpu.vector_store %arg21[%630, %c0_258], %629 {strides = array<i32>} : memref<8x8xf32, #tpu.memory_space<vmem>>, vector<1x8xf32>,
    %c7_i32_259 = arith.constant 7 : i32
    %632 = vector.broadcast %c7_i32_259 : i32 to vector<8x8xi32>
    %633 = arith.cmpi eq, %227, %632 : vector<8x8xi32>
    %c7_i32_260 = arith.constant 7 : i32
    %634 = tpu.dynamic_rotate %589 by %c7_i32_260 dim 0 : vector<8x8xf32>, i32 -> vector<8x8xf32>
    %cst_261 = arith.constant -1.000000e+30 : f32
    %635 = vector.broadcast %cst_261 : f32 to vector<8x8xf32>
    %636 = arith.select %633, %635, %634 : vector<8x8xi1>, vector<8x8xf32>
    %637 = vector.broadcast %594 : vector<1x8xf32> to vector<8x8xf32>
    %638 = arith.addf %589, %637 : vector<8x8xf32>
    %639 = vector.broadcast %592 : vector<1x8xf32> to vector<8x8xf32>
    %640 = arith.addf %636, %639 : vector<8x8xf32>
    %641 = arith.maximumf %638, %640 : vector<8x8xf32>
    %642 = arith.subf %638, %641 : vector<8x8xf32>
    %643 = math.exp %642 : vector<8x8xf32>
    %644 = arith.subf %640, %641 : vector<8x8xf32>
    %645 = math.exp %644 : vector<8x8xf32>
    %646 = arith.addf %643, %645 : vector<8x8xf32>
    %647 = math.log %646 : vector<8x8xf32>
    %648 = arith.addf %641, %647 : vector<8x8xf32>
    %c5_i32_262 = arith.constant 5 : i32
    %649 = vector.broadcast %c5_i32_262 : i32 to vector<8x8xi32>
    %650 = arith.cmpi sle, %227, %649 : vector<8x8xi32>
    %651 = vector.broadcast %590 : i32 to vector<8x8xi32>
    %652 = arith.cmpi sle, %227, %651 : vector<8x8xi32>
    %653 = vector.broadcast %590 : i32 to vector<1x8xi32>
    %654 = arith.cmpi sge, %653, %154 : vector<1x8xi32>
    %655 = vector.broadcast %654 : vector<1x8xi1> to vector<8x8xi1>
    %656 = arith.ori %652, %655 : vector<8x8xi1>
    %657 = arith.andi %650, %656 : vector<8x8xi1>
    %cst_263 = arith.constant -1.000000e+30 : f32
    %658 = vector.broadcast %cst_263 : f32 to vector<8x8xf32>
    %659 = arith.select %657, %648, %658 : vector<8x8xi1>, vector<8x8xf32>
    %c2_i32_264 = arith.constant 2 : i32
    %c7_i32_265 = arith.constant 7 : i32
    %660 = arith.subi %c7_i32_265, %c2_i32_264 : i32
    %661 = arith.index_cast %660 : i32 to index
    %c0_266 = arith.constant 0 : index
    %662 = vector.load %arg27[%661, %c0_266] : memref<8x8xf32, #tpu.memory_space<vmem>>, vector<1x8xf32>
    %663 = arith.index_cast %660 : i32 to index
    %c0_267 = arith.constant 0 : index
    %664 = vector.load %arg28[%663, %c0_267] : memref<8x8xf32, #tpu.memory_space<vmem>>, vector<1x8xf32>
    %665 = arith.index_cast %660 : i32 to index
    %c0_268 = arith.constant 0 : index
    %c0_269 = arith.constant 0 : index
    %666 = vector.load %arg26[%665, %c0_268, %c0_269] : memref<9x8x8xf32, #tpu.memory_space<vmem>>, vector<1x8x8xf32>
    %667 = vector.shape_cast %666 : vector<1x8x8xf32> to vector<8x8xf32>
    %c0_i32_270 = arith.constant 0 : i32
    %668 = vector.broadcast %c0_i32_270 : i32 to vector<8x8xi32>
    %669 = arith.cmpi eq, %227, %668 : vector<8x8xi32>
    %c1_i32_271 = arith.constant 1 : i32
    %670 = tpu.dynamic_rotate %667 by %c1_i32_271 dim 0 : vector<8x8xf32>, i32 -> vector<8x8xf32>
    %cst_272 = arith.constant -1.000000e+30 : f32
    %671 = vector.broadcast %cst_272 : f32 to vector<8x8xf32>
    %672 = arith.select %669, %671, %670 : vector<8x8xi1>, vector<8x8xf32>
    %c1_i32_273 = arith.constant 1 : i32
    %673 = vector.broadcast %c1_i32_273 : i32 to vector<8x8xi32>
    %674 = arith.cmpi sge, %227, %673 : vector<8x8xi32>
    %c5_i32_274 = arith.constant 5 : i32
    %675 = vector.broadcast %c5_i32_274 : i32 to vector<8x8xi32>
    %676 = arith.cmpi sle, %227, %675 : vector<8x8xi32>
    %677 = arith.andi %674, %676 : vector<8x8xi1>
    %678 = arith.addf %672, %659 : vector<8x8xf32>
    %cst_275 = arith.constant -1.000000e+30 : f32
    %679 = vector.broadcast %cst_275 : f32 to vector<8x8xf32>
    %680 = arith.select %677, %678, %679 : vector<8x8xi1>, vector<8x8xf32>
    %cst_276 = arith.constant dense<0xFF800000> : vector<8xf32>
    %681 = vector.multi_reduction <maximumf>, %680, %cst_276 [0] : vector<8x8xf32> to vector<8xf32>
    %682 = vector.shape_cast %681 : vector<8xf32> to vector<1x8xf32>
    %683 = vector.broadcast %682 : vector<1x8xf32> to vector<8x8xf32>
    %684 = arith.subf %680, %683 : vector<8x8xf32>
    %685 = math.exp %684 : vector<8x8xf32>
    %cst_277 = arith.constant dense<0.000000e+00> : vector<8xf32>
    %686 = vector.multi_reduction <add>, %685, %cst_277 [0] : vector<8x8xf32> to vector<8xf32>
    %687 = vector.shape_cast %686 : vector<8xf32> to vector<1x8xf32>
    %688 = math.log %687 : vector<1x8xf32>
    %689 = arith.addf %682, %688 : vector<1x8xf32>
    %690 = arith.addf %662, %689 : vector<1x8xf32>
    %691 = arith.addf %690, %514 : vector<1x8xf32>
    %692 = vector.broadcast %660 : i32 to vector<1x8xi32>
    %693 = arith.cmpi slt, %692, %154 : vector<1x8xi32>
    %694 = arith.andi %693, %510 : vector<1x8xi1>
    %cst_278 = arith.constant 0.000000e+00 : f32
    %695 = vector.broadcast %cst_278 : f32 to vector<1x8xf32>
    %696 = arith.minimumf %691, %695 : vector<1x8xf32>
    %697 = math.exp %696 : vector<1x8xf32>
    %cst_279 = arith.constant 0.000000e+00 : f32
    %698 = vector.broadcast %cst_279 : f32 to vector<1x8xf32>
    %699 = arith.select %694, %697, %698 : vector<1x8xi1>, vector<1x8xf32>
    %700 = arith.index_cast %660 : i32 to index
    %c0_280 = arith.constant 0 : index
    %701 = vector.load %arg21[%700, %c0_280] : memref<8x8xf32, #tpu.memory_space<vmem>>, vector<1x8xf32>
    tpu.vector_store %arg21[%700, %c0_280], %699 {strides = array<i32>} : memref<8x8xf32, #tpu.memory_space<vmem>>, vector<1x8xf32>,
    %c7_i32_281 = arith.constant 7 : i32
    %702 = vector.broadcast %c7_i32_281 : i32 to vector<8x8xi32>
    %703 = arith.cmpi eq, %227, %702 : vector<8x8xi32>
    %c7_i32_282 = arith.constant 7 : i32
    %704 = tpu.dynamic_rotate %659 by %c7_i32_282 dim 0 : vector<8x8xf32>, i32 -> vector<8x8xf32>
    %cst_283 = arith.constant -1.000000e+30 : f32
    %705 = vector.broadcast %cst_283 : f32 to vector<8x8xf32>
    %706 = arith.select %703, %705, %704 : vector<8x8xi1>, vector<8x8xf32>
    %707 = vector.broadcast %664 : vector<1x8xf32> to vector<8x8xf32>
    %708 = arith.addf %659, %707 : vector<8x8xf32>
    %709 = vector.broadcast %662 : vector<1x8xf32> to vector<8x8xf32>
    %710 = arith.addf %706, %709 : vector<8x8xf32>
    %711 = arith.maximumf %708, %710 : vector<8x8xf32>
    %712 = arith.subf %708, %711 : vector<8x8xf32>
    %713 = math.exp %712 : vector<8x8xf32>
    %714 = arith.subf %710, %711 : vector<8x8xf32>
    %715 = math.exp %714 : vector<8x8xf32>
    %716 = arith.addf %713, %715 : vector<8x8xf32>
    %717 = math.log %716 : vector<8x8xf32>
    %718 = arith.addf %711, %717 : vector<8x8xf32>
    %c5_i32_284 = arith.constant 5 : i32
    %719 = vector.broadcast %c5_i32_284 : i32 to vector<8x8xi32>
    %720 = arith.cmpi sle, %227, %719 : vector<8x8xi32>
    %721 = vector.broadcast %660 : i32 to vector<8x8xi32>
    %722 = arith.cmpi sle, %227, %721 : vector<8x8xi32>
    %723 = vector.broadcast %660 : i32 to vector<1x8xi32>
    %724 = arith.cmpi sge, %723, %154 : vector<1x8xi32>
    %725 = vector.broadcast %724 : vector<1x8xi1> to vector<8x8xi1>
    %726 = arith.ori %722, %725 : vector<8x8xi1>
    %727 = arith.andi %720, %726 : vector<8x8xi1>
    %cst_285 = arith.constant -1.000000e+30 : f32
    %728 = vector.broadcast %cst_285 : f32 to vector<8x8xf32>
    %729 = arith.select %727, %718, %728 : vector<8x8xi1>, vector<8x8xf32>
    %c3_i32_286 = arith.constant 3 : i32
    %c7_i32_287 = arith.constant 7 : i32
    %730 = arith.subi %c7_i32_287, %c3_i32_286 : i32
    %731 = arith.index_cast %730 : i32 to index
    %c0_288 = arith.constant 0 : index
    %732 = vector.load %arg27[%731, %c0_288] : memref<8x8xf32, #tpu.memory_space<vmem>>, vector<1x8xf32>
    %733 = arith.index_cast %730 : i32 to index
    %c0_289 = arith.constant 0 : index
    %734 = vector.load %arg28[%733, %c0_289] : memref<8x8xf32, #tpu.memory_space<vmem>>, vector<1x8xf32>
    %735 = arith.index_cast %730 : i32 to index
    %c0_290 = arith.constant 0 : index
    %c0_291 = arith.constant 0 : index
    %736 = vector.load %arg26[%735, %c0_290, %c0_291] : memref<9x8x8xf32, #tpu.memory_space<vmem>>, vector<1x8x8xf32>
    %737 = vector.shape_cast %736 : vector<1x8x8xf32> to vector<8x8xf32>
    %c0_i32_292 = arith.constant 0 : i32
    %738 = vector.broadcast %c0_i32_292 : i32 to vector<8x8xi32>
    %739 = arith.cmpi eq, %227, %738 : vector<8x8xi32>
    %c1_i32_293 = arith.constant 1 : i32
    %740 = tpu.dynamic_rotate %737 by %c1_i32_293 dim 0 : vector<8x8xf32>, i32 -> vector<8x8xf32>
    %cst_294 = arith.constant -1.000000e+30 : f32
    %741 = vector.broadcast %cst_294 : f32 to vector<8x8xf32>
    %742 = arith.select %739, %741, %740 : vector<8x8xi1>, vector<8x8xf32>
    %c1_i32_295 = arith.constant 1 : i32
    %743 = vector.broadcast %c1_i32_295 : i32 to vector<8x8xi32>
    %744 = arith.cmpi sge, %227, %743 : vector<8x8xi32>
    %c5_i32_296 = arith.constant 5 : i32
    %745 = vector.broadcast %c5_i32_296 : i32 to vector<8x8xi32>
    %746 = arith.cmpi sle, %227, %745 : vector<8x8xi32>
    %747 = arith.andi %744, %746 : vector<8x8xi1>
    %748 = arith.addf %742, %729 : vector<8x8xf32>
    %cst_297 = arith.constant -1.000000e+30 : f32
    %749 = vector.broadcast %cst_297 : f32 to vector<8x8xf32>
    %750 = arith.select %747, %748, %749 : vector<8x8xi1>, vector<8x8xf32>
    %cst_298 = arith.constant dense<0xFF800000> : vector<8xf32>
    %751 = vector.multi_reduction <maximumf>, %750, %cst_298 [0] : vector<8x8xf32> to vector<8xf32>
    %752 = vector.shape_cast %751 : vector<8xf32> to vector<1x8xf32>
    %753 = vector.broadcast %752 : vector<1x8xf32> to vector<8x8xf32>
    %754 = arith.subf %750, %753 : vector<8x8xf32>
    %755 = math.exp %754 : vector<8x8xf32>
    %cst_299 = arith.constant dense<0.000000e+00> : vector<8xf32>
    %756 = vector.multi_reduction <add>, %755, %cst_299 [0] : vector<8x8xf32> to vector<8xf32>
    %757 = vector.shape_cast %756 : vector<8xf32> to vector<1x8xf32>
    %758 = math.log %757 : vector<1x8xf32>
    %759 = arith.addf %752, %758 : vector<1x8xf32>
    %760 = arith.addf %732, %759 : vector<1x8xf32>
    %761 = arith.addf %760, %514 : vector<1x8xf32>
    %762 = vector.broadcast %730 : i32 to vector<1x8xi32>
    %763 = arith.cmpi slt, %762, %154 : vector<1x8xi32>
    %764 = arith.andi %763, %510 : vector<1x8xi1>
    %cst_300 = arith.constant 0.000000e+00 : f32
    %765 = vector.broadcast %cst_300 : f32 to vector<1x8xf32>
    %766 = arith.minimumf %761, %765 : vector<1x8xf32>
    %767 = math.exp %766 : vector<1x8xf32>
    %cst_301 = arith.constant 0.000000e+00 : f32
    %768 = vector.broadcast %cst_301 : f32 to vector<1x8xf32>
    %769 = arith.select %764, %767, %768 : vector<1x8xi1>, vector<1x8xf32>
    %770 = arith.index_cast %730 : i32 to index
    %c0_302 = arith.constant 0 : index
    %771 = vector.load %arg21[%770, %c0_302] : memref<8x8xf32, #tpu.memory_space<vmem>>, vector<1x8xf32>
    tpu.vector_store %arg21[%770, %c0_302], %769 {strides = array<i32>} : memref<8x8xf32, #tpu.memory_space<vmem>>, vector<1x8xf32>,
    %c7_i32_303 = arith.constant 7 : i32
    %772 = vector.broadcast %c7_i32_303 : i32 to vector<8x8xi32>
    %773 = arith.cmpi eq, %227, %772 : vector<8x8xi32>
    %c7_i32_304 = arith.constant 7 : i32
    %774 = tpu.dynamic_rotate %729 by %c7_i32_304 dim 0 : vector<8x8xf32>, i32 -> vector<8x8xf32>
    %cst_305 = arith.constant -1.000000e+30 : f32
    %775 = vector.broadcast %cst_305 : f32 to vector<8x8xf32>
    %776 = arith.select %773, %775, %774 : vector<8x8xi1>, vector<8x8xf32>
    %777 = vector.broadcast %734 : vector<1x8xf32> to vector<8x8xf32>
    %778 = arith.addf %729, %777 : vector<8x8xf32>
    %779 = vector.broadcast %732 : vector<1x8xf32> to vector<8x8xf32>
    %780 = arith.addf %776, %779 : vector<8x8xf32>
    %781 = arith.maximumf %778, %780 : vector<8x8xf32>
    %782 = arith.subf %778, %781 : vector<8x8xf32>
    %783 = math.exp %782 : vector<8x8xf32>
    %784 = arith.subf %780, %781 : vector<8x8xf32>
    %785 = math.exp %784 : vector<8x8xf32>
    %786 = arith.addf %783, %785 : vector<8x8xf32>
    %787 = math.log %786 : vector<8x8xf32>
    %788 = arith.addf %781, %787 : vector<8x8xf32>
    %c5_i32_306 = arith.constant 5 : i32
    %789 = vector.broadcast %c5_i32_306 : i32 to vector<8x8xi32>
    %790 = arith.cmpi sle, %227, %789 : vector<8x8xi32>
    %791 = vector.broadcast %730 : i32 to vector<8x8xi32>
    %792 = arith.cmpi sle, %227, %791 : vector<8x8xi32>
    %793 = vector.broadcast %730 : i32 to vector<1x8xi32>
    %794 = arith.cmpi sge, %793, %154 : vector<1x8xi32>
    %795 = vector.broadcast %794 : vector<1x8xi1> to vector<8x8xi1>
    %796 = arith.ori %792, %795 : vector<8x8xi1>
    %797 = arith.andi %790, %796 : vector<8x8xi1>
    %cst_307 = arith.constant -1.000000e+30 : f32
    %798 = vector.broadcast %cst_307 : f32 to vector<8x8xf32>
    %799 = arith.select %797, %788, %798 : vector<8x8xi1>, vector<8x8xf32>
    %c4_i32_308 = arith.constant 4 : i32
    %c7_i32_309 = arith.constant 7 : i32
    %800 = arith.subi %c7_i32_309, %c4_i32_308 : i32
    %801 = arith.index_cast %800 : i32 to index
    %c0_310 = arith.constant 0 : index
    %802 = vector.load %arg27[%801, %c0_310] : memref<8x8xf32, #tpu.memory_space<vmem>>, vector<1x8xf32>
    %803 = arith.index_cast %800 : i32 to index
    %c0_311 = arith.constant 0 : index
    %804 = vector.load %arg28[%803, %c0_311] : memref<8x8xf32, #tpu.memory_space<vmem>>, vector<1x8xf32>
    %805 = arith.index_cast %800 : i32 to index
    %c0_312 = arith.constant 0 : index
    %c0_313 = arith.constant 0 : index
    %806 = vector.load %arg26[%805, %c0_312, %c0_313] : memref<9x8x8xf32, #tpu.memory_space<vmem>>, vector<1x8x8xf32>
    %807 = vector.shape_cast %806 : vector<1x8x8xf32> to vector<8x8xf32>
    %c0_i32_314 = arith.constant 0 : i32
    %808 = vector.broadcast %c0_i32_314 : i32 to vector<8x8xi32>
    %809 = arith.cmpi eq, %227, %808 : vector<8x8xi32>
    %c1_i32_315 = arith.constant 1 : i32
    %810 = tpu.dynamic_rotate %807 by %c1_i32_315 dim 0 : vector<8x8xf32>, i32 -> vector<8x8xf32>
    %cst_316 = arith.constant -1.000000e+30 : f32
    %811 = vector.broadcast %cst_316 : f32 to vector<8x8xf32>
    %812 = arith.select %809, %811, %810 : vector<8x8xi1>, vector<8x8xf32>
    %c1_i32_317 = arith.constant 1 : i32
    %813 = vector.broadcast %c1_i32_317 : i32 to vector<8x8xi32>
    %814 = arith.cmpi sge, %227, %813 : vector<8x8xi32>
    %c5_i32_318 = arith.constant 5 : i32
    %815 = vector.broadcast %c5_i32_318 : i32 to vector<8x8xi32>
    %816 = arith.cmpi sle, %227, %815 : vector<8x8xi32>
    %817 = arith.andi %814, %816 : vector<8x8xi1>
    %818 = arith.addf %812, %799 : vector<8x8xf32>
    %cst_319 = arith.constant -1.000000e+30 : f32
    %819 = vector.broadcast %cst_319 : f32 to vector<8x8xf32>
    %820 = arith.select %817, %818, %819 : vector<8x8xi1>, vector<8x8xf32>
    %cst_320 = arith.constant dense<0xFF800000> : vector<8xf32>
    %821 = vector.multi_reduction <maximumf>, %820, %cst_320 [0] : vector<8x8xf32> to vector<8xf32>
    %822 = vector.shape_cast %821 : vector<8xf32> to vector<1x8xf32>
    %823 = vector.broadcast %822 : vector<1x8xf32> to vector<8x8xf32>
    %824 = arith.subf %820, %823 : vector<8x8xf32>
    %825 = math.exp %824 : vector<8x8xf32>
    %cst_321 = arith.constant dense<0.000000e+00> : vector<8xf32>
    %826 = vector.multi_reduction <add>, %825, %cst_321 [0] : vector<8x8xf32> to vector<8xf32>
    %827 = vector.shape_cast %826 : vector<8xf32> to vector<1x8xf32>
    %828 = math.log %827 : vector<1x8xf32>
    %829 = arith.addf %822, %828 : vector<1x8xf32>
    %830 = arith.addf %802, %829 : vector<1x8xf32>
    %831 = arith.addf %830, %514 : vector<1x8xf32>
    %832 = vector.broadcast %800 : i32 to vector<1x8xi32>
    %833 = arith.cmpi slt, %832, %154 : vector<1x8xi32>
    %834 = arith.andi %833, %510 : vector<1x8xi1>
    %cst_322 = arith.constant 0.000000e+00 : f32
    %835 = vector.broadcast %cst_322 : f32 to vector<1x8xf32>
    %836 = arith.minimumf %831, %835 : vector<1x8xf32>
    %837 = math.exp %836 : vector<1x8xf32>
    %cst_323 = arith.constant 0.000000e+00 : f32
    %838 = vector.broadcast %cst_323 : f32 to vector<1x8xf32>
    %839 = arith.select %834, %837, %838 : vector<1x8xi1>, vector<1x8xf32>
    %840 = arith.index_cast %800 : i32 to index
    %c0_324 = arith.constant 0 : index
    %841 = vector.load %arg21[%840, %c0_324] : memref<8x8xf32, #tpu.memory_space<vmem>>, vector<1x8xf32>
    tpu.vector_store %arg21[%840, %c0_324], %839 {strides = array<i32>} : memref<8x8xf32, #tpu.memory_space<vmem>>, vector<1x8xf32>,
    %c7_i32_325 = arith.constant 7 : i32
    %842 = vector.broadcast %c7_i32_325 : i32 to vector<8x8xi32>
    %843 = arith.cmpi eq, %227, %842 : vector<8x8xi32>
    %c7_i32_326 = arith.constant 7 : i32
    %844 = tpu.dynamic_rotate %799 by %c7_i32_326 dim 0 : vector<8x8xf32>, i32 -> vector<8x8xf32>
    %cst_327 = arith.constant -1.000000e+30 : f32
    %845 = vector.broadcast %cst_327 : f32 to vector<8x8xf32>
    %846 = arith.select %843, %845, %844 : vector<8x8xi1>, vector<8x8xf32>
    %847 = vector.broadcast %804 : vector<1x8xf32> to vector<8x8xf32>
    %848 = arith.addf %799, %847 : vector<8x8xf32>
    %849 = vector.broadcast %802 : vector<1x8xf32> to vector<8x8xf32>
    %850 = arith.addf %846, %849 : vector<8x8xf32>
    %851 = arith.maximumf %848, %850 : vector<8x8xf32>
    %852 = arith.subf %848, %851 : vector<8x8xf32>
    %853 = math.exp %852 : vector<8x8xf32>
    %854 = arith.subf %850, %851 : vector<8x8xf32>
    %855 = math.exp %854 : vector<8x8xf32>
    %856 = arith.addf %853, %855 : vector<8x8xf32>
    %857 = math.log %856 : vector<8x8xf32>
    %858 = arith.addf %851, %857 : vector<8x8xf32>
    %c5_i32_328 = arith.constant 5 : i32
    %859 = vector.broadcast %c5_i32_328 : i32 to vector<8x8xi32>
    %860 = arith.cmpi sle, %227, %859 : vector<8x8xi32>
    %861 = vector.broadcast %800 : i32 to vector<8x8xi32>
    %862 = arith.cmpi sle, %227, %861 : vector<8x8xi32>
    %863 = vector.broadcast %800 : i32 to vector<1x8xi32>
    %864 = arith.cmpi sge, %863, %154 : vector<1x8xi32>
    %865 = vector.broadcast %864 : vector<1x8xi1> to vector<8x8xi1>
    %866 = arith.ori %862, %865 : vector<8x8xi1>
    %867 = arith.andi %860, %866 : vector<8x8xi1>
    %cst_329 = arith.constant -1.000000e+30 : f32
    %868 = vector.broadcast %cst_329 : f32 to vector<8x8xf32>
    %869 = arith.select %867, %858, %868 : vector<8x8xi1>, vector<8x8xf32>
    %c5_i32_330 = arith.constant 5 : i32
    %c7_i32_331 = arith.constant 7 : i32
    %870 = arith.subi %c7_i32_331, %c5_i32_330 : i32
    %871 = arith.index_cast %870 : i32 to index
    %c0_332 = arith.constant 0 : index
    %872 = vector.load %arg27[%871, %c0_332] : memref<8x8xf32, #tpu.memory_space<vmem>>, vector<1x8xf32>
    %873 = arith.index_cast %870 : i32 to index
    %c0_333 = arith.constant 0 : index
    %874 = vector.load %arg28[%873, %c0_333] : memref<8x8xf32, #tpu.memory_space<vmem>>, vector<1x8xf32>
    %875 = arith.index_cast %870 : i32 to index
    %c0_334 = arith.constant 0 : index
    %c0_335 = arith.constant 0 : index
    %876 = vector.load %arg26[%875, %c0_334, %c0_335] : memref<9x8x8xf32, #tpu.memory_space<vmem>>, vector<1x8x8xf32>
    %877 = vector.shape_cast %876 : vector<1x8x8xf32> to vector<8x8xf32>
    %c0_i32_336 = arith.constant 0 : i32
    %878 = vector.broadcast %c0_i32_336 : i32 to vector<8x8xi32>
    %879 = arith.cmpi eq, %227, %878 : vector<8x8xi32>
    %c1_i32_337 = arith.constant 1 : i32
    %880 = tpu.dynamic_rotate %877 by %c1_i32_337 dim 0 : vector<8x8xf32>, i32 -> vector<8x8xf32>
    %cst_338 = arith.constant -1.000000e+30 : f32
    %881 = vector.broadcast %cst_338 : f32 to vector<8x8xf32>
    %882 = arith.select %879, %881, %880 : vector<8x8xi1>, vector<8x8xf32>
    %c1_i32_339 = arith.constant 1 : i32
    %883 = vector.broadcast %c1_i32_339 : i32 to vector<8x8xi32>
    %884 = arith.cmpi sge, %227, %883 : vector<8x8xi32>
    %c5_i32_340 = arith.constant 5 : i32
    %885 = vector.broadcast %c5_i32_340 : i32 to vector<8x8xi32>
    %886 = arith.cmpi sle, %227, %885 : vector<8x8xi32>
    %887 = arith.andi %884, %886 : vector<8x8xi1>
    %888 = arith.addf %882, %869 : vector<8x8xf32>
    %cst_341 = arith.constant -1.000000e+30 : f32
    %889 = vector.broadcast %cst_341 : f32 to vector<8x8xf32>
    %890 = arith.select %887, %888, %889 : vector<8x8xi1>, vector<8x8xf32>
    %cst_342 = arith.constant dense<0xFF800000> : vector<8xf32>
    %891 = vector.multi_reduction <maximumf>, %890, %cst_342 [0] : vector<8x8xf32> to vector<8xf32>
    %892 = vector.shape_cast %891 : vector<8xf32> to vector<1x8xf32>
    %893 = vector.broadcast %892 : vector<1x8xf32> to vector<8x8xf32>
    %894 = arith.subf %890, %893 : vector<8x8xf32>
    %895 = math.exp %894 : vector<8x8xf32>
    %cst_343 = arith.constant dense<0.000000e+00> : vector<8xf32>
    %896 = vector.multi_reduction <add>, %895, %cst_343 [0] : vector<8x8xf32> to vector<8xf32>
    %897 = vector.shape_cast %896 : vector<8xf32> to vector<1x8xf32>
    %898 = math.log %897 : vector<1x8xf32>
    %899 = arith.addf %892, %898 : vector<1x8xf32>
    %900 = arith.addf %872, %899 : vector<1x8xf32>
    %901 = arith.addf %900, %514 : vector<1x8xf32>
    %902 = vector.broadcast %870 : i32 to vector<1x8xi32>
    %903 = arith.cmpi slt, %902, %154 : vector<1x8xi32>
    %904 = arith.andi %903, %510 : vector<1x8xi1>
    %cst_344 = arith.constant 0.000000e+00 : f32
    %905 = vector.broadcast %cst_344 : f32 to vector<1x8xf32>
    %906 = arith.minimumf %901, %905 : vector<1x8xf32>
    %907 = math.exp %906 : vector<1x8xf32>
    %cst_345 = arith.constant 0.000000e+00 : f32
    %908 = vector.broadcast %cst_345 : f32 to vector<1x8xf32>
    %909 = arith.select %904, %907, %908 : vector<1x8xi1>, vector<1x8xf32>
    %910 = arith.index_cast %870 : i32 to index
    %c0_346 = arith.constant 0 : index
    %911 = vector.load %arg21[%910, %c0_346] : memref<8x8xf32, #tpu.memory_space<vmem>>, vector<1x8xf32>
    tpu.vector_store %arg21[%910, %c0_346], %909 {strides = array<i32>} : memref<8x8xf32, #tpu.memory_space<vmem>>, vector<1x8xf32>,
    %c7_i32_347 = arith.constant 7 : i32
    %912 = vector.broadcast %c7_i32_347 : i32 to vector<8x8xi32>
    %913 = arith.cmpi eq, %227, %912 : vector<8x8xi32>
    %c7_i32_348 = arith.constant 7 : i32
    %914 = tpu.dynamic_rotate %869 by %c7_i32_348 dim 0 : vector<8x8xf32>, i32 -> vector<8x8xf32>
    %cst_349 = arith.constant -1.000000e+30 : f32
    %915 = vector.broadcast %cst_349 : f32 to vector<8x8xf32>
    %916 = arith.select %913, %915, %914 : vector<8x8xi1>, vector<8x8xf32>
    %917 = vector.broadcast %874 : vector<1x8xf32> to vector<8x8xf32>
    %918 = arith.addf %869, %917 : vector<8x8xf32>
    %919 = vector.broadcast %872 : vector<1x8xf32> to vector<8x8xf32>
    %920 = arith.addf %916, %919 : vector<8x8xf32>
    %921 = arith.maximumf %918, %920 : vector<8x8xf32>
    %922 = arith.subf %918, %921 : vector<8x8xf32>
    %923 = math.exp %922 : vector<8x8xf32>
    %924 = arith.subf %920, %921 : vector<8x8xf32>
    %925 = math.exp %924 : vector<8x8xf32>
    %926 = arith.addf %923, %925 : vector<8x8xf32>
    %927 = math.log %926 : vector<8x8xf32>
    %928 = arith.addf %921, %927 : vector<8x8xf32>
    %c5_i32_350 = arith.constant 5 : i32
    %929 = vector.broadcast %c5_i32_350 : i32 to vector<8x8xi32>
    %930 = arith.cmpi sle, %227, %929 : vector<8x8xi32>
    %931 = vector.broadcast %870 : i32 to vector<8x8xi32>
    %932 = arith.cmpi sle, %227, %931 : vector<8x8xi32>
    %933 = vector.broadcast %870 : i32 to vector<1x8xi32>
    %934 = arith.cmpi sge, %933, %154 : vector<1x8xi32>
    %935 = vector.broadcast %934 : vector<1x8xi1> to vector<8x8xi1>
    %936 = arith.ori %932, %935 : vector<8x8xi1>
    %937 = arith.andi %930, %936 : vector<8x8xi1>
    %cst_351 = arith.constant -1.000000e+30 : f32
    %938 = vector.broadcast %cst_351 : f32 to vector<8x8xf32>
    %939 = arith.select %937, %928, %938 : vector<8x8xi1>, vector<8x8xf32>
    %c6_i32_352 = arith.constant 6 : i32
    %c7_i32_353 = arith.constant 7 : i32
    %940 = arith.subi %c7_i32_353, %c6_i32_352 : i32
    %941 = arith.index_cast %940 : i32 to index
    %c0_354 = arith.constant 0 : index
    %942 = vector.load %arg27[%941, %c0_354] : memref<8x8xf32, #tpu.memory_space<vmem>>, vector<1x8xf32>
    %943 = arith.index_cast %940 : i32 to index
    %c0_355 = arith.constant 0 : index
    %944 = vector.load %arg28[%943, %c0_355] : memref<8x8xf32, #tpu.memory_space<vmem>>, vector<1x8xf32>
    %945 = arith.index_cast %940 : i32 to index
    %c0_356 = arith.constant 0 : index
    %c0_357 = arith.constant 0 : index
    %946 = vector.load %arg26[%945, %c0_356, %c0_357] : memref<9x8x8xf32, #tpu.memory_space<vmem>>, vector<1x8x8xf32>
    %947 = vector.shape_cast %946 : vector<1x8x8xf32> to vector<8x8xf32>
    %c0_i32_358 = arith.constant 0 : i32
    %948 = vector.broadcast %c0_i32_358 : i32 to vector<8x8xi32>
    %949 = arith.cmpi eq, %227, %948 : vector<8x8xi32>
    %c1_i32_359 = arith.constant 1 : i32
    %950 = tpu.dynamic_rotate %947 by %c1_i32_359 dim 0 : vector<8x8xf32>, i32 -> vector<8x8xf32>
    %cst_360 = arith.constant -1.000000e+30 : f32
    %951 = vector.broadcast %cst_360 : f32 to vector<8x8xf32>
    %952 = arith.select %949, %951, %950 : vector<8x8xi1>, vector<8x8xf32>
    %c1_i32_361 = arith.constant 1 : i32
    %953 = vector.broadcast %c1_i32_361 : i32 to vector<8x8xi32>
    %954 = arith.cmpi sge, %227, %953 : vector<8x8xi32>
    %c5_i32_362 = arith.constant 5 : i32
    %955 = vector.broadcast %c5_i32_362 : i32 to vector<8x8xi32>
    %956 = arith.cmpi sle, %227, %955 : vector<8x8xi32>
    %957 = arith.andi %954, %956 : vector<8x8xi1>
    %958 = arith.addf %952, %939 : vector<8x8xf32>
    %cst_363 = arith.constant -1.000000e+30 : f32
    %959 = vector.broadcast %cst_363 : f32 to vector<8x8xf32>
    %960 = arith.select %957, %958, %959 : vector<8x8xi1>, vector<8x8xf32>
    %cst_364 = arith.constant dense<0xFF800000> : vector<8xf32>
    %961 = vector.multi_reduction <maximumf>, %960, %cst_364 [0] : vector<8x8xf32> to vector<8xf32>
    %962 = vector.shape_cast %961 : vector<8xf32> to vector<1x8xf32>
    %963 = vector.broadcast %962 : vector<1x8xf32> to vector<8x8xf32>
    %964 = arith.subf %960, %963 : vector<8x8xf32>
    %965 = math.exp %964 : vector<8x8xf32>
    %cst_365 = arith.constant dense<0.000000e+00> : vector<8xf32>
    %966 = vector.multi_reduction <add>, %965, %cst_365 [0] : vector<8x8xf32> to vector<8xf32>
    %967 = vector.shape_cast %966 : vector<8xf32> to vector<1x8xf32>
    %968 = math.log %967 : vector<1x8xf32>
    %969 = arith.addf %962, %968 : vector<1x8xf32>
    %970 = arith.addf %942, %969 : vector<1x8xf32>
    %971 = arith.addf %970, %514 : vector<1x8xf32>
    %972 = vector.broadcast %940 : i32 to vector<1x8xi32>
    %973 = arith.cmpi slt, %972, %154 : vector<1x8xi32>
    %974 = arith.andi %973, %510 : vector<1x8xi1>
    %cst_366 = arith.constant 0.000000e+00 : f32
    %975 = vector.broadcast %cst_366 : f32 to vector<1x8xf32>
    %976 = arith.minimumf %971, %975 : vector<1x8xf32>
    %977 = math.exp %976 : vector<1x8xf32>
    %cst_367 = arith.constant 0.000000e+00 : f32
    %978 = vector.broadcast %cst_367 : f32 to vector<1x8xf32>
    %979 = arith.select %974, %977, %978 : vector<1x8xi1>, vector<1x8xf32>
    %980 = arith.index_cast %940 : i32 to index
    %c0_368 = arith.constant 0 : index
    %981 = vector.load %arg21[%980, %c0_368] : memref<8x8xf32, #tpu.memory_space<vmem>>, vector<1x8xf32>
    tpu.vector_store %arg21[%980, %c0_368], %979 {strides = array<i32>} : memref<8x8xf32, #tpu.memory_space<vmem>>, vector<1x8xf32>,
    %c7_i32_369 = arith.constant 7 : i32
    %982 = vector.broadcast %c7_i32_369 : i32 to vector<8x8xi32>
    %983 = arith.cmpi eq, %227, %982 : vector<8x8xi32>
    %c7_i32_370 = arith.constant 7 : i32
    %984 = tpu.dynamic_rotate %939 by %c7_i32_370 dim 0 : vector<8x8xf32>, i32 -> vector<8x8xf32>
    %cst_371 = arith.constant -1.000000e+30 : f32
    %985 = vector.broadcast %cst_371 : f32 to vector<8x8xf32>
    %986 = arith.select %983, %985, %984 : vector<8x8xi1>, vector<8x8xf32>
    %987 = vector.broadcast %944 : vector<1x8xf32> to vector<8x8xf32>
    %988 = arith.addf %939, %987 : vector<8x8xf32>
    %989 = vector.broadcast %942 : vector<1x8xf32> to vector<8x8xf32>
    %990 = arith.addf %986, %989 : vector<8x8xf32>
    %991 = arith.maximumf %988, %990 : vector<8x8xf32>
    %992 = arith.subf %988, %991 : vector<8x8xf32>
    %993 = math.exp %992 : vector<8x8xf32>
    %994 = arith.subf %990, %991 : vector<8x8xf32>
    %995 = math.exp %994 : vector<8x8xf32>
    %996 = arith.addf %993, %995 : vector<8x8xf32>
    %997 = math.log %996 : vector<8x8xf32>
    %998 = arith.addf %991, %997 : vector<8x8xf32>
    %c5_i32_372 = arith.constant 5 : i32
    %999 = vector.broadcast %c5_i32_372 : i32 to vector<8x8xi32>
    %1000 = arith.cmpi sle, %227, %999 : vector<8x8xi32>
    %1001 = vector.broadcast %940 : i32 to vector<8x8xi32>
    %1002 = arith.cmpi sle, %227, %1001 : vector<8x8xi32>
    %1003 = vector.broadcast %940 : i32 to vector<1x8xi32>
    %1004 = arith.cmpi sge, %1003, %154 : vector<1x8xi32>
    %1005 = vector.broadcast %1004 : vector<1x8xi1> to vector<8x8xi1>
    %1006 = arith.ori %1002, %1005 : vector<8x8xi1>
    %1007 = arith.andi %1000, %1006 : vector<8x8xi1>
    %cst_373 = arith.constant -1.000000e+30 : f32
    %1008 = vector.broadcast %cst_373 : f32 to vector<8x8xf32>
    %1009 = arith.select %1007, %998, %1008 : vector<8x8xi1>, vector<8x8xf32>
    %c7_i32_374 = arith.constant 7 : i32
    %c7_i32_375 = arith.constant 7 : i32
    %1010 = arith.subi %c7_i32_375, %c7_i32_374 : i32
    %1011 = arith.index_cast %1010 : i32 to index
    %c0_376 = arith.constant 0 : index
    %1012 = vector.load %arg27[%1011, %c0_376] : memref<8x8xf32, #tpu.memory_space<vmem>>, vector<1x8xf32>
    %1013 = arith.index_cast %1010 : i32 to index
    %c0_377 = arith.constant 0 : index
    %1014 = vector.load %arg28[%1013, %c0_377] : memref<8x8xf32, #tpu.memory_space<vmem>>, vector<1x8xf32>
    %1015 = arith.index_cast %1010 : i32 to index
    %c0_378 = arith.constant 0 : index
    %c0_379 = arith.constant 0 : index
    %1016 = vector.load %arg26[%1015, %c0_378, %c0_379] : memref<9x8x8xf32, #tpu.memory_space<vmem>>, vector<1x8x8xf32>
    %1017 = vector.shape_cast %1016 : vector<1x8x8xf32> to vector<8x8xf32>
    %c0_i32_380 = arith.constant 0 : i32
    %1018 = vector.broadcast %c0_i32_380 : i32 to vector<8x8xi32>
    %1019 = arith.cmpi eq, %227, %1018 : vector<8x8xi32>
    %c1_i32_381 = arith.constant 1 : i32
    %1020 = tpu.dynamic_rotate %1017 by %c1_i32_381 dim 0 : vector<8x8xf32>, i32 -> vector<8x8xf32>
    %cst_382 = arith.constant -1.000000e+30 : f32
    %1021 = vector.broadcast %cst_382 : f32 to vector<8x8xf32>
    %1022 = arith.select %1019, %1021, %1020 : vector<8x8xi1>, vector<8x8xf32>
    %c1_i32_383 = arith.constant 1 : i32
    %1023 = vector.broadcast %c1_i32_383 : i32 to vector<8x8xi32>
    %1024 = arith.cmpi sge, %227, %1023 : vector<8x8xi32>
    %c5_i32_384 = arith.constant 5 : i32
    %1025 = vector.broadcast %c5_i32_384 : i32 to vector<8x8xi32>
    %1026 = arith.cmpi sle, %227, %1025 : vector<8x8xi32>
    %1027 = arith.andi %1024, %1026 : vector<8x8xi1>
    %1028 = arith.addf %1022, %1009 : vector<8x8xf32>
    %cst_385 = arith.constant -1.000000e+30 : f32
    %1029 = vector.broadcast %cst_385 : f32 to vector<8x8xf32>
    %1030 = arith.select %1027, %1028, %1029 : vector<8x8xi1>, vector<8x8xf32>
    %cst_386 = arith.constant dense<0xFF800000> : vector<8xf32>
    %1031 = vector.multi_reduction <maximumf>, %1030, %cst_386 [0] : vector<8x8xf32> to vector<8xf32>
    %1032 = vector.shape_cast %1031 : vector<8xf32> to vector<1x8xf32>
    %1033 = vector.broadcast %1032 : vector<1x8xf32> to vector<8x8xf32>
    %1034 = arith.subf %1030, %1033 : vector<8x8xf32>
    %1035 = math.exp %1034 : vector<8x8xf32>
    %cst_387 = arith.constant dense<0.000000e+00> : vector<8xf32>
    %1036 = vector.multi_reduction <add>, %1035, %cst_387 [0] : vector<8x8xf32> to vector<8xf32>
    %1037 = vector.shape_cast %1036 : vector<8xf32> to vector<1x8xf32>
    %1038 = math.log %1037 : vector<1x8xf32>
    %1039 = arith.addf %1032, %1038 : vector<1x8xf32>
    %1040 = arith.addf %1012, %1039 : vector<1x8xf32>
    %1041 = arith.addf %1040, %514 : vector<1x8xf32>
    %1042 = vector.broadcast %1010 : i32 to vector<1x8xi32>
    %1043 = arith.cmpi slt, %1042, %154 : vector<1x8xi32>
    %1044 = arith.andi %1043, %510 : vector<1x8xi1>
    %cst_388 = arith.constant 0.000000e+00 : f32
    %1045 = vector.broadcast %cst_388 : f32 to vector<1x8xf32>
    %1046 = arith.minimumf %1041, %1045 : vector<1x8xf32>
    %1047 = math.exp %1046 : vector<1x8xf32>
    %cst_389 = arith.constant 0.000000e+00 : f32
    %1048 = vector.broadcast %cst_389 : f32 to vector<1x8xf32>
    %1049 = arith.select %1044, %1047, %1048 : vector<1x8xi1>, vector<1x8xf32>
    %1050 = arith.index_cast %1010 : i32 to index
    %c0_390 = arith.constant 0 : index
    %1051 = vector.load %arg21[%1050, %c0_390] : memref<8x8xf32, #tpu.memory_space<vmem>>, vector<1x8xf32>
    tpu.vector_store %arg21[%1050, %c0_390], %1049 {strides = array<i32>} : memref<8x8xf32, #tpu.memory_space<vmem>>, vector<1x8xf32>,
    %c7_i32_391 = arith.constant 7 : i32
    %1052 = vector.broadcast %c7_i32_391 : i32 to vector<8x8xi32>
    %1053 = arith.cmpi eq, %227, %1052 : vector<8x8xi32>
    %c7_i32_392 = arith.constant 7 : i32
    %1054 = tpu.dynamic_rotate %1009 by %c7_i32_392 dim 0 : vector<8x8xf32>, i32 -> vector<8x8xf32>
    %cst_393 = arith.constant -1.000000e+30 : f32
    %1055 = vector.broadcast %cst_393 : f32 to vector<8x8xf32>
    %1056 = arith.select %1053, %1055, %1054 : vector<8x8xi1>, vector<8x8xf32>
    %1057 = vector.broadcast %1014 : vector<1x8xf32> to vector<8x8xf32>
    %1058 = arith.addf %1009, %1057 : vector<8x8xf32>
    %1059 = vector.broadcast %1012 : vector<1x8xf32> to vector<8x8xf32>
    %1060 = arith.addf %1056, %1059 : vector<8x8xf32>
    %1061 = arith.maximumf %1058, %1060 : vector<8x8xf32>
    %1062 = arith.subf %1058, %1061 : vector<8x8xf32>
    %1063 = math.exp %1062 : vector<8x8xf32>
    %1064 = arith.subf %1060, %1061 : vector<8x8xf32>
    %1065 = math.exp %1064 : vector<8x8xf32>
    %1066 = arith.addf %1063, %1065 : vector<8x8xf32>
    %1067 = math.log %1066 : vector<8x8xf32>
    %1068 = arith.addf %1061, %1067 : vector<8x8xf32>
    %c5_i32_394 = arith.constant 5 : i32
    %1069 = vector.broadcast %c5_i32_394 : i32 to vector<8x8xi32>
    %1070 = arith.cmpi sle, %227, %1069 : vector<8x8xi32>
    %1071 = vector.broadcast %1010 : i32 to vector<8x8xi32>
    %1072 = arith.cmpi sle, %227, %1071 : vector<8x8xi32>
    %1073 = vector.broadcast %1010 : i32 to vector<1x8xi32>
    %1074 = arith.cmpi sge, %1073, %154 : vector<1x8xi32>
    %1075 = vector.broadcast %1074 : vector<1x8xi1> to vector<8x8xi1>
    %1076 = arith.ori %1072, %1075 : vector<8x8xi1>
    %1077 = arith.andi %1070, %1076 : vector<8x8xi1>
    %cst_395 = arith.constant -1.000000e+30 : f32
    %1078 = vector.broadcast %cst_395 : f32 to vector<8x8xf32>
    %1079 = arith.select %1077, %1068, %1078 : vector<8x8xi1>, vector<8x8xf32>
    %c8_i32_396 = arith.constant 8 : i32
    return
  }
  func.func @transform_0(%arg0: i32) -> (i32, i32) {
    %c0_i32 = arith.constant 0 : i32
    %c0_i32_0 = arith.constant 0 : i32
    return %c0_i32, %arg0 : i32, i32
  }
  func.func @transform_1(%arg0: i32) -> (i32, i32, i32) {
    %c0_i32 = arith.constant 0 : i32
    %c0_i32_0 = arith.constant 0 : i32
    %c0_i32_1 = arith.constant 0 : i32
    return %arg0, %c0_i32, %c0_i32_0 : i32, i32, i32
  }
  func.func @transform_2(%arg0: i32) -> (i32, i32) {
    %c0_i32 = arith.constant 0 : i32
    %c0_i32_0 = arith.constant 0 : i32
    %c0_i32_1 = arith.constant 0 : i32
    return %c0_i32, %c0_i32_0 : i32, i32
  }
  func.func @transform_3(%arg0: i32) -> (i32, i32) {
    %c0_i32 = arith.constant 0 : i32
    %c0_i32_0 = arith.constant 0 : i32
    %c0_i32_1 = arith.constant 0 : i32
    return %c0_i32, %c0_i32_0 : i32, i32
  }
  func.func @transform_4(%arg0: i32) -> (i32, i32) {
    %c0_i32 = arith.constant 0 : i32
    %c0_i32_0 = arith.constant 0 : i32
    %c0_i32_1 = arith.constant 0 : i32
    return %c0_i32, %c0_i32_0 : i32, i32
  }
  func.func @transform_5(%arg0: i32) -> (i32, i32) {
    %c0_i32 = arith.constant 0 : i32
    %c0_i32_0 = arith.constant 0 : i32
    %c0_i32_1 = arith.constant 0 : i32
    return %c0_i32, %c0_i32_0 : i32, i32
  }
  func.func @transform_6(%arg0: i32) -> (i32, i32) {
    %c0_i32 = arith.constant 0 : i32
    %c0_i32_0 = arith.constant 0 : i32
    %c0_i32_1 = arith.constant 0 : i32
    return %c0_i32, %c0_i32_0 : i32, i32
  }
  func.func @transform_7(%arg0: i32) -> (i32, i32) {
    %c0_i32 = arith.constant 0 : i32
    %c0_i32_0 = arith.constant 0 : i32
    %c0_i32_1 = arith.constant 0 : i32
    return %c0_i32, %c0_i32_0 : i32, i32
  }
  func.func @transform_8(%arg0: i32) -> (i32, i32, i32) {
    %c0_i32 = arith.constant 0 : i32
    %c0_i32_0 = arith.constant 0 : i32
    %c0_i32_1 = arith.constant 0 : i32
    %c0_i32_2 = arith.constant 0 : i32
    return %c0_i32, %c0_i32_0, %c0_i32_1 : i32, i32, i32
  }
  func.func @transform_9(%arg0: i32) -> (i32, i32) {
    %c0_i32 = arith.constant 0 : i32
    %c0_i32_0 = arith.constant 0 : i32
    %c0_i32_1 = arith.constant 0 : i32
    return %c0_i32, %c0_i32_0 : i32, i32
  }
  func.func @transform_10(%arg0: i32) -> (i32, i32) {
    %c0_i32 = arith.constant 0 : i32
    %c0_i32_0 = arith.constant 0 : i32
    %c0_i32_1 = arith.constant 0 : i32
    return %c0_i32, %c0_i32_0 : i32, i32
  }
  func.func @transform_11(%arg0: i32) -> (i32, i32) {
    %c0_i32 = arith.constant 0 : i32
    %c0_i32_0 = arith.constant 0 : i32
    %c0_i32_1 = arith.constant 0 : i32
    return %c0_i32, %c0_i32_0 : i32, i32
  }
  func.func @transform_12(%arg0: i32) -> (i32, i32) {
    %c0_i32 = arith.constant 0 : i32
    %c0_i32_0 = arith.constant 0 : i32
    %c0_i32_1 = arith.constant 0 : i32
    return %c0_i32, %c0_i32_0 : i32, i32
  }
  func.func @transform_13(%arg0: i32) -> (i32, i32) {
    %c0_i32 = arith.constant 0 : i32
    %c0_i32_0 = arith.constant 0 : i32
    %c0_i32_1 = arith.constant 0 : i32
    return %c0_i32, %c0_i32_0 : i32, i32
  }
  func.func @transform_14(%arg0: i32) -> (i32, i32) {
    %c0_i32 = arith.constant 0 : i32
    %c0_i32_0 = arith.constant 0 : i32
    %c0_i32_1 = arith.constant 0 : i32
    return %c0_i32, %c0_i32_0 : i32, i32
  }
  func.func @transform_15(%arg0: i32) -> (i32, i32) {
    %c0_i32 = arith.constant 0 : i32
    %c0_i32_0 = arith.constant 0 : i32
    %c0_i32_1 = arith.constant 0 : i32
    return %c0_i32, %c0_i32_0 : i32, i32
  }
  func.func @transform_16(%arg0: i32) -> (i32, i32) {
    %c0_i32 = arith.constant 0 : i32
    %c0_i32_0 = arith.constant 0 : i32
    %c0_i32_1 = arith.constant 0 : i32
    return %c0_i32, %c0_i32_0 : i32, i32
  }
  func.func @transform_17(%arg0: i32) -> (i32, i32) {
    %c0_i32 = arith.constant 0 : i32
    %c0_i32_0 = arith.constant 0 : i32
    %c0_i32_1 = arith.constant 0 : i32
    return %c0_i32, %c0_i32_0 : i32, i32
  }
  func.func @transform_18(%arg0: i32) -> (i32, i32) {
    %c0_i32 = arith.constant 0 : i32
    %c0_i32_0 = arith.constant 0 : i32
    %c0_i32_1 = arith.constant 0 : i32
    return %c0_i32, %c0_i32_0 : i32, i32
  }
  func.func @transform_19(%arg0: i32) -> (i32, i32) {
    %c0_i32 = arith.constant 0 : i32
    %c0_i32_0 = arith.constant 0 : i32
    %c0_i32_1 = arith.constant 0 : i32
    return %c0_i32, %c0_i32_0 : i32, i32
  }
  func.func @transform_20(%arg0: i32) -> (i32, i32) {
    %c0_i32 = arith.constant 0 : i32
    %c0_i32_0 = arith.constant 0 : i32
    return %c0_i32, %arg0 : i32, i32
  }
  func.func @transform_21(%arg0: i32) -> (i32, i32) {
    %c0_i32 = arith.constant 0 : i32
    %c0_i32_0 = arith.constant 0 : i32
    return %c0_i32, %arg0 : i32, i32
  }
  func.func @transform_22(%arg0: i32) -> (i32, i32) {
    %c0_i32 = arith.constant 0 : i32
    %c0_i32_0 = arith.constant 0 : i32
    return %c0_i32, %arg0 : i32, i32
  }
  func.func @transform_23(%arg0: i32) -> (i32, i32) {
    %c0_i32 = arith.constant 0 : i32
    %c0_i32_0 = arith.constant 0 : i32
    return %c0_i32, %arg0 : i32, i32
  }
}

</mosaic_0001>

<bundles_post_ra>
// kernel: tpu_custom_call.1
= control target key start
LH: loop header
LB: loop body
LE: loop exit
PB: predicated region body
PF: predicated region fallthrough
CT: control target
= control target key end

     0   :  { %s11055_s0 = inlined_call_operand.vmem [shape: s32[1,8], index: 0, kind: input, shape index: {}]   ;;  %s11056_s1 = inlined_call_operand.vmem [shape: bf16[8,8,32], index: 1, kind: input, shape index: {}]   ;;  %s11057_s2 = inlined_call_operand.vmem [shape: bf16[32,32], index: 2, kind: input, shape index: {}]   ;;  %s11058_s3 = inlined_call_operand.vmem [shape: bf16[32,32], index: 3, kind: input, shape index: {}]   ;;  %s11059_s4 = inlined_call_operand.vmem [shape: bf16[32,32], index: 4, kind: input, shape index: {}]   ;;  %s11060_s5 = inlined_call_operand.vmem [shape: f32[1,32], index: 5, kind: input, shape index: {}]   ;;  %s11061_s6 = inlined_call_operand.vmem [shape: f32[1,32], index: 6, kind: input, shape index: {}]   ;;  %s11062_s7 = inlined_call_operand.vmem [shape: f32[1,32], index: 7, kind: input, shape index: {}]   ;;  %s11063_s8 = inlined_call_operand.vmem [shape: bf16[4,8,32], index: 8, kind: input, shape index: {}]   ;;  %s11064_s9 = inlined_call_operand.vmem [shape: f32[1,32], index: 9, kind: input, shape index: {}]   ;;  %s11065_s10 = inlined_call_operand.vmem [shape: f32[1,32], index: 10, kind: input, shape index: {}]   ;;  %s11066_s11 = inlined_call_operand.<no memory space> [shape: f32[1,1], index: 11, kind: input, shape index: {}]   ;;  %s11067_s12 = inlined_call_operand.vmem [shape: f32[96,16], index: 12, kind: input, shape index: {}]   ;;  %s11068_s13 = inlined_call_operand.vmem [shape: f32[1,16], index: 13, kind: input, shape index: {}]   ;;  %s11069_s14 = inlined_call_operand.vmem [shape: f32[16,1], index: 14, kind: input, shape index: {}]   ;;  %s11070_s16 = inlined_call_operand.vmem [shape: f32[32,16], index: 16, kind: input, shape index: {}]   ;;  %s11071_s17 = inlined_call_operand.vmem [shape: f32[1,16], index: 17, kind: input, shape index: {}]   ;;  %s11072_s18 = inlined_call_operand.vmem [shape: f32[16,1], index: 18, kind: input, shape index: {}]   ;;  %s11073_s20 = inlined_call_operand.hbm [shape: f32[8,8], index: 20, kind: output, shape index: {0}]   ;;  %s11074_s21 = inlined_call_operand.hbm [shape: f32[1,8], index: 21, kind: output, shape index: {1}]   ;;  %s11075_s22 = inlined_call_operand.hbm [shape: f32[1,8], index: 22, kind: output, shape index: {2}]   ;;  %s11076_s23 = inlined_call_operand.hbm [shape: f32[8,8], index: 23, kind: output, shape index: {3}]   ;;  %s11077_s15 = inlined_call_operand.<no memory space> [shape: f32[1,1], index: 15, kind: input, shape index: {}]   ;;  %s11078_s19 = inlined_call_operand.<no memory space> [shape: f32[1,1], index: 19, kind: input, shape index: {}]  }
   0x1   :  { %11084 = sst [smem:[#allocation19_spill]] %s11055_s0  ;;  %v29_v0 = vstv %s11066_s11  ;;  %v31_v1 = vstv %s11077_s15  ;;  %v33_v2 = vstv %s11078_s19 }
   0x2   :  { %11085 = sst [smem:[#allocation20_spill]] %s11056_s1  ;;  %30 = vst [vmem:[#allocation6] sm:$0x1] %v29_v0  ;;  %32 = vst [vmem:[#allocation7] sm:$0x1] %v31_v1 }
   0x3   :  { %11086 = sst [smem:[#allocation21_spill]] %s11057_s2  ;;  %34 = vst [vmem:[#allocation8] sm:$0x1] %v33_v2 }
   0x4   :  { %11087 = sst [smem:[#allocation22_spill]] %s11058_s3 }
   0x5   :  { %11088 = sst [smem:[#allocation23_spill]] %s11059_s4 }
   0x6   :  { %11089 = sst [smem:[#allocation24_spill]] %s11060_s5 }
   0x7   :  { %11090 = sst [smem:[#allocation25_spill]] %s11061_s6 }
   0x8   :  { %11091 = sst [smem:[#allocation26_spill]] %s11062_s7 }
   0x9   :  { %35 = vsyncpa [#allocation10], 0 }
   0xa   :  { %36 = vsyncpa [#allocation12], 0  ;;  %s11092_s6 = sld [smem:[#allocation22_spill]]  ;;  %s11093_s11 = sld [smem:[#allocation21_spill]]  ;;  %vm148_vm0 = vcmask 261120  }
   0xb   :  { %s11094_s4 = sld [smem:[#allocation20_spill]] }
  0x10   :  { %v8953_v3 = vld [vmem:[%s11092_s6] sm:$0xff]   ;;  %v8955_v5 = vld [vmem:[%s11092_s6 + $0x8] sm:$0xff]  }
  0x11   :  { %v8954_v4 = vld [vmem:[%s11093_s11] sm:$0xff]   ;;  %8423 = vmatprep.subr.bf16.mxu1 %v8953_v3  ;;  %v8956_v6 = vld [vmem:[%s11093_s11 + $0x8] sm:$0xff]   ;;  %v106_v9 = vld [vmem:[%s11094_s4 + $0x10] sm:$0xff]  }
  0x12   :  { %8424 = vmatpush3.bf16.msra.mxu1 %v8953_v3  ;;  %8411 = vmatprep.subr.bf16.mxu0 %v8954_v4  ;;  %v102_v7 = vld [vmem:[%s11094_s4] sm:$0xff]   ;;  %v104_v8 = vld [vmem:[%s11094_s4 + $0x8] sm:$0xff]  }
  0x13   :  { %8412 = vmatpush3.bf16.msra.mxu0 %v8954_v4  ;;  %8425 = vmatprep.subr.bf16.mxu1 %v8955_v5 }
  0x14   :  { %8413 = vmatprep.subr.bf16.mxu0 %v8956_v6 }
  0x15   :  { %37 = vsyncpa [#allocation15], 0  ;;  %8427 = vmatprep.mubr.msk.bf16.mxu1 %vm148_vm0, %v102_v7  ;;  %8415 = vmatprep.mubr.msk.bf16.mxu0 %vm148_vm0, %v102_v7  ;;  %v108_v10 = vld [vmem:[%s11094_s4 + $0x18] sm:$0xff]   ;;  %s11095_s27 = sld [smem:[#allocation23_spill]]  ;;  %v9352_v13 = vmov 0.0   ;;  %vm9353_vm1 = vmmov 0  }
  0x16   :  { %8426 = vmatpush3.bf16.msra.mxu1 %v8955_v5  ;;  %s11096_s19 = sld [smem:[#allocation25_spill]]  ;;  %s11097_s0 = sld [smem:[#allocation24_spill]]  ;;  %vm392_vm2 = vcmask 64512   ;;  %vm3041_vm3 = vcmask 1043456   ;;  %vm6237_vm4 = vcmask 1041409   ;;  %vm6239_vm5 = vcmask 1042434  }
  0x17   :  { %8414 = vmatpush3.bf16.msra.mxu0 %v8956_v6  ;;  %8447 = vmatprep.subr.mxu1 %v9352_v13  ;;  %s9354_s30 = smov 120   ;;  %s11098_s5 = sld [smem:[#allocation26_spill]]  ;;  %vm6241_vm6 = vcmask 1043459   ;;  %vm6243_vm7 = vcmask 1044484   ;;  %vm6245_vm8 = vcmask 1045509   ;;  %vm6247_vm9 = vcmask 1046534  }
  0x18   :  { %s9355_s1 = smov 112   ;;  %s9356_s7 = smov 104   ;;  %vm6249_vm10 = vcmask 1047559   ;;  %vm6833_vm12 = vcmask 130048  }
  0x19   :  { %8428 = vmatmul.mubr.msk.bf16.vlgmr.msra.gmra.mrb[0].mxu1 %vm148_vm0, %v104_v8  ;;  %s9360_s26 = smov [#allocation14]  }
  0x1a   :  { %8416 = vmatmul.mubr.msk.bf16.vlgmr.msra.gmra.mrb[0].mxu0 %vm148_vm0, %v104_v8  ;;  %8431 = vmatprep.mubr.msk.bf16.mxu1 %vm148_vm0, %v106_v9  ;;  %s7992_s2 = sshll.u32 %s9360_s26, 4  ;;  %s7993_s2 = int_to_ptr.vmem [resolvable:$true] %s7992_s2 }
  0x1b   :  { %8419 = vmatprep.mubr.msk.bf16.mxu0 %vm148_vm0, %v106_v9  ;;  %v8961_v11 = vld [vmem:[%s11095_s27] sm:$0xff]   ;;  %v8962_v12 = vld [vmem:[%s11095_s27 + $0x8] sm:$0xff]   ;;  %s9258_s6 = scalar_lea.vmem %s7993_s2, 128  ;;  %p9263_p1 = scmp.lt.s32.totalorder %s7993_s2, %s7993_s2 }
  0x1c   :  { %8435 = vmatprep.subr.bf16.mxu0 %v8961_v11  ;;  %v8025_v14 = vld [vmem:[%s11096_s19] ss:$0 sm:$0xff]  ;;  %p9259_p0 = scmp.ne.s32.totalorder %s7993_s2, %s9258_s6  ;;  %p9264_p2 = scmp.lt.s32.totalorder %s9258_s6, %s9258_s6 }
  0x1d   :  { %8436 = vmatpush3.bf16.msra.mxu0 %v8961_v11  ;;  %v9548_v16 = vld [vmem:[%s11097_s0] ss:$0 sm:$0xff] }
  0x1e   :  { %8437 = vmatprep.subr.bf16.mxu0 %v8962_v12  ;;  %v8032_v56 = vld [vmem:[%s11098_s5] ss:$0 sm:$0xff]  ;;  %p9265_p3 = por %p9264_p2, %p9263_p1 }
  0x20   :  { %p9266_p4 = pnand %p9265_p3, %p9259_p0 }
  0x21   :  { %8432 = vmatmul.mubr.msk.bf16.gmra.mrb[4].mxu1 %vm148_vm0, %v108_v10  ;;  %8438 = vmatpush3.bf16.msra.mxu0 %v8962_v12 }
  0x22   :  { %8420 = vmatmul.mubr.msk.bf16.gmra.mrb[4].mxu0 %vm148_vm0, %v108_v10  ;;  %8467 = vmatprep.subr.mxu0 %v9352_v13 }
  0x23   :  { %8439 = vmatprep.mubr.msk.bf16.mxu0 %vm148_vm0, %v102_v7  ;;  %8449 = vmatprep.mubr.msk.f32.mxu1 %vm9353_vm1, %v9352_v13 }
  0x2a   :  { %8440 = vmatmul.mubr.msk.bf16.vlgmr.msra.gmra.mrb[8].mxu0 %vm148_vm0, %v104_v8 }
  0x2b   :  { %8443 = vmatprep.mubr.msk.bf16.mxu0 %vm148_vm0, %v106_v9 }
  0x32   :  { %8444 = vmatmul.mubr.msk.bf16.gmra.mrb[12].mxu0 %vm148_vm0, %v108_v10 }
  0x33   :  { %8469 = vmatprep.mubr.msk.f32.mxu0 %vm9353_vm1, %v9352_v13 }
  0xec   :  { %v8429_v15 = vpop.f32.mrb[0].mxu1 }
  0xed   :  { %v278_v17 = vpop.f32.mrb[1].mxu1  ;;  %v8417_v18 = vpop.f32.mrb[0].mxu0  ;;  %v9572_v31 = vadd.f32 %v8429_v15, %v8025_v14 }
  0xee   :  { %v9550_v19 = vadd.f32 %v8025_v14, %v278_v17  ;;  %v8430_v20 = vpop.f32.mrb[2].mxu1  ;;  %v195_v21 = vpop.f32.mrb[1].mxu0  ;;  %v9583_v38 = vadd.f32 %v8417_v18, %v9548_v16 }
  0xef   :  { %v281_v22 = vpop.f32.mrb[3].mxu1  ;;  %v9553_v23 = vadd.f32 %v9548_v16, %v195_v21  ;;  %v8418_v24 = vpop.f32.mrb[2].mxu0  ;;  %v9591_v40 = vadd.f32 %v8430_v20, %v8025_v14 }
  0xf0   :  { %8448 = vmatpush3.xpose.msk.msra.mxu1 %vm392_vm2, %v9550_v19  ;;  %v198_v25 = vpop.f32.mrb[3].mxu0  ;;  %v9561_v27 = vadd.f32 %v8025_v14, %v281_v22  ;;  %v9603_v42 = vadd.f32 %v8418_v24, %v9548_v16 }
  0xf1   :  { %8452 = vmatprep.subr.mxu1 %v9352_v13  ;;  %v9559_v26 = vadd.f32 %v9548_v16, %v198_v25 }
  0xf3   :  { %8450 = vmatmul.mubr.msk.f32.vlgmr.msra.gmra.mrb[8].mxu1 %vm392_vm2, %v9553_v23  ;;  %1759 = vrot.lane.b32.xlu1 %v9559_v26, %s9354_s30 }
  0xf4   :  { %8453 = vmatpush3.xpose.msk.msra.mxu1 %vm392_vm2, %v9561_v27  ;;  %8454 = vmatprep.mubr.msk.f32.mxu1 %vm9353_vm1, %v9352_v13  ;;  %v8433_v28 = vpop.f32.mrb[4].mxu1 }
  0xf5   :  { %8457 = vmatprep.subr.mxu1 %v9352_v13  ;;  %v294_v29 = vpop.f32.mrb[5].mxu1  ;;  %v8421_v30 = vpop.f32.mrb[4].mxu0  ;;  %v9593_v41 = vadd.f32 %v8433_v28, %v8025_v14 }
  0xf6   :  { %v9574_v32 = vadd.f32 %v8025_v14, %v294_v29  ;;  %v8434_v33 = vpop.f32.mrb[6].mxu1  ;;  %v211_v34 = vpop.f32.mrb[5].mxu0  ;;  %v9606_v43 = vadd.f32 %v8421_v30, %v9548_v16 }
  0xf7   :  { %8455 = vmatmul.mubr.msk.f32.vlgmr.msra.gmra.mrb[10].mxu1 %vm392_vm2, %v9559_v26  ;;  %v297_v35 = vpop.f32.mrb[7].mxu1  ;;  %v8422_v36 = vpop.f32.mrb[6].mxu0  ;;  %v9587_v39 = vadd.f32 %v9548_v16, %v211_v34  ;;  %v9630_v46 = vadd.f32 %v8434_v33, %v8025_v14 }
  0xf8   :  { %8458 = vmatpush3.xpose.msk.msra.mxu1 %vm392_vm2, %v9572_v31  ;;  %8459 = vmatprep.mubr.msk.f32.mxu1 %vm9353_vm1, %v9352_v13  ;;  %v214_v37 = vpop.f32.mrb[7].mxu0  ;;  %v9611_v44 = vadd.f32 %v8025_v14, %v297_v35  ;;  %v9641_v47 = vadd.f32 %v8422_v36, %v9548_v16 }
  0xf9   :  { %8462 = vmatprep.subr.mxu1 %v9352_v13  ;;  %8468 = vmatpush3.xpose.msk.msra.mxu0 %vm392_vm2, %v9574_v32  ;;  %v9625_v45 = vadd.f32 %v9548_v16, %v214_v37 }
  0xfa   :  { %8477 = vmatprep.subr.mxu0 %v9352_v13 }
  0xfb   :  { %8460 = vmatmul.mubr.msk.f32.vlgmr.msra.gmra.mrb[12].mxu1 %vm392_vm2, %v9583_v38 }
  0xfc   :  { %8463 = vmatpush3.xpose.msk.msra.mxu1 %vm392_vm2, %v9591_v40  ;;  %8464 = vmatprep.mubr.msk.f32.mxu1 %vm9353_vm1, %v9352_v13 }
  0xfd   :  { %8472 = vmatprep.subr.mxu1 %v9352_v13  ;;  %8470 = vmatmul.mubr.msk.f32.vlgmr.msra.gmra.mrb[16].mxu0 %vm392_vm2, %v9587_v39  ;;  %v8441_v48 = vpop.f32.mrb[8].mxu0 }
  0xfe   :  { %8478 = vmatpush3.xpose.msk.msra.mxu0 %vm392_vm2, %v9593_v41  ;;  %8479 = vmatprep.mubr.msk.f32.mxu0 %vm9353_vm1, %v9352_v13  ;;  %v361_v49 = vpop.f32.mrb[9].mxu0  ;;  %v9651_v57 = vadd.f32 %v8441_v48, %v8032_v56 }
  0xff   :  { %8465 = vmatmul.mubr.msk.f32.vlgmr.msra.gmra.mrb[14].mxu1 %vm392_vm2, %v9603_v42  ;;  %8487 = vmatprep.subr.mxu0 %v9352_v13  ;;  %v8442_v50 = vpop.f32.mrb[10].mxu0  ;;  %v9653_v58 = vadd.f32 %v8032_v56, %v361_v49 }
 0x100   :  { %8473 = vmatpush3.xpose.msk.msra.mxu1 %vm392_vm2, %v9611_v44  ;;  %8474 = vmatprep.mubr.msk.f32.mxu1 %vm9353_vm1, %v9352_v13  ;;  %v364_v51 = vpop.f32.mrb[11].mxu0  ;;  %v9655_v59 = vadd.f32 %v8442_v50, %v8032_v56 }
 0x101   :  { %8482 = vmatprep.subr.mxu1 %v9352_v13  ;;  %8480 = vmatmul.mubr.msk.f32.vlgmr.msra.gmra.mrb[18].mxu0 %vm392_vm2, %v9606_v43  ;;  %v9658_v60 = vadd.f32 %v8032_v56, %v364_v51 }
 0x102   :  { %8489 = vmatprep.mubr.msk.f32.mxu0 %vm9353_vm1, %v9352_v13  ;;  %8488 = vmatpush3.msra.mxu0 %v9653_v58 }
 0x103   :  { %8475 = vmatmul.mubr.msk.f32.vlgmr.msra.gmra.mrb[16].mxu1 %vm392_vm2, %v9625_v45  ;;  %8497 = vmatprep.subr.mxu0 %v9352_v13 }
 0x104   :  { %8483 = vmatpush3.xpose.msk.msra.mxu1 %vm392_vm2, %v9630_v46  ;;  %8484 = vmatprep.mubr.msk.f32.mxu1 %vm9353_vm1, %v9352_v13 }
 0x105   :  { %8492 = vmatprep.subr.mxu1 %v9352_v13  ;;  %v8445_v52 = vpop.f32.mrb[12].mxu0 }
 0x106   :  { %v377_v53 = vpop.f32.mrb[13].mxu0  ;;  %v9660_v61 = vadd.f32 %v8445_v52, %v8032_v56 }
 0x107   :  { %8485 = vmatmul.mubr.msk.f32.vlgmr.msra.gmra.mrb[18].mxu1 %vm392_vm2, %v9641_v47  ;;  %v8446_v54 = vpop.f32.mrb[14].mxu0  ;;  %v9662_v62 = vadd.f32 %v8032_v56, %v377_v53 }
 0x108   :  { %8494 = vmatprep.mubr.msk.f32.mxu1 %vm9353_vm1, %v9352_v13  ;;  %v380_v55 = vpop.f32.mrb[15].mxu0  ;;  %v9664_v63 = vadd.f32 %v8446_v54, %v8032_v56  ;;  %8493 = vmatpush3.msra.mxu1 %v9658_v60 }
 0x109   :  { %8502 = vmatprep.subr.mxu1 %v9352_v13  ;;  %v9669_v0 = vadd.f32 %v8032_v56, %v380_v55 }
 0x165   :  { %v1760_v53 = vpop.permute.xlu1 %1759 }
 0x1c6   :  { %v465_v1 = vpop.f32.mrb[8].mxu1 }
 0x1c7   :  { %v8451_v2 = vpop.f32.mrb[9].mxu1  ;;  %v9689_v30 = vmul.f32 0.35355338, %v465_v1 }
 0x1c9   :  { %v1009_v34 = vsel %vm392_vm2, %v9689_v30, -inf }
 0x1ca   :  { %v541_v3 = vpop.f32.mrb[10].mxu1 }
 0x1cb   :  { %v1002_v4 = vmul.f32 0.35355338, %v541_v3  ;;  %v8456_v5 = vpop.f32.mrb[11].mxu1 }
 0x1cd   :  { %v1012_v6 = vsel %vm392_vm2, %v1002_v4, -inf }
 0x1ce   :  { %1013 = vmax.xlane.f32.xlu0 %v1012_v6  ;;  %v617_v7 = vpop.f32.mrb[12].mxu1 }
 0x1cf   :  { %v8461_v8 = vpop.f32.mrb[13].mxu1  ;;  %v9699_v37 = vmul.f32 0.35355338, %v617_v7 }
 0x1d0   :  { %v769_v9 = vpop.f32.mrb[16].mxu0 }
 0x1d1   :  { %v8471_v10 = vpop.f32.mrb[17].mxu0  ;;  %v9691_v33 = vmul.f32 0.35355338, %v769_v9  ;;  %v1015_v49 = vsel %vm392_vm2, %v9699_v37, -inf }
 0x1d2   :  { %v693_v11 = vpop.f32.mrb[14].mxu1 }
 0x1d3   :  { %v1004_v12 = vmul.f32 0.35355338, %v693_v11  ;;  %v8466_v14 = vpop.f32.mrb[15].mxu1  ;;  %v1021_v36 = vsel %vm392_vm2, %v9691_v33, -inf }
 0x1d4   :  { %v921_v15 = vpop.f32.mrb[18].mxu0 }
 0x1d5   :  { %v1018_v16 = vsel %vm392_vm2, %v1004_v12, -inf  ;;  %v8481_v17 = vpop.f32.mrb[19].mxu0  ;;  %v9695_v35 = vmul.f32 0.35355338, %v921_v15 }
 0x1d6   :  { %1019 = vmax.xlane.f32.xlu0 %v1018_v16  ;;  %v845_v18 = vpop.f32.mrb[16].mxu1 }
 0x1d7   :  { %v1006_v20 = vmul.f32 0.35355338, %v845_v18  ;;  %v8476_v21 = vpop.f32.mrb[17].mxu1  ;;  %v1027_v48 = vsel %vm392_vm2, %v9695_v35, -inf }
 0x1d9   :  { %v1024_v22 = vsel %vm392_vm2, %v1006_v20, -inf }
 0x1da   :  { %1025 = vmax.xlane.f32.xlu1 %v1024_v22  ;;  %v997_v24 = vpop.f32.mrb[18].mxu1 }
 0x1db   :  { %v1008_v25 = vmul.f32 0.35355338, %v997_v24  ;;  %v8486_v28 = vpop.f32.mrb[19].mxu1 }
 0x1dd   :  { %v1030_v29 = vsel %vm392_vm2, %v1008_v25, -inf }
 0x1de   :  { %1031 = vmax.xlane.f32.xlu1 %v1030_v29 }
 0x1ec   :  { %1761 = vrot.lane.b32.xlu0 %v9561_v27, %s9354_s30 }
 0x1ef   :  { %1917 = vrot.lane.b32.xlu1 %v9591_v40, %s9354_s30 }
 0x1f0   :  { %2073 = vrot.lane.b32.xlu0 %v9611_v44, %s9354_s30 }
 0x1f3   :  { %1915 = vrot.lane.b32.xlu1 %v9603_v42, %s9354_s30 }
 0x1f4   :  { %2229 = vrot.lane.b32.xlu0 %v9630_v46, %s9354_s30 }
 0x1f7   :  { %2071 = vrot.lane.b32.xlu1 %v9625_v45, %s9354_s30 }
 0x1fb   :  { %2227 = vrot.lane.b32.xlu1 %v9641_v47, %s9354_s30 }
 0x213   :  { %1010 = vmax.xlane.f32.xlu0 %v1009_v34 }
 0x217   :  { %1022 = vmax.xlane.f32.xlu0 %v1021_v36 }
 0x21b   :  { %1028 = vmax.xlane.f32.xlu0 %v1027_v48 }
 0x21f   :  { %1016 = vmax.xlane.f32.xlu1 %v1015_v49 }
 0x230   :  { %1681 = vrot.lane.b32.xlu1 %v9553_v23, %s9354_s30 }
 0x231   :  { %1683 = vrot.lane.b32.xlu0 %v9550_v19, %s9354_s30 }
 0x234   :  { %1839 = vrot.lane.b32.xlu1 %v9572_v31, %s9354_s30 }
 0x235   :  { %1995 = vrot.lane.b32.xlu0 %v9574_v32, %s9354_s30 }
 0x238   :  { %1837 = vrot.lane.b32.xlu1 %v9583_v38, %s9354_s30 }
 0x239   :  { %2151 = vrot.lane.b32.xlu0 %v9593_v41, %s9354_s30 }
 0x23c   :  { %1993 = vrot.lane.b32.xlu1 %v9587_v39, %s9354_s30 }
 0x23d   :  { %2471 = vrot.lane.b32.xlu0 %v9658_v60, %s9354_s30 }
 0x240   :  { %2149 = vrot.lane.b32.xlu1 %v9606_v43, %s9354_s30 }
 0x241   :  { %3220 = vrot.lane.b32.xlu0 %v9550_v19, %s9355_s1 }
 0x244   :  { %2625 = vrot.lane.b32.xlu1 %v9655_v59, %s9354_s30 }
 0x248   :  { %2779 = vrot.lane.b32.xlu1 %v9669_v0, %s9354_s30 }
 0x24c   :  { %2933 = vrot.lane.b32.xlu1 %v9664_v63, %s9354_s30 }
 0x25b   :  { %v1014_v50 = vpop.xlane.xlu0 %1013 }
 0x25c   :  { %v1034_v51 = vsub.f32 %v1002_v4, %v1014_v50 }
 0x25e   :  { %v1043_v52 = vmul.f32 1.442695, %v1034_v51 }
 0x260   :  { %8967 = vpow2.f32 %v1043_v52 }
 0x263   :  { %v1020_v54 = vpop.xlane.xlu0 %1019 }
 0x264   :  { %v1036_v55 = vsub.f32 %v1004_v12, %v1020_v54 }
 0x266   :  { %v1047_v56 = vmul.f32 1.442695, %v1036_v55 }
 0x267   :  { %v1026_v1 = vpop.xlane.xlu1 %1025  ;;  %v1762_v12 = vpop.permute.xlu0 %1761 }
 0x268   :  { %8969 = vpow2.f32 %v1047_v56  ;;  %v1038_v2 = vsub.f32 %v1006_v20, %v1026_v1 }
 0x26a   :  { %v9731_v3 = vpop.eup %8967  ;;  %v1051_v5 = vmul.f32 1.442695, %v1038_v2 }
 0x26b   :  { %8495 = vmatmul.mubr.msk.f32.vlgmr.msra.gmra.mrb[20].mxu1 %vm392_vm2, %v9731_v3  ;;  %v1032_v6 = vpop.xlane.xlu1 %1031  ;;  %v2074_v15 = vpop.permute.xlu0 %2073 }
 0x26c   :  { %8971 = vpow2.f32 %v1051_v5  ;;  %v1040_v7 = vsub.f32 %v1008_v25, %v1032_v6  ;;  %8503 = vmatpush3.msra.mxu1 %v9655_v59  ;;  %8504 = vmatprep.mubr.msk.f32.mxu1 %vm9353_vm1, %v9352_v13 }
 0x26d   :  { %8512 = vmatprep.subr.mxu1 %v9352_v13 }
 0x26e   :  { %v1055_v4 = vmul.f32 1.442695, %v1040_v7 }
 0x26f   :  { %v1918_v11 = vpop.permute.xlu1 %1917  ;;  %v2230_v17 = vpop.permute.xlu0 %2229 }
 0x270   :  { %8973 = vpow2.f32 %v1055_v4 }
 0x272   :  { %v9739_v8 = vpop.eup %8969 }
 0x273   :  { %8505 = vmatmul.mubr.msk.f32.vlgmr.msra.gmra.mrb[22].mxu1 %vm392_vm2, %v9739_v8  ;;  %v1916_v14 = vpop.permute.xlu1 %1915 }
 0x274   :  { %8513 = vmatpush3.msra.mxu1 %v9669_v0  ;;  %8514 = vmatprep.mubr.msk.f32.mxu1 %vm9353_vm1, %v9352_v13 }
 0x275   :  { %8522 = vmatprep.subr.mxu1 %v9352_v13 }
 0x276   :  { %v9747_v9 = vpop.eup %8971 }
 0x277   :  { %8515 = vmatmul.mubr.msk.f32.vlgmr.msra.gmra.mrb[24].mxu1 %vm392_vm2, %v9747_v9  ;;  %v2072_v16 = vpop.permute.xlu1 %2071 }
 0x278   :  { %8523 = vmatpush3.msra.mxu1 %v9664_v63  ;;  %8524 = vmatprep.mubr.msk.f32.mxu1 %vm9353_vm1, %v9352_v13 }
 0x279   :  { %8532 = vmatprep.subr.mxu1 %v9352_v13 }
 0x27a   :  { %v9755_v10 = vpop.eup %8973 }
 0x27b   :  { %8525 = vmatmul.mubr.msk.f32.vlgmr.msra.gmra.mrb[26].mxu1 %vm392_vm2, %v9755_v10  ;;  %v2228_v18 = vpop.permute.xlu1 %2227 }
 0x27c   :  { %8534 = vmatprep.mubr.msk.f32.mxu1 %vm9353_vm1, %v9352_v13 }
 0x27f   :  { %8533 = vmatpush3.xpose.msk.msra.mxu1 %vm392_vm2, %v1762_v12 }
 0x280   :  { %8542 = vmatprep.subr.mxu1 %v9352_v13 }
 0x282   :  { %8535 = vmatmul.mubr.msk.f32.vlgmr.msra.gmra.mrb[28].mxu1 %vm392_vm2, %v1760_v53 }
 0x283   :  { %8543 = vmatpush3.xpose.msk.msra.mxu1 %vm392_vm2, %v1918_v11  ;;  %8544 = vmatprep.mubr.msk.f32.mxu1 %vm9353_vm1, %v9352_v13 }
 0x284   :  { %8552 = vmatprep.subr.mxu1 %v9352_v13 }
 0x286   :  { %8545 = vmatmul.mubr.msk.f32.vlgmr.msra.gmra.mrb[30].mxu1 %vm392_vm2, %v1916_v14 }
 0x287   :  { %8553 = vmatpush3.xpose.msk.msra.mxu1 %vm392_vm2, %v2074_v15  ;;  %8554 = vmatprep.mubr.msk.f32.mxu1 %vm9353_vm1, %v9352_v13 }
 0x288   :  { %8562 = vmatprep.subr.mxu1 %v9352_v13 }
 0x28a   :  { %8555 = vmatmul.mubr.msk.f32.vlgmr.msra.gmra.mrb[32].mxu1 %vm392_vm2, %v2072_v16 }
 0x28b   :  { %8563 = vmatpush3.xpose.msk.msra.mxu1 %vm392_vm2, %v2230_v17  ;;  %8564 = vmatprep.mubr.msk.f32.mxu1 %vm9353_vm1, %v9352_v13 }
 0x28c   :  { %8572 = vmatprep.subr.mxu1 %v9352_v13 }
 0x28e   :  { %8565 = vmatmul.mubr.msk.f32.vlgmr.msra.gmra.mrb[34].mxu1 %vm392_vm2, %v2228_v18 }
 0x28f   :  { %8574 = vmatprep.mubr.msk.f32.mxu1 %vm9353_vm1, %v9352_v13 }
 0x2a0   :  { %v1011_v20 = vpop.xlane.xlu0 %1010 }
 0x2a1   :  { %v1033_v21 = vsub.f32 %v9689_v30, %v1011_v20 }
 0x2a3   :  { %v1041_v22 = vmul.f32 1.442695, %v1033_v21 }
 0x2a4   :  { %v1023_v24 = vpop.xlane.xlu0 %1022 }
 0x2a5   :  { %8975 = vpow2.f32 %v1041_v22  ;;  %v1037_v34 = vsub.f32 %v9691_v33, %v1023_v24 }
 0x2a7   :  { %v1049_v51 = vmul.f32 1.442695, %v1037_v34 }
 0x2a8   :  { %v1029_v25 = vpop.xlane.xlu0 %1028 }
 0x2a9   :  { %v1039_v30 = vsub.f32 %v9695_v35, %v1029_v25 }
 0x2ac   :  { %v1684_v28 = vpop.permute.xlu0 %1683  ;;  %v1017_v29 = vpop.xlane.xlu1 %1016 }
 0x2ad   :  { %v1035_v36 = vsub.f32 %v9699_v37, %v1017_v29  ;;  %v1053_v37 = vmul.f32 1.442695, %v1039_v30 }
 0x2af   :  { %v9784_v48 = vpop.eup %8975  ;;  %v1045_v49 = vmul.f32 1.442695, %v1035_v36 }
 0x2b0   :  { %8490 = vmatmul.mubr.msk.f32.vlgmr.msra.gmra.mrb[20].mxu0 %vm392_vm2, %v9784_v48  ;;  %v1996_v50 = vpop.permute.xlu0 %1995  ;;  %v1682_v35 = vpop.permute.xlu1 %1681 }
 0x2b1   :  { %8977 = vpow2.f32 %v1045_v49  ;;  %8498 = vmatpush3.msra.mxu0 %v9651_v57  ;;  %8499 = vmatprep.mubr.msk.f32.mxu0 %vm9353_vm1, %v9352_v13 }
 0x2b2   :  { %8507 = vmatprep.subr.mxu0 %v9352_v13  ;;  %8979 = vpow2.f32 %v1049_v51 }
 0x2b3   :  { %8981 = vpow2.f32 %v1053_v37 }
 0x2b4   :  { %v2152_v33 = vpop.permute.xlu0 %2151  ;;  %v1840_v56 = vpop.permute.xlu1 %1839 }
 0x2b8   :  { %v2472_v52 = vpop.permute.xlu0 %2471  ;;  %v1838_v1 = vpop.permute.xlu1 %1837 }
 0x2b9   :  { %8573 = vmatpush3.msra.mxu1 %v2472_v52 }
 0x2ba   :  { %8582 = vmatprep.subr.mxu1 %v9352_v13 }
 0x2bb   :  { %v9794_v53 = vpop.eup %8977 }
 0x2bc   :  { %8500 = vmatmul.mubr.msk.f32.vlgmr.msra.gmra.mrb[22].mxu0 %vm392_vm2, %v9794_v53  ;;  %v9802_v54 = vpop.eup %8979  ;;  %v1994_v2 = vpop.permute.xlu1 %1993 }
 0x2bd   :  { %8508 = vmatpush3.msra.mxu0 %v9662_v62  ;;  %8509 = vmatprep.mubr.msk.f32.mxu0 %vm9353_vm1, %v9352_v13  ;;  %v9810_v55 = vpop.eup %8981 }
 0x2be   :  { %8517 = vmatprep.subr.mxu0 %v9352_v13 }
 0x2c0   :  { %8510 = vmatmul.mubr.msk.f32.vlgmr.msra.gmra.mrb[24].mxu0 %vm392_vm2, %v9802_v54  ;;  %v2150_v5 = vpop.permute.xlu1 %2149 }
 0x2c1   :  { %8518 = vmatpush3.msra.mxu0 %v9660_v61  ;;  %8519 = vmatprep.mubr.msk.f32.mxu0 %vm9353_vm1, %v9352_v13 }
 0x2c2   :  { %8527 = vmatprep.subr.mxu0 %v9352_v13 }
 0x2c4   :  { %8520 = vmatmul.mubr.msk.f32.vlgmr.msra.gmra.mrb[26].mxu0 %vm392_vm2, %v9810_v55 }
 0x2c5   :  { %8529 = vmatprep.mubr.msk.f32.mxu0 %vm9353_vm1, %v9352_v13 }
 0x2c8   :  { %8528 = vmatpush3.xpose.msk.msra.mxu0 %vm392_vm2, %v1684_v28 }
 0x2c9   :  { %8537 = vmatprep.subr.mxu0 %v9352_v13 }
 0x2cb   :  { %8530 = vmatmul.mubr.msk.f32.vlgmr.msra.gmra.mrb[28].mxu0 %vm392_vm2, %v1682_v35 }
 0x2cc   :  { %8538 = vmatpush3.xpose.msk.msra.mxu0 %vm392_vm2, %v1840_v56  ;;  %8539 = vmatprep.mubr.msk.f32.mxu0 %vm9353_vm1, %v9352_v13 }
 0x2cd   :  { %8547 = vmatprep.subr.mxu0 %v9352_v13 }
 0x2cf   :  { %8540 = vmatmul.mubr.msk.f32.vlgmr.msra.gmra.mrb[30].mxu0 %vm392_vm2, %v1838_v1 }
 0x2d0   :  { %8548 = vmatpush3.xpose.msk.msra.mxu0 %vm392_vm2, %v1996_v50  ;;  %8549 = vmatprep.mubr.msk.f32.mxu0 %vm9353_vm1, %v9352_v13 }
 0x2d1   :  { %8557 = vmatprep.subr.mxu0 %v9352_v13 }
 0x2d3   :  { %8550 = vmatmul.mubr.msk.f32.vlgmr.msra.gmra.mrb[32].mxu0 %vm392_vm2, %v1994_v2 }
 0x2d4   :  { %8558 = vmatpush3.xpose.msk.msra.mxu0 %vm392_vm2, %v2152_v33  ;;  %8559 = vmatprep.mubr.msk.f32.mxu0 %vm9353_vm1, %v9352_v13 }
 0x2d5   :  { %8567 = vmatprep.subr.mxu0 %v9352_v13 }
 0x2d7   :  { %8560 = vmatmul.mubr.msk.f32.vlgmr.msra.gmra.mrb[34].mxu0 %vm392_vm2, %v2150_v5 }
 0x2d8   :  { %8569 = vmatprep.mubr.msk.f32.mxu0 %vm9353_vm1, %v9352_v13 }
 0x33e   :  { %v9836_v6 = vpop.f32.mrb[20].mxu1 }
 0x33f   :  { %v8496_v7 = vpop.f32.mrb[21].mxu1 }
 0x346   :  { %v9838_v4 = vpop.f32.mrb[22].mxu1 }
 0x347   :  { %v8506_v11 = vpop.f32.mrb[23].mxu1 }
 0x34a   :  { %v9840_v12 = vpop.f32.mrb[24].mxu1 }
 0x34b   :  { %v8516_v14 = vpop.f32.mrb[25].mxu1 }
 0x34e   :  { %v9842_v15 = vpop.f32.mrb[26].mxu1 }
 0x34f   :  { %v8526_v16 = vpop.f32.mrb[27].mxu1 }
 0x355   :  { %v1833_v17 = vpop.f32.mrb[28].mxu1 }
 0x356   :  { %v9844_v18 = vmul.f32 0.35355338, %v1833_v17  ;;  %v8536_v20 = vpop.f32.mrb[29].mxu1 }
 0x358   :  { %v2316_v21 = vsel %vm392_vm2, %v9844_v18, -inf }
 0x359   :  { %2317 = vmax.xlane.f32.xlu0 %v2316_v21  ;;  %v1989_v22 = vpop.f32.mrb[30].mxu1 }
 0x35a   :  { %v9848_v24 = vmul.f32 0.35355338, %v1989_v22  ;;  %v8546_v25 = vpop.f32.mrb[31].mxu1 }
 0x35c   :  { %v2322_v28 = vsel %vm392_vm2, %v9848_v24, -inf }
 0x35d   :  { %2323 = vmax.xlane.f32.xlu1 %v2322_v28  ;;  %v2145_v29 = vpop.f32.mrb[32].mxu1 }
 0x35e   :  { %v8556_v34 = vpop.f32.mrb[33].mxu1  ;;  %v9878_v37 = vmul.f32 0.35355338, %v2145_v29 }
 0x360   :  { %v2328_v1 = vsel %vm392_vm2, %v9878_v37, -inf }
 0x361   :  { %v2301_v36 = vpop.f32.mrb[34].mxu1 }
 0x362   :  { %v8566_v49 = vpop.f32.mrb[35].mxu1  ;;  %v9882_v56 = vmul.f32 0.35355338, %v2301_v36  ;;  %v2626_v36 = vpop.permute.xlu1 %2625 }
 0x364   :  { %v2334_v7 = vsel %vm392_vm2, %v9882_v56, -inf }
 0x36e   :  { %3218 = vrot.lane.b32.xlu1 %v9553_v23, %s9355_s1 }
 0x36f   :  { %3298 = vrot.lane.b32.xlu0 %v9561_v27, %s9355_s1 }
 0x372   :  { %3296 = vrot.lane.b32.xlu1 %v9559_v26, %s9355_s1 }
 0x373   :  { %3376 = vrot.lane.b32.xlu0 %v9572_v31, %s9355_s1 }
 0x376   :  { %3374 = vrot.lane.b32.xlu1 %v9583_v38, %s9355_s1 }
 0x377   :  { %3454 = vrot.lane.b32.xlu0 %v9591_v40, %s9355_s1 }
 0x37a   :  { %3452 = vrot.lane.b32.xlu1 %v9603_v42, %s9355_s1 }
 0x37e   :  { %3530 = vrot.lane.b32.xlu1 %v9587_v39, %s9355_s1 }
 0x382   :  { %3608 = vrot.lane.b32.xlu1 %v9625_v45, %s9355_s1 }
 0x383   :  { %v9870_v50 = vpop.f32.mrb[20].mxu0 }
 0x384   :  { %v8491_v51 = vpop.f32.mrb[21].mxu0 }
 0x386   :  { %3686 = vrot.lane.b32.xlu1 %v9606_v43, %s9355_s1 }
 0x38a   :  { %3764 = vrot.lane.b32.xlu1 %v9641_v47, %s9355_s1 }
 0x38f   :  { %v9876_v30 = vpop.f32.mrb[22].mxu0 }
 0x390   :  { %v8501_v33 = vpop.f32.mrb[23].mxu0 }
 0x393   :  { %v9880_v52 = vpop.f32.mrb[24].mxu0 }
 0x394   :  { %v8511_v35 = vpop.f32.mrb[25].mxu0 }
 0x396   :  { %2329 = vmax.xlane.f32.xlu0 %v2328_v1  ;;  %v2780_v1 = vpop.permute.xlu1 %2779 }
 0x397   :  { %v9886_v2 = vpop.f32.mrb[26].mxu0 }
 0x398   :  { %v8521_v5 = vpop.f32.mrb[27].mxu0 }
 0x399   :  { %v9918_v5 = vpop.permute.xlu0 %3220 }
 0x39a   :  { %2335 = vmax.xlane.f32.xlu0 %v2334_v7 }
 0x39e   :  { %v1755_v11 = vpop.f32.mrb[28].mxu0 }
 0x39f   :  { %v8531_v14 = vpop.f32.mrb[29].mxu0  ;;  %v9908_v34 = vmul.f32 0.35355338, %v1755_v11  ;;  %v2934_v11 = vpop.permute.xlu1 %2933 }
 0x3a1   :  { %v2313_v51 = vsel %vm392_vm2, %v9908_v34, -inf }
 0x3a2   :  { %v1911_v16 = vpop.f32.mrb[30].mxu0 }
 0x3a3   :  { %v8541_v17 = vpop.f32.mrb[31].mxu0  ;;  %v9890_v22 = vmul.f32 0.35355338, %v1911_v16 }
 0x3a5   :  { %v2319_v29 = vsel %vm392_vm2, %v9890_v22, -inf }
 0x3a6   :  { %v2067_v20 = vpop.f32.mrb[32].mxu0 }
 0x3a7   :  { %v8551_v21 = vpop.f32.mrb[33].mxu0  ;;  %v9910_v49 = vmul.f32 0.35355338, %v2067_v20 }
 0x3a8   :  { %v1060_v21 = vsel %vm392_vm2, %v9731_v3, 0.0  ;;  %v1078_v3 = vsel %vm392_vm2, %v9755_v10, 0.0  ;;  %v1057_v10 = vsel %vm392_vm2, %v9784_v48, 0.0 }
 0x3a9   :  { %v2325_v35 = vsel %vm392_vm2, %v9910_v49, -inf }
 0x3aa   :  { %v2223_v25 = vpop.f32.mrb[34].mxu0 }
 0x3ab   :  { %v8561_v28 = vpop.f32.mrb[35].mxu0  ;;  %v9914_v33 = vmul.f32 0.35355338, %v2223_v25 }
 0x3ad   :  { %v2331_v7 = vsel %vm392_vm2, %v9914_v33, -inf }
 0x3ae   :  { %2320 = vmax.xlane.f32.xlu1 %v2319_v29  ;;  %v1066_v29 = vsel %vm392_vm2, %v9739_v8, 0.0 }
 0x3b0   :  { %3532 = vrot.lane.b32.xlu0 %v9574_v32, %s9355_s1 }
 0x3b4   :  { %3610 = vrot.lane.b32.xlu0 %v9611_v44, %s9355_s1 }
 0x3b8   :  { %3688 = vrot.lane.b32.xlu0 %v9593_v41, %s9355_s1 }
 0x3bc   :  { %3766 = vrot.lane.b32.xlu0 %v9630_v46, %s9355_s1 }
 0x3bf   :  { %2548 = vrot.lane.b32.xlu1 %v9651_v57, %s9354_s30 }
 0x3c3   :  { %2702 = vrot.lane.b32.xlu1 %v9662_v62, %s9354_s30 }
 0x3c7   :  { %2856 = vrot.lane.b32.xlu1 %v9660_v61, %s9354_s30 }
 0x3db   :  { %2314 = vmax.xlane.f32.xlu0 %v2313_v51  ;;  %v1072_v51 = vsel %vm392_vm2, %v9747_v9, 0.0 }
 0x3df   :  { %2326 = vmax.xlane.f32.xlu0 %v2325_v35 }
 0x3e3   :  { %2332 = vmax.xlane.f32.xlu0 %v2331_v7 }
 0x3e6   :  { %v2318_v14 = vpop.xlane.xlu0 %2317 }
 0x3e7   :  { %v2338_v16 = vsub.f32 %v9844_v18, %v2318_v14  ;;  %v1075_v14 = vsel %vm392_vm2, %v9810_v55, 0.0 }
 0x3e9   :  { %v2347_v17 = vmul.f32 1.442695, %v2338_v16 }
 0x3ea   :  { %v2324_v20 = vpop.xlane.xlu1 %2323  ;;  %v3299_v9 = vpop.permute.xlu0 %3298 }
 0x3eb   :  { %8983 = vpow2.f32 %v2347_v17  ;;  %v2340_v25 = vsub.f32 %v9848_v24, %v2324_v20  ;;  %1061 = vadd.xlane.f32.xlu1 %v1060_v21 }
 0x3ed   :  { %v2351_v28 = vmul.f32 1.442695, %v2340_v25 }
 0x3ee   :  { %v3377_v24 = vpop.permute.xlu0 %3376 }
 0x3ef   :  { %8985 = vpow2.f32 %v2351_v28  ;;  %1067 = vadd.xlane.f32.xlu1 %v1066_v29 }
 0x3f2   :  { %v3455_v35 = vpop.permute.xlu0 %3454 }
 0x3f3   :  { %1073 = vadd.xlane.f32.xlu1 %v1072_v51 }
 0x3f5   :  { %v8984_v18 = vpop.eup %8983 }
 0x3f6   :  { %8575 = vmatmul.mubr.msk.f32.vlgmr.msra.gmra.mrb[36].mxu1 %vm392_vm2, %v8984_v18 }
 0x3f7   :  { %8583 = vmatpush3.msra.mxu1 %v2626_v36  ;;  %1079 = vadd.xlane.f32.xlu1 %v1078_v3  ;;  %v1063_v36 = vsel %vm392_vm2, %v9794_v53, 0.0  ;;  %v3219_v53 = vpop.permute.xlu1 %3218 }
 0x3f8   :  { %8584 = vmatprep.mubr.msk.f32.mxu1 %vm9353_vm1, %v9352_v13  ;;  %8592 = vmatprep.subr.mxu1 %v9352_v13 }
 0x3f9   :  { %v9936_v8 = vpop.eup %8985  ;;  %2394 = vrot.lane.b32.xlu0 %v9653_v58, %s9354_s30 }
 0x3fa   :  { %8585 = vmatmul.mubr.msk.f32.vlgmr.msra.gmra.mrb[38].mxu1 %vm392_vm2, %v9936_v8 }
 0x3fb   :  { %8593 = vmatpush3.msra.mxu1 %v2780_v1  ;;  %8594 = vmatprep.mubr.msk.f32.mxu1 %vm9353_vm1, %v9352_v13  ;;  %v1069_v1 = vsel %vm392_vm2, %v9802_v54, 0.0  ;;  %v2364_v54 = vsel %vm392_vm2, %v8984_v18, 0.0  ;;  %v3297_v28 = vpop.permute.xlu1 %3296 }
 0x3fc   :  { %8602 = vmatprep.subr.mxu1 %v9352_v13 }
 0x408   :  { %4006 = vrot.lane.b32.xlu1 %v9658_v60, %s9355_s1 }
 0x40c   :  { %4082 = vrot.lane.b32.xlu1 %v9651_v57, %s9355_s1 }
 0x410   :  { %4158 = vrot.lane.b32.xlu1 %v9655_v59, %s9355_s1 }
 0x418   :  { %1058 = vadd.xlane.f32.xlu0 %v1057_v10 }
 0x41c   :  { %1064 = vadd.xlane.f32.xlu0 %v1063_v36 }
 0x420   :  { %1070 = vadd.xlane.f32.xlu0 %v1069_v1 }
 0x423   :  { %v2330_v7 = vpop.xlane.xlu0 %2329 }
 0x424   :  { %v2342_v16 = vsub.f32 %v9878_v37, %v2330_v7  ;;  %1076 = vadd.xlane.f32.xlu0 %v1075_v14 }
 0x426   :  { %v2355_v17 = vmul.f32 1.442695, %v2342_v16 }
 0x427   :  { %v2336_v48 = vpop.xlane.xlu0 %2335 }
 0x428   :  { %8987 = vpow2.f32 %v2355_v17  ;;  %v2344_v20 = vsub.f32 %v9882_v56, %v2336_v48  ;;  %v3375_v56 = vpop.permute.xlu1 %3374 }
 0x42a   :  { %v2359_v21 = vmul.f32 1.442695, %v2344_v20 }
 0x42c   :  { %8989 = vpow2.f32 %v2359_v21  ;;  %v3453_v29 = vpop.permute.xlu1 %3452 }
 0x430   :  { %v3531_v51 = vpop.permute.xlu1 %3530 }
 0x432   :  { %v8988_v25 = vpop.eup %8987 }
 0x433   :  { %8595 = vmatmul.mubr.msk.f32.vlgmr.msra.gmra.mrb[40].mxu1 %vm392_vm2, %v8988_v25  ;;  %v2376_v37 = vsel %vm392_vm2, %v8988_v25, 0.0 }
 0x434   :  { %8603 = vmatpush3.msra.mxu1 %v2934_v11  ;;  %2365 = vadd.xlane.f32.xlu1 %v2364_v54  ;;  %v3609_v3 = vpop.permute.xlu1 %3608 }
 0x435   :  { %8604 = vmatprep.mubr.msk.f32.mxu1 %vm9353_vm1, %v9352_v13  ;;  %8635 = vmatprep.subr.mxu1 %v9352_v13 }
 0x436   :  { %v8990_v55 = vpop.eup %8989 }
 0x437   :  { %8605 = vmatmul.mubr.msk.f32.vlgmr.msra.gmra.mrb[42].mxu1 %vm392_vm2, %v8990_v55  ;;  %v2382_v11 = vsel %vm392_vm2, %v8990_v55, 0.0 }
 0x438   :  { %2377 = vadd.xlane.f32.xlu1 %v2376_v37  ;;  %8637 = vmatprep.mubr.msk.f32.mxu1 %vm9353_vm1, %v9352_v13  ;;  %v3687_v10 = vpop.permute.xlu1 %3686 }
 0x43a   :  { %3930 = vrot.lane.b32.xlu0 %v9653_v58, %s9355_s1 }
 0x43b   :  { %8636 = vmatpush3.xpose.msk.msra.mxu1 %vm392_vm2, %v9918_v5  ;;  %v3533_v5 = vpop.permute.xlu0 %3532 }
 0x43c   :  { %2383 = vadd.xlane.f32.xlu1 %v2382_v11  ;;  %8640 = vmatprep.subr.mxu1 %v9352_v13  ;;  %v3765_v36 = vpop.permute.xlu1 %3764 }
 0x43e   :  { %8638 = vmatmul.mubr.msk.f32.vlgmr.msra.gmra.mrb[44].mxu1 %vm392_vm2, %v3219_v53 }
 0x43f   :  { %8641 = vmatpush3.xpose.msk.msra.mxu1 %vm392_vm2, %v3299_v9  ;;  %8642 = vmatprep.mubr.msk.f32.mxu1 %vm9353_vm1, %v9352_v13  ;;  %v3611_v18 = vpop.permute.xlu0 %3610 }
 0x440   :  { %8645 = vmatprep.subr.mxu1 %v9352_v13 }
 0x442   :  { %8643 = vmatmul.mubr.msk.f32.vlgmr.msra.gmra.mrb[46].mxu1 %vm392_vm2, %v3297_v28 }
 0x443   :  { %8646 = vmatpush3.xpose.msk.msra.mxu1 %vm392_vm2, %v3377_v24  ;;  %8647 = vmatprep.mubr.msk.f32.mxu1 %vm9353_vm1, %v9352_v13  ;;  %v3689_v9 = vpop.permute.xlu0 %3688 }
 0x444   :  { %8650 = vmatprep.subr.mxu1 %v9352_v13 }
 0x446   :  { %8648 = vmatmul.mubr.msk.f32.vlgmr.msra.gmra.mrb[48].mxu1 %vm392_vm2, %v3375_v56 }
 0x447   :  { %8651 = vmatpush3.xpose.msk.msra.mxu1 %vm392_vm2, %v3455_v35  ;;  %8652 = vmatprep.mubr.msk.f32.mxu1 %vm9353_vm1, %v9352_v13  ;;  %v3767_v24 = vpop.permute.xlu0 %3766  ;;  %v2321_v35 = vpop.xlane.xlu1 %2320 }
 0x448   :  { %8655 = vmatprep.subr.mxu1 %v9352_v13  ;;  %v2339_v1 = vsub.f32 %v9890_v22, %v2321_v35 }
 0x44a   :  { %8653 = vmatmul.mubr.msk.f32.vlgmr.msra.gmra.mrb[50].mxu1 %vm392_vm2, %v3453_v29  ;;  %v2349_v17 = vmul.f32 1.442695, %v2339_v1 }
 0x44b   :  { %8656 = vmatpush3.xpose.msk.msra.mxu1 %vm392_vm2, %v3533_v5  ;;  %8657 = vmatprep.mubr.msk.f32.mxu1 %vm9353_vm1, %v9352_v13  ;;  %v2549_v7 = vpop.permute.xlu1 %2548 }
 0x44c   :  { %8660 = vmatprep.subr.mxu1 %v9352_v13 }
 0x44d   :  { %4310 = vrot.lane.b32.xlu1 %v9669_v0, %s9355_s1 }
 0x44e   :  { %8658 = vmatmul.mubr.msk.f32.vlgmr.msra.gmra.mrb[52].mxu1 %vm392_vm2, %v3531_v51 }
 0x44f   :  { %8661 = vmatpush3.xpose.msk.msra.mxu1 %vm392_vm2, %v3611_v18  ;;  %8662 = vmatprep.mubr.msk.f32.mxu1 %vm9353_vm1, %v9352_v13  ;;  %v2703_v53 = vpop.permute.xlu1 %2702  ;;  %v2370_v18 = vsel %vm392_vm2, %v9936_v8, 0.0 }
 0x450   :  { %8665 = vmatprep.subr.mxu1 %v9352_v13 }
 0x452   :  { %8663 = vmatmul.mubr.msk.f32.vlgmr.msra.gmra.mrb[54].mxu1 %vm392_vm2, %v3609_v3 }
 0x453   :  { %8666 = vmatpush3.xpose.msk.msra.mxu1 %vm392_vm2, %v3689_v9  ;;  %8667 = vmatprep.mubr.msk.f32.mxu1 %vm9353_vm1, %v9352_v13  ;;  %v2857_v55 = vpop.permute.xlu1 %2856 }
 0x454   :  { %8670 = vmatprep.subr.mxu1 %v9352_v13 }
 0x456   :  { %8668 = vmatmul.mubr.msk.f32.vlgmr.msra.gmra.mrb[56].mxu1 %vm392_vm2, %v3687_v10 }
 0x457   :  { %8671 = vmatpush3.xpose.msk.msra.mxu1 %vm392_vm2, %v3767_v24  ;;  %8672 = vmatprep.mubr.msk.f32.mxu1 %vm9353_vm1, %v9352_v13 }
 0x458   :  { %8680 = vmatprep.subr.mxu1 %v9352_v13 }
 0x45a   :  { %8673 = vmatmul.mubr.msk.f32.vlgmr.msra.gmra.mrb[58].mxu1 %vm392_vm2, %v3765_v36 }
 0x45b   :  { %8682 = vmatprep.mubr.msk.f32.mxu1 %vm9353_vm1, %v9352_v13 }
 0x468   :  { %v2315_v14 = vpop.xlane.xlu0 %2314 }
 0x469   :  { %v2337_v16 = vsub.f32 %v9908_v34, %v2315_v14 }
 0x46b   :  { %v2345_v48 = vmul.f32 1.442695, %v2337_v16 }
 0x46c   :  { %v2327_v20 = vpop.xlane.xlu0 %2326 }
 0x46d   :  { %8991 = vpow2.f32 %v2345_v48  ;;  %v2341_v21 = vsub.f32 %v9910_v49, %v2327_v20 }
 0x46e   :  { %8993 = vpow2.f32 %v2349_v17 }
 0x46f   :  { %v2353_v54 = vmul.f32 1.442695, %v2341_v21 }
 0x470   :  { %v2333_v25 = vpop.xlane.xlu0 %2332 }
 0x471   :  { %v2343_v28 = vsub.f32 %v9914_v33, %v2333_v25  ;;  %8995 = vpow2.f32 %v2353_v54 }
 0x473   :  { %v2357_v37 = vmul.f32 1.442695, %v2343_v28 }
 0x474   :  { %v2395_v56 = vpop.permute.xlu0 %2394 }
 0x475   :  { %8568 = vmatpush3.msra.mxu0 %v2395_v56  ;;  %8997 = vpow2.f32 %v2357_v37 }
 0x476   :  { %8577 = vmatprep.subr.mxu0 %v9352_v13 }
 0x477   :  { %v8992_v22 = vpop.eup %8991 }
 0x478   :  { %v1062_v34 = vpop.xlane.xlu1 %1061  ;;  %8570 = vmatmul.mubr.msk.f32.vlgmr.msra.gmra.mrb[36].mxu0 %vm392_vm2, %v8992_v22  ;;  %v2361_v49 = vsel %vm392_vm2, %v8992_v22, 0.0  ;;  %v8994_v11 = vpop.eup %8993 }
 0x479   :  { %8999 = vrcp.f32 %v1062_v34  ;;  %8578 = vmatpush3.msra.mxu0 %v2549_v7  ;;  %2362 = vadd.xlane.f32.xlu0 %v2361_v49  ;;  %v2367_v29 = vsel %vm392_vm2, %v8994_v11, 0.0 }
 0x47a   :  { %8579 = vmatprep.mubr.msk.f32.mxu0 %vm9353_vm1, %v9352_v13  ;;  %8587 = vmatprep.subr.mxu0 %v9352_v13 }
 0x47b   :  { %v8996_v5 = vpop.eup %8995 }
 0x47c   :  { %v1068_v33 = vpop.xlane.xlu1 %1067  ;;  %8580 = vmatmul.mubr.msk.f32.vlgmr.msra.gmra.mrb[38].mxu0 %vm392_vm2, %v8994_v11  ;;  %v2373_v36 = vsel %vm392_vm2, %v8996_v5, 0.0 }
 0x47d   :  { %9001 = vrcp.f32 %v1068_v33  ;;  %8588 = vmatpush3.msra.mxu0 %v2703_v53  ;;  %2368 = vadd.xlane.f32.xlu0 %v2367_v29  ;;  %v10066_v53 = vld [vmem:[%s11063_s8] sm:$0xf] }
 0x47e   :  { %8589 = vmatprep.mubr.msk.f32.mxu0 %vm9353_vm1, %v9352_v13  ;;  %8597 = vmatprep.subr.mxu0 %v9352_v13 }
 0x47f   :  { %v8998_v3 = vpop.eup %8997 }
 0x480   :  { %v1074_v51 = vpop.xlane.xlu1 %1073  ;;  %8590 = vmatmul.mubr.msk.f32.vlgmr.msra.gmra.mrb[40].mxu0 %vm392_vm2, %v8996_v5  ;;  %v2379_v1 = vsel %vm392_vm2, %v8998_v3, 0.0 }
 0x481   :  { %9003 = vrcp.f32 %v1074_v51  ;;  %8598 = vmatpush3.msra.mxu0 %v2857_v55  ;;  %2371 = vadd.xlane.f32.xlu0 %v2370_v18 }
 0x482   :  { %8599 = vmatprep.mubr.msk.f32.mxu0 %vm9353_vm1, %v9352_v13 }
 0x483   :  { %v9000_v9 = vpop.eup %8999 }
 0x484   :  { %v10037_v10 = vmul.f32 %v9000_v9, %v9836_v6  ;;  %v1080_v24 = vpop.xlane.xlu1 %1079  ;;  %8600 = vmatmul.mubr.msk.f32.vlgmr.msra.gmra.mrb[42].mxu0 %vm392_vm2, %v8998_v3 }
 0x485   :  { %9005 = vrcp.f32 %v1080_v24  ;;  %2374 = vadd.xlane.f32.xlu0 %v2373_v36 }
 0x487   :  { %v9002_v35 = vpop.eup %9001 }
 0x488   :  { %v4007_v8 = vpop.permute.xlu1 %4006  ;;  %v10043_v7 = vmul.f32 %v9002_v35, %v9838_v4  ;;  %v8011_v4 = vld [vmem:[%s11063_s8 + $0x4] sm:$0xf] }
 0x489   :  { %8681 = vmatpush3.msra.mxu1 %v4007_v8  ;;  %2380 = vadd.xlane.f32.xlu0 %v2379_v1 }
 0x48a   :  { %8690 = vmatprep.subr.mxu1 %v9352_v13  ;;  %8935 = vmatprep.subr.msk.bf16.mxu0 %vm3041_vm3, %v8011_v4 }
 0x48b   :  { %v9004_v6 = vpop.eup %9003 }
 0x48c   :  { %v10047_v14 = vmul.f32 %v9004_v6, %v9840_v12  ;;  %v3043_v12 = vsel %vm3041_vm3, %v8011_v4, 0 }
 0x48d   :  { %8608 = vmatpush3.bf16.msra.mxu0 %v3043_v12 }
 0x48e   :  { %8936 = vmatprep.subr.msk.bf16.mxu0 %vm3041_vm3, %v10066_v53 }
 0x48f   :  { %v9006_v16 = vpop.eup %9005 }
 0x490   :  { %v10050_v17 = vmul.f32 %v9006_v16, %v9842_v15 }
 0x49f   :  { %4234 = vrot.lane.b32.xlu0 %v9662_v62, %s9355_s1 }
 0x4a5   :  { %v10078_v11 = vpop.xlane.xlu0 %1058 }
 0x4a9   :  { %v10086_v9 = vpop.xlane.xlu0 %1064 }
 0x4ad   :  { %v10094_v16 = vpop.xlane.xlu0 %1070 }
 0x4c9   :  { %v10054_v48 = vpop.f32.mrb[36].mxu1 }
 0x4ca   :  { %v8576_v20 = vpop.f32.mrb[37].mxu1 }
 0x4cd   :  { %v10061_v21 = vpop.f32.mrb[38].mxu1 }
 0x4ce   :  { %v8586_v15 = vpop.f32.mrb[39].mxu1 }
 0x506   :  { %v10070_v25 = vpop.f32.mrb[40].mxu1 }
 0x507   :  { %v8596_v54 = vpop.f32.mrb[41].mxu1 }
 0x50a   :  { %v10072_v28 = vpop.f32.mrb[42].mxu1 }
 0x50b   :  { %v8606_v55 = vpop.f32.mrb[43].mxu1 }
 0x511   :  { %v3292_v37 = vpop.f32.mrb[44].mxu1 }
 0x512   :  { %v10074_v56 = vmul.f32 0.35355338, %v3292_v37  ;;  %v8639_v22 = vpop.f32.mrb[45].mxu1  ;;  %v10102_v37 = vpop.xlane.xlu0 %1076 }
 0x514   :  { %v3850_v34 = vsel %vm392_vm2, %v10074_v56, -inf }
 0x515   :  { %3851 = vmax.xlane.f32.xlu0 %v3850_v34  ;;  %v3370_v49 = vpop.f32.mrb[46].mxu1 }
 0x516   :  { %v10080_v33 = vmul.f32 0.35355338, %v3370_v49  ;;  %v8644_v29 = vpop.f32.mrb[47].mxu1 }
 0x518   :  { %v3853_v5 = vsel %vm392_vm2, %v10080_v33, -inf }
 0x519   :  { %3854 = vmax.xlane.f32.xlu1 %v3853_v5  ;;  %v3448_v51 = vpop.f32.mrb[48].mxu1 }
 0x51a   :  { %v10084_v18 = vmul.f32 0.35355338, %v3448_v51  ;;  %v8649_v3 = vpop.f32.mrb[49].mxu1 }
 0x51b   :  { %v10110_v3 = vpop.permute.xlu0 %3930 }
 0x51c   :  { %v3856_v24 = vsel %vm392_vm2, %v10084_v18, -inf }
 0x51d   :  { %3857 = vmax.xlane.f32.xlu0 %v3856_v24  ;;  %v3526_v36 = vpop.f32.mrb[50].mxu1 }
 0x51e   :  { %v10090_v35 = vmul.f32 0.35355338, %v3526_v36  ;;  %v8654_v8 = vpop.f32.mrb[51].mxu1 }
 0x520   :  { %v3859_v1 = vsel %vm392_vm2, %v10090_v35, -inf }
 0x521   :  { %3860 = vmax.xlane.f32.xlu1 %v3859_v1  ;;  %v3604_v6 = vpop.f32.mrb[52].mxu1  ;;  %v2363_v1 = vpop.xlane.xlu0 %2362 }
 0x522   :  { %v10096_v20 = vmul.f32 0.35355338, %v3604_v6  ;;  %v8659_v4 = vpop.f32.mrb[53].mxu1  ;;  %v10116_v6 = vpop.permute.xlu1 %4082 }
 0x524   :  { %v3862_v12 = vsel %vm392_vm2, %v10096_v20, -inf }
 0x525   :  { %3863 = vmax.xlane.f32.xlu0 %v3862_v12  ;;  %v3682_v15 = vpop.f32.mrb[54].mxu1  ;;  %v2369_v4 = vpop.xlane.xlu0 %2368 }
 0x526   :  { %v10100_v54 = vmul.f32 0.35355338, %v3682_v15  ;;  %v8664_v55 = vpop.f32.mrb[55].mxu1  ;;  %v10118_v12 = vpop.permute.xlu1 %4158 }
 0x528   :  { %v3865_v22 = vsel %vm392_vm2, %v10100_v54, -inf }
 0x529   :  { %3866 = vmax.xlane.f32.xlu1 %v3865_v22  ;;  %v3760_v34 = vpop.f32.mrb[56].mxu1  ;;  %v2372_v55 = vpop.xlane.xlu0 %2371 }
 0x52a   :  { %v10106_v49 = vmul.f32 0.35355338, %v3760_v34  ;;  %v8669_v29 = vpop.f32.mrb[57].mxu1  ;;  %v2366_v15 = vpop.xlane.xlu1 %2365 }
 0x52b   :  { %9007 = vrcp.f32 %v2366_v15 }
 0x52c   :  { %v3868_v5 = vsel %vm392_vm2, %v10106_v49, -inf  ;;  %9009 = vrcp.f32 %v2363_v1 }
 0x52d   :  { %3869 = vmax.xlane.f32.xlu0 %v3868_v5  ;;  %v3838_v51 = vpop.f32.mrb[58].mxu1  ;;  %9011 = vrcp.f32 %v2372_v55  ;;  %v2375_v22 = vpop.xlane.xlu0 %2374 }
 0x52e   :  { %v10112_v24 = vmul.f32 0.35355338, %v3838_v51  ;;  %v8674_v36 = vpop.f32.mrb[59].mxu1  ;;  %v2378_v34 = vpop.xlane.xlu1 %2377  ;;  %9013 = vrcp.f32 %v2369_v4 }
 0x52f   :  { %9015 = vrcp.f32 %v2375_v22 }
 0x530   :  { %v3871_v8 = vsel %vm392_vm2, %v10112_v24, -inf  ;;  %9017 = vrcp.f32 %v2378_v34 }
 0x531   :  { %3872 = vmax.xlane.f32.xlu1 %v3871_v8  ;;  %v2381_v5 = vpop.xlane.xlu0 %2380  ;;  %9019 = vrcp.f32 %v10078_v11 }
 0x532   :  { %v2384_v36 = vpop.xlane.xlu1 %2383  ;;  %9021 = vrcp.f32 %v2381_v5 }
 0x533   :  { %9023 = vrcp.f32 %v2384_v36 }
 0x534   :  { %9025 = vrcp.f32 %v10086_v9 }
 0x535   :  { %v9008_v29 = vpop.eup %9007  ;;  %9027 = vrcp.f32 %v10094_v16 }
 0x536   :  { %v9010_v51 = vpop.eup %9009  ;;  %v3010_v4 = vmul.f32 %v9008_v29, %v10054_v48  ;;  %9029 = vrcp.f32 %v10102_v37 }
 0x537   :  { %v9012_v15 = vpop.eup %9011 }
 0x542   :  { %4462 = vrot.lane.b32.xlu1 %v9664_v63, %s9355_s1 }
 0x543   :  { %4386 = vrot.lane.b32.xlu0 %v9660_v61, %s9355_s1 }
 0x546   :  { %4654 = vrot.lane.b32.xlu1 %v9553_v23, %s9356_s7 }
 0x547   :  { %4656 = vrot.lane.b32.xlu0 %v9550_v19, %s9356_s7  ;;  %v3143_v19 = vsel %vm3041_vm3, %v10066_v53, 0  ;;  %v3012_v53 = vmul.f32 %v9012_v15, %v10061_v21 }
 0x54a   :  { %4734 = vrot.lane.b32.xlu1 %v9561_v27, %s9356_s7  ;;  %v9014_v27 = vpop.eup %9013 }
 0x54b   :  { %4812 = vrot.lane.b32.xlu0 %v9572_v31, %s9356_s7  ;;  %v2466_v8 = vpop.f32.mrb[36].mxu0 }
 0x54c   :  { %v3009_v1 = vmul.f32 %v9010_v51, %v2466_v8  ;;  %v8571_v23 = vpop.f32.mrb[37].mxu0 }
 0x54e   :  { %4732 = vrot.lane.b32.xlu1 %v9559_v26, %s9356_s7  ;;  %8609 = vmatprep.mubr.msk.f32.mxu0 %vm392_vm2, %v3009_v1  ;;  %v9016_v26 = vpop.eup %9015 }
 0x54f   :  { %4890 = vrot.lane.b32.xlu0 %v9591_v40, %s9356_s7  ;;  %v2620_v31 = vpop.f32.mrb[38].mxu0  ;;  %8610 = vmatmul.mubr.msk.f32.vlgmr.msra.gmra.mrb[44].mxu0 %vm392_vm2, %v3010_v4  ;;  %v9018_v55 = vpop.eup %9017 }
 0x550   :  { %v3011_v11 = vmul.f32 %v9014_v27, %v2620_v31  ;;  %v8581_v48 = vpop.f32.mrb[39].mxu0  ;;  %8622 = vmatpush3.bf16.msra.mxu0 %v3143_v19  ;;  %v3014_v21 = vmul.f32 %v9018_v55, %v10070_v25  ;;  %v9020_v9 = vpop.eup %9019 }
 0x551   :  { %8675 = vmatprep.subr.mxu0 %v9352_v13 }
 0x552   :  { %4810 = vrot.lane.b32.xlu1 %v9583_v38, %s9356_s7  ;;  %8612 = vmatprep.mubr.msk.f32.mxu0 %vm392_vm2, %v3011_v11  ;;  %v9022_v38 = vpop.eup %9021 }
 0x553   :  { %4968 = vrot.lane.b32.xlu0 %v9574_v32, %s9356_s7  ;;  %v2774_v40 = vpop.f32.mrb[40].mxu0  ;;  %8613 = vmatmul.mubr.msk.f32.gmra.mrb[46].mxu0 %vm392_vm2, %v3012_v53  ;;  %v9024_v32 = vpop.eup %9023 }
 0x554   :  { %v3013_v22 = vmul.f32 %v9016_v26, %v2774_v40  ;;  %v8591_v34 = vpop.f32.mrb[41].mxu0  ;;  %v3016_v36 = vmul.f32 %v9024_v32, %v10072_v28  ;;  %v9026_v25 = vpop.eup %9025 }
 0x555   :  { %v1675_v16 = vmul.f32 %v9026_v25, %v9876_v30  ;;  %v9028_v8 = vpop.eup %9027 }
 0x556   :  { %4888 = vrot.lane.b32.xlu1 %v9603_v42, %s9356_s7  ;;  %8615 = vmatprep.mubr.msk.f32.mxu0 %vm392_vm2, %v3013_v22  ;;  %v1673_v42 = vmul.f32 %v9020_v9, %v9870_v50  ;;  %v9030_v50 = vpop.eup %9029 }
 0x557   :  { %v2928_v29 = vpop.f32.mrb[42].mxu0  ;;  %8616 = vmatmul.mubr.msk.f32.gmra.mrb[48].mxu0 %vm392_vm2, %v3014_v21  ;;  %v1679_v30 = vmul.f32 %v9030_v50, %v9886_v2 }
 0x558   :  { %v3015_v5 = vmul.f32 %v9022_v38, %v2928_v29  ;;  %v8601_v51 = vpop.f32.mrb[43].mxu0 }
 0x55a   :  { %5046 = vrot.lane.b32.xlu1 %v9611_v44, %s9356_s7  ;;  %8618 = vmatprep.mubr.msk.f32.mxu0 %vm392_vm2, %v3015_v5  ;;  %v1677_v44 = vmul.f32 %v9028_v8, %v9880_v52  ;;  %v4235_v52 = vpop.permute.xlu0 %4234 }
 0x55b   :  { %8619 = vmatmul.mubr.msk.f32.gmra.mrb[50].mxu0 %vm392_vm2, %v3016_v36 }
 0x55c   :  { %8623 = vmatprep.mubr.msk.f32.mxu0 %vm392_vm2, %v1673_v42 }
 0x55f   :  { %8624 = vmatmul.mubr.msk.f32.vlgmr.msra.gmra.mrb[44].mxu0 %vm392_vm2, %v10037_v10  ;;  %v4311_v10 = vpop.permute.xlu1 %4310 }
 0x560   :  { %8676 = vmatpush3.msra.mxu0 %v10110_v3  ;;  %8626 = vmatprep.mubr.msk.f32.mxu0 %vm392_vm2, %v1675_v16 }
 0x561   :  { %8685 = vmatprep.subr.mxu0 %v9352_v13 }
 0x563   :  { %8627 = vmatmul.mubr.msk.f32.gmra.mrb[46].mxu0 %vm392_vm2, %v10043_v7 }
 0x564   :  { %8629 = vmatprep.mubr.msk.f32.mxu0 %vm392_vm2, %v1677_v44 }
 0x567   :  { %8630 = vmatmul.mubr.msk.f32.gmra.mrb[48].mxu0 %vm392_vm2, %v10047_v14 }
 0x568   :  { %8632 = vmatprep.mubr.msk.f32.mxu0 %vm392_vm2, %v1679_v30 }
 0x56b   :  { %8633 = vmatmul.mubr.msk.f32.gmra.mrb[50].mxu0 %vm392_vm2, %v10050_v17 }
 0x56c   :  { %8677 = vmatprep.mubr.msk.f32.mxu0 %vm9353_vm1, %v9352_v13 }
 0x5a2   :  { %v3852_v28 = vpop.xlane.xlu0 %3851 }
 0x5a3   :  { %v3874_v7 = vsub.f32 %v10074_v56, %v3852_v28 }
 0x5a5   :  { %v3882_v37 = vmul.f32 1.442695, %v3874_v7 }
 0x5a6   :  { %v3855_v3 = vpop.xlane.xlu1 %3854 }
 0x5a7   :  { %9031 = vpow2.f32 %v3882_v37  ;;  %v3875_v2 = vsub.f32 %v10080_v33, %v3855_v3 }
 0x5a9   :  { %v3884_v1 = vmul.f32 1.442695, %v3875_v2 }
 0x5aa   :  { %v3858_v14 = vpop.xlane.xlu0 %3857 }
 0x5ab   :  { %9033 = vpow2.f32 %v3884_v1  ;;  %v3876_v23 = vsub.f32 %v10084_v18, %v3858_v14 }
 0x5ad   :  { %v3886_v4 = vmul.f32 1.442695, %v3876_v23 }
 0x5ae   :  { %v3861_v17 = vpop.xlane.xlu1 %3860 }
 0x5af   :  { %9035 = vpow2.f32 %v3886_v4  ;;  %v3877_v19 = vsub.f32 %v10090_v35, %v3861_v17 }
 0x5b1   :  { %v9032_v15 = vpop.eup %9031  ;;  %v3888_v27 = vmul.f32 1.442695, %v3877_v19 }
 0x5b2   :  { %8678 = vmatmul.mubr.msk.f32.vlgmr.msra.gmra.mrb[52].mxu0 %vm392_vm2, %v9032_v15  ;;  %v3864_v56 = vpop.xlane.xlu0 %3863  ;;  %v3898_v31 = vsel %vm392_vm2, %v9032_v15, 0.0 }
 0x5b3   :  { %9037 = vpow2.f32 %v3888_v27  ;;  %8686 = vmatpush3.msra.mxu0 %v10116_v6  ;;  %v3878_v33 = vsub.f32 %v10096_v20, %v3864_v56  ;;  %3899 = vadd.xlane.f32.xlu0 %v3898_v31 }
 0x5b4   :  { %8687 = vmatprep.mubr.msk.f32.mxu0 %vm9353_vm1, %v9352_v13  ;;  %8695 = vmatprep.subr.mxu0 %v9352_v13 }
 0x5b5   :  { %v9034_v18 = vpop.eup %9033  ;;  %v3890_v35 = vmul.f32 1.442695, %v3878_v33 }
 0x5b6   :  { %8683 = vmatmul.mubr.msk.f32.vlgmr.msra.gmra.mrb[60].mxu1 %vm392_vm2, %v9034_v18  ;;  %v3867_v11 = vpop.xlane.xlu1 %3866  ;;  %v3901_v48 = vsel %vm392_vm2, %v9034_v18, 0.0 }
 0x5b7   :  { %9039 = vpow2.f32 %v3890_v35  ;;  %8691 = vmatpush3.msra.mxu1 %v10118_v12  ;;  %v3879_v6 = vsub.f32 %v10100_v54, %v3867_v11  ;;  %3902 = vadd.xlane.f32.xlu1 %v3901_v48 }
 0x5b8   :  { %8692 = vmatprep.mubr.msk.f32.mxu1 %vm9353_vm1, %v9352_v13  ;;  %8700 = vmatprep.subr.mxu1 %v9352_v13 }
 0x5b9   :  { %v9036_v20 = vpop.eup %9035  ;;  %v3892_v53 = vmul.f32 1.442695, %v3879_v6 }
 0x5ba   :  { %8688 = vmatmul.mubr.msk.f32.vlgmr.msra.gmra.mrb[54].mxu0 %vm392_vm2, %v9036_v20  ;;  %v3870_v26 = vpop.xlane.xlu0 %3869  ;;  %v3904_v40 = vsel %vm392_vm2, %v9036_v20, 0.0 }
 0x5bb   :  { %9041 = vpow2.f32 %v3892_v53  ;;  %8696 = vmatpush3.msra.mxu0 %v4235_v52  ;;  %v3880_v55 = vsub.f32 %v10106_v49, %v3870_v26  ;;  %3905 = vadd.xlane.f32.xlu0 %v3904_v40 }
 0x5bc   :  { %8697 = vmatprep.mubr.msk.f32.mxu0 %vm9353_vm1, %v9352_v13  ;;  %8705 = vmatprep.subr.mxu0 %v9352_v13 }
 0x5bd   :  { %v9038_v54 = vpop.eup %9037  ;;  %v3894_v12 = vmul.f32 1.442695, %v3880_v55 }
 0x5be   :  { %8693 = vmatmul.mubr.msk.f32.vlgmr.msra.gmra.mrb[62].mxu1 %vm392_vm2, %v9038_v54  ;;  %v3873_v22 = vpop.xlane.xlu1 %3872  ;;  %v3907_v34 = vsel %vm392_vm2, %v9038_v54, 0.0  ;;  %v4387_v38 = vpop.permute.xlu0 %4386 }
 0x5bf   :  { %9043 = vpow2.f32 %v3894_v12  ;;  %8701 = vmatpush3.msra.mxu1 %v4311_v10  ;;  %v3881_v21 = vsub.f32 %v10112_v24, %v3873_v22  ;;  %3908 = vadd.xlane.f32.xlu0 %v3907_v34 }
 0x5c0   :  { %8702 = vmatprep.mubr.msk.f32.mxu1 %vm9353_vm1, %v9352_v13  ;;  %8710 = vmatprep.subr.mxu1 %v9352_v13 }
 0x5c1   :  { %v9040_v49 = vpop.eup %9039  ;;  %v3896_v9 = vmul.f32 1.442695, %v3881_v21 }
 0x5c2   :  { %8698 = vmatmul.mubr.msk.f32.vlgmr.msra.gmra.mrb[56].mxu0 %vm392_vm2, %v9040_v49  ;;  %v4463_v29 = vpop.permute.xlu1 %4462  ;;  %v3910_v32 = vsel %vm392_vm2, %v9040_v49, 0.0  ;;  %v4657_v8 = vpop.permute.xlu0 %4656 }
 0x5c3   :  { %9045 = vpow2.f32 %v3896_v9  ;;  %8706 = vmatpush3.msra.mxu0 %v4387_v38  ;;  %3911 = vadd.xlane.f32.xlu0 %v3910_v32 }
 0x5c4   :  { %8707 = vmatprep.mubr.msk.f32.mxu0 %vm9353_vm1, %v9352_v13 }
 0x5c5   :  { %v9042_v24 = vpop.eup %9041 }
 0x5c6   :  { %8703 = vmatmul.mubr.msk.f32.vlgmr.msra.gmra.mrb[64].mxu1 %vm392_vm2, %v9042_v24  ;;  %v4655_v5 = vpop.permute.xlu1 %4654  ;;  %v3913_v51 = vsel %vm392_vm2, %v9042_v24, 0.0  ;;  %v4813_v30 = vpop.permute.xlu0 %4812 }
 0x5c7   :  { %8711 = vmatpush3.msra.mxu1 %v4463_v29  ;;  %3914 = vadd.xlane.f32.xlu1 %v3913_v51 }
 0x5c8   :  { %8712 = vmatprep.mubr.msk.f32.mxu1 %vm9353_vm1, %v9352_v13  ;;  %8729 = vmatprep.subr.mxu1 %v9352_v13 }
 0x5c9   :  { %v9044_v36 = vpop.eup %9043 }
 0x5ca   :  { %8708 = vmatmul.mubr.msk.f32.vlgmr.msra.gmra.mrb[58].mxu0 %vm392_vm2, %v9044_v36  ;;  %v4735_v42 = vpop.permute.xlu1 %4734  ;;  %v3916_v25 = vsel %vm392_vm2, %v9044_v36, 0.0  ;;  %v4891_v10 = vpop.permute.xlu0 %4890 }
 0x5cb   :  { %3917 = vadd.xlane.f32.xlu0 %v3916_v25 }
 0x5cd   :  { %v9046_v16 = vpop.eup %9045 }
 0x5ce   :  { %8713 = vmatmul.mubr.msk.f32.vlgmr.msra.gmra.mrb[66].mxu1 %vm392_vm2, %v9046_v16  ;;  %v4733_v44 = vpop.permute.xlu1 %4732 }
 0x5cf   :  { %8730 = vmatpush3.xpose.msk.msra.mxu1 %vm392_vm2, %v4657_v8  ;;  %8731 = vmatprep.mubr.msk.f32.mxu1 %vm9353_vm1, %v9352_v13 }
 0x5d0   :  { %8734 = vmatprep.subr.mxu1 %v9352_v13 }
 0x5d2   :  { %8732 = vmatmul.mubr.msk.f32.vlgmr.msra.gmra.mrb[68].mxu1 %vm392_vm2, %v4655_v5  ;;  %v4811_v50 = vpop.permute.xlu1 %4810 }
 0x5d3   :  { %8735 = vmatpush3.xpose.msk.msra.mxu1 %vm392_vm2, %v4735_v42  ;;  %8736 = vmatprep.mubr.msk.f32.mxu1 %vm9353_vm1, %v9352_v13 }
 0x5d4   :  { %8739 = vmatprep.subr.mxu1 %v9352_v13 }
 0x5d6   :  { %8737 = vmatmul.mubr.msk.f32.vlgmr.msra.gmra.mrb[70].mxu1 %vm392_vm2, %v4733_v44  ;;  %v4889_v52 = vpop.permute.xlu1 %4888 }
 0x5d7   :  { %8740 = vmatpush3.xpose.msk.msra.mxu1 %vm392_vm2, %v4813_v30  ;;  %8741 = vmatprep.mubr.msk.f32.mxu1 %vm9353_vm1, %v9352_v13 }
 0x5d8   :  { %5044 = vrot.lane.b32.xlu1 %v9625_v45, %s9356_s7  ;;  %8744 = vmatprep.subr.mxu1 %v9352_v13  ;;  %v8012_v45 = vld [vmem:[%s11063_s8 + $0x8] sm:$0xf] }
 0x5d9   :  { %8937 = vmatprep.subr.msk.bf16.mxu0 %vm3041_vm3, %v8012_v45 }
 0x5da   :  { %8742 = vmatmul.mubr.msk.f32.vlgmr.msra.gmra.mrb[72].mxu1 %vm392_vm2, %v4811_v50  ;;  %v5047_v28 = vpop.permute.xlu1 %5046 }
 0x5db   :  { %8745 = vmatpush3.xpose.msk.msra.mxu1 %vm392_vm2, %v4891_v10  ;;  %8746 = vmatprep.mubr.msk.f32.mxu1 %vm9353_vm1, %v9352_v13 }
 0x5dc   :  { %5202 = vrot.lane.b32.xlu1 %v9630_v46, %s9356_s7  ;;  %8754 = vmatprep.subr.mxu1 %v9352_v13  ;;  %v4571_v46 = vsel %vm3041_vm3, %v8012_v45, 0 }
 0x5dd   :  { %8716 = vmatpush3.bf16.msra.mxu0 %v4571_v46 }
 0x5de   :  { %8747 = vmatmul.mubr.msk.f32.vlgmr.msra.gmra.mrb[74].mxu1 %vm392_vm2, %v4889_v52  ;;  %8749 = vmatprep.subr.mxu0 %v9352_v13 }
 0x5df   :  { %8755 = vmatpush3.xpose.msk.msra.mxu1 %vm392_vm2, %v5047_v28  ;;  %8756 = vmatprep.mubr.msk.f32.mxu1 %vm9353_vm1, %v9352_v13 }
 0x5e0   :  { %8764 = vmatprep.subr.mxu1 %v9352_v13 }
 0x5e1   :  { %4966 = vrot.lane.b32.xlu0 %v9587_v39, %s9356_s7  ;;  %v3919_v39 = vsel %vm392_vm2, %v9046_v16, 0.0 }
 0x5e5   :  { %5124 = vrot.lane.b32.xlu0 %v9593_v41, %s9356_s7 }
 0x5e9   :  { %5122 = vrot.lane.b32.xlu0 %v9606_v43, %s9356_s7 }
 0x5ed   :  { %5366 = vrot.lane.b32.xlu0 %v9653_v58, %s9356_s7 }
 0x5f1   :  { %5670 = vrot.lane.b32.xlu0 %v9662_v62, %s9356_s7 }
 0x600   :  { %3920 = vadd.xlane.f32.xlu1 %v3919_v39 }
 0x611   :  { %5200 = vrot.lane.b32.xlu1 %v9641_v47, %s9356_s7 }
 0x615   :  { %5442 = vrot.lane.b32.xlu1 %v9658_v60, %s9356_s7 }
 0x619   :  { %5518 = vrot.lane.b32.xlu1 %v9651_v57, %s9356_s7  ;;  %v4969_v57 = vpop.permute.xlu0 %4968 }
 0x61d   :  { %5594 = vrot.lane.b32.xlu1 %v9655_v59, %s9356_s7 }
 0x621   :  { %5746 = vrot.lane.b32.xlu1 %v9669_v0, %s9356_s7 }
 0x640   :  { %v3900_v60 = vpop.xlane.xlu0 %3899 }
 0x641   :  { %9047 = vrcp.f32 %v3900_v60 }
 0x644   :  { %v3903_v41 = vpop.xlane.xlu1 %3902 }
 0x645   :  { %9049 = vrcp.f32 %v3903_v41 }
 0x648   :  { %v3906_v59 = vpop.xlane.xlu0 %3905 }
 0x649   :  { %9051 = vrcp.f32 %v3906_v59 }
 0x64b   :  { %v9048_v0 = vpop.eup %9047 }
 0x64c   :  { %v3909_v62 = vpop.xlane.xlu0 %3908 }
 0x64d   :  { %9053 = vrcp.f32 %v3909_v62 }
 0x64f   :  { %v9050_v1 = vpop.eup %9049 }
 0x650   :  { %v3912_v2 = vpop.xlane.xlu0 %3911 }
 0x651   :  { %9055 = vrcp.f32 %v3912_v2 }
 0x653   :  { %v9052_v17 = vpop.eup %9051 }
 0x654   :  { %v3915_v43 = vpop.xlane.xlu1 %3914 }
 0x655   :  { %9057 = vrcp.f32 %v3915_v43 }
 0x657   :  { %v9054_v33 = vpop.eup %9053 }
 0x658   :  { %v5045_v58 = vpop.permute.xlu1 %5044  ;;  %v3918_v31 = vpop.xlane.xlu0 %3917 }
 0x659   :  { %8757 = vmatmul.mubr.msk.f32.vlgmr.msra.gmra.mrb[76].mxu1 %vm392_vm2, %v5045_v58  ;;  %9059 = vrcp.f32 %v3918_v31 }
 0x65a   :  { %8766 = vmatprep.mubr.msk.f32.mxu1 %vm9353_vm1, %v9352_v13 }
 0x65b   :  { %v9056_v6 = vpop.eup %9055 }
 0x65c   :  { %v5203_v47 = vpop.permute.xlu1 %5202  ;;  %v4967_v12 = vpop.permute.xlu0 %4966 }
 0x65d   :  { %8765 = vmatpush3.xpose.msk.msra.mxu1 %vm392_vm2, %v5203_v47 }
 0x65e   :  { %8774 = vmatprep.subr.mxu1 %v9352_v13 }
 0x65f   :  { %v9058_v55 = vpop.eup %9057 }
 0x660   :  { %v5125_v29 = vpop.permute.xlu0 %5124 }
 0x663   :  { %v9060_v21 = vpop.eup %9059 }
 0x664   :  { %v5123_v42 = vpop.permute.xlu0 %5122 }
 0x668   :  { %v5367_v52 = vpop.permute.xlu0 %5366 }
 0x685   :  { %v4002_v7 = vpop.f32.mrb[52].mxu0 }
 0x686   :  { %v4538_v37 = vmul.f32 %v9048_v0, %v4002_v7  ;;  %v8679_v3 = vpop.f32.mrb[53].mxu0 }
 0x688   :  { %8717 = vmatprep.mubr.msk.f32.mxu0 %vm392_vm2, %v4538_v37  ;;  %v5671_v37 = vpop.permute.xlu0 %5670 }
 0x689   :  { %v4078_v14 = vpop.f32.mrb[60].mxu1 }
 0x68a   :  { %v4539_v23 = vmul.f32 %v9050_v1, %v4078_v14  ;;  %v8684_v4 = vpop.f32.mrb[61].mxu1 }
 0x68c   :  { %8718 = vmatmul.mubr.msk.f32.vlgmr.msra.gmra.mrb[44].mxu0 %vm392_vm2, %v4539_v23 }
 0x68d   :  { %8750 = vmatpush3.xpose.msk.msra.mxu0 %vm392_vm2, %v4969_v57  ;;  %v4154_v19 = vpop.f32.mrb[54].mxu0  ;;  %v3921_v15 = vpop.xlane.xlu1 %3920 }
 0x68e   :  { %v4540_v27 = vmul.f32 %v9052_v17, %v4154_v19  ;;  %v8689_v56 = vpop.f32.mrb[55].mxu0  ;;  %8759 = vmatprep.subr.mxu0 %v9352_v13  ;;  %9061 = vrcp.f32 %v3921_v15 }
 0x690   :  { %8720 = vmatprep.mubr.msk.f32.mxu0 %vm392_vm2, %v4540_v27 }
 0x691   :  { %v5201_v18 = vpop.permute.xlu1 %5200  ;;  %v4230_v35 = vpop.f32.mrb[62].mxu1 }
 0x692   :  { %v4541_v11 = vmul.f32 %v9054_v33, %v4230_v35  ;;  %v8694_v48 = vpop.f32.mrb[63].mxu1  ;;  %8767 = vmatmul.mubr.msk.f32.vlgmr.msra.gmra.mrb[78].mxu1 %vm392_vm2, %v5201_v18 }
 0x693   :  { %8776 = vmatprep.mubr.msk.f32.mxu1 %vm9353_vm1, %v9352_v13 }
 0x694   :  { %8721 = vmatmul.mubr.msk.f32.gmra.mrb[46].mxu0 %vm392_vm2, %v4541_v11 }
 0x695   :  { %v4306_v20 = vpop.f32.mrb[56].mxu0  ;;  %v5443_v53 = vpop.permute.xlu1 %5442 }
 0x696   :  { %v4542_v26 = vmul.f32 %v9056_v6, %v4306_v20  ;;  %v8699_v40 = vpop.f32.mrb[57].mxu0  ;;  %8775 = vmatpush3.msra.mxu1 %v5443_v53 }
 0x697   :  { %8784 = vmatprep.subr.mxu1 %v9352_v13 }
 0x698   :  { %8723 = vmatprep.mubr.msk.f32.mxu0 %vm392_vm2, %v4542_v26  ;;  %v9062_v32 = vpop.eup %9061 }
 0x699   :  { %v4382_v54 = vpop.f32.mrb[64].mxu1  ;;  %v5519_v57 = vpop.permute.xlu1 %5518 }
 0x69a   :  { %v4543_v22 = vmul.f32 %v9058_v55, %v4382_v54  ;;  %v8704_v34 = vpop.f32.mrb[65].mxu1 }
 0x69c   :  { %8724 = vmatmul.mubr.msk.f32.gmra.mrb[48].mxu0 %vm392_vm2, %v4543_v22 }
 0x69d   :  { %v4458_v49 = vpop.f32.mrb[58].mxu0  ;;  %v5595_v7 = vpop.permute.xlu1 %5594 }
 0x69e   :  { %v4544_v9 = vmul.f32 %v9060_v21, %v4458_v49  ;;  %v8709_v38 = vpop.f32.mrb[59].mxu0 }
 0x6a0   :  { %8726 = vmatprep.mubr.msk.f32.mxu0 %vm392_vm2, %v4544_v9 }
 0x6a1   :  { %v4534_v24 = vpop.f32.mrb[66].mxu1  ;;  %v5747_v3 = vpop.permute.xlu1 %5746 }
 0x6a2   :  { %v4545_v5 = vmul.f32 %v9062_v32, %v4534_v24  ;;  %v8714_v51 = vpop.f32.mrb[67].mxu1 }
 0x6a4   :  { %8727 = vmatmul.mubr.msk.f32.gmra.mrb[50].mxu0 %vm392_vm2, %v4545_v5 }
 0x6a5   :  { %v4728_v36 = vpop.f32.mrb[68].mxu1  ;;  %8751 = vmatprep.mubr.msk.f32.mxu0 %vm9353_vm1, %v9352_v13 }
 0x6a6   :  { %v5278_v25 = vmul.f32 0.35355338, %v4728_v36  ;;  %v8733_v16 = vpop.f32.mrb[69].mxu1 }
 0x6a8   :  { %8752 = vmatmul.mubr.msk.f32.vlgmr.msra.gmra.mrb[60].mxu0 %vm392_vm2, %v4967_v12  ;;  %v5286_v8 = vsel %vm392_vm2, %v5278_v25, -inf }
 0x6a9   :  { %8760 = vmatpush3.xpose.msk.msra.mxu0 %vm392_vm2, %v5125_v29  ;;  %5287 = vmax.xlane.f32.xlu0 %v5286_v8  ;;  %v4806_v44 = vpop.f32.mrb[70].mxu1 }
 0x6aa   :  { %v5279_v50 = vmul.f32 0.35355338, %v4806_v44  ;;  %v8738_v30 = vpop.f32.mrb[71].mxu1  ;;  %8761 = vmatprep.mubr.msk.f32.mxu0 %vm9353_vm1, %v9352_v13  ;;  %8769 = vmatprep.subr.mxu0 %v9352_v13 }
 0x6ac   :  { %8762 = vmatmul.mubr.msk.f32.vlgmr.msra.gmra.mrb[62].mxu0 %vm392_vm2, %v5123_v42  ;;  %v5289_v10 = vsel %vm392_vm2, %v5279_v50, -inf }
 0x6ad   :  { %8770 = vmatpush3.msra.mxu0 %v5367_v52  ;;  %5290 = vmax.xlane.f32.xlu1 %v5289_v10  ;;  %v4884_v28 = vpop.f32.mrb[72].mxu1 }
 0x6ae   :  { %v5280_v45 = vmul.f32 0.35355338, %v4884_v28  ;;  %v8743_v46 = vpop.f32.mrb[73].mxu1  ;;  %8771 = vmatprep.mubr.msk.f32.mxu0 %vm9353_vm1, %v9352_v13  ;;  %8779 = vmatprep.subr.mxu0 %v9352_v13 }
 0x6b0   :  { %v5292_v39 = vsel %vm392_vm2, %v5280_v45, -inf }
 0x6b1   :  { %5293 = vmax.xlane.f32.xlu0 %v5292_v39  ;;  %v4962_v41 = vpop.f32.mrb[74].mxu1 }
 0x6b2   :  { %v5281_v43 = vmul.f32 0.35355338, %v4962_v41  ;;  %v8748_v58 = vpop.f32.mrb[75].mxu1 }
 0x6b4   :  { %v5295_v47 = vsel %vm392_vm2, %v5281_v43, -inf }
 0x6b5   :  { %5296 = vmax.xlane.f32.xlu0 %v5295_v47 }
 0x72c   :  { %v5118_v60 = vpop.f32.mrb[76].mxu1 }
 0x72d   :  { %v10314_v59 = vmul.f32 0.35355338, %v5118_v60  ;;  %v8758_v62 = vpop.f32.mrb[77].mxu1 }
 0x72f   :  { %v5301_v0 = vsel %vm392_vm2, %v10314_v59, -inf }
 0x730   :  { %5302 = vmax.xlane.f32.xlu1 %v5301_v0 }
 0x736   :  { %v5288_v2 = vpop.xlane.xlu0 %5287 }
 0x737   :  { %v5310_v1 = vsub.f32 %v5278_v25, %v5288_v2 }
 0x739   :  { %v5318_v14 = vmul.f32 1.442695, %v5310_v1 }
 0x73a   :  { %v5291_v23 = vpop.xlane.xlu1 %5290 }
 0x73b   :  { %9063 = vpow2.f32 %v5318_v14  ;;  %v5311_v4 = vsub.f32 %v5279_v50, %v5291_v23 }
 0x73d   :  { %v5320_v17 = vmul.f32 1.442695, %v5311_v4 }
 0x73e   :  { %v5294_v19 = vpop.xlane.xlu0 %5293 }
 0x73f   :  { %9065 = vpow2.f32 %v5320_v17  ;;  %v5312_v15 = vsub.f32 %v5280_v45, %v5294_v19 }
 0x741   :  { %v5322_v27 = vmul.f32 1.442695, %v5312_v15 }
 0x742   :  { %v5297_v56 = vpop.xlane.xlu0 %5296 }
 0x743   :  { %9067 = vpow2.f32 %v5322_v27  ;;  %v5313_v31 = vsub.f32 %v5281_v43, %v5297_v56  ;;  %v8013_v43 = vld [vmem:[%s11063_s8 + $0xc] sm:$0xf] }
 0x745   :  { %v9064_v33 = vpop.eup %9063  ;;  %v5324_v18 = vmul.f32 1.442695, %v5313_v31 }
 0x746   :  { %8772 = vmatmul.mubr.msk.f32.vlgmr.msra.gmra.mrb[64].mxu0 %vm392_vm2, %v9064_v33 }
 0x747   :  { %9069 = vpow2.f32 %v5324_v18  ;;  %8780 = vmatpush3.msra.mxu0 %v5519_v57  ;;  %8781 = vmatprep.mubr.msk.f32.mxu0 %vm9353_vm1, %v9352_v13 }
 0x748   :  { %8789 = vmatprep.subr.mxu0 %v9352_v13 }
 0x749   :  { %v9066_v35 = vpop.eup %9065 }
 0x74a   :  { %8777 = vmatmul.mubr.msk.f32.vlgmr.msra.gmra.mrb[80].mxu1 %vm392_vm2, %v9066_v35  ;;  %v5337_v9 = vsel %vm392_vm2, %v9066_v35, 0.0 }
 0x74b   :  { %8785 = vmatpush3.msra.mxu1 %v5595_v7  ;;  %8786 = vmatprep.mubr.msk.f32.mxu1 %vm9353_vm1, %v9352_v13 }
 0x74c   :  { %8794 = vmatprep.subr.mxu1 %v9352_v13 }
 0x74d   :  { %v9068_v11 = vpop.eup %9067 }
 0x74e   :  { %8782 = vmatmul.mubr.msk.f32.vlgmr.msra.gmra.mrb[66].mxu0 %vm392_vm2, %v9068_v11  ;;  %v5340_v38 = vsel %vm392_vm2, %v9068_v11, 0.0 }
 0x74f   :  { %8790 = vmatpush3.msra.mxu0 %v5671_v37  ;;  %8791 = vmatprep.mubr.msk.f32.mxu0 %vm9353_vm1, %v9352_v13 }
 0x750   :  { %8799 = vmatprep.subr.mxu0 %v9352_v13 }
 0x751   :  { %v9070_v48 = vpop.eup %9069 }
 0x752   :  { %8787 = vmatmul.mubr.msk.f32.vlgmr.msra.gmra.mrb[82].mxu1 %vm392_vm2, %v9070_v48  ;;  %v5343_v24 = vsel %vm392_vm2, %v9070_v48, 0.0 }
 0x753   :  { %8795 = vmatpush3.msra.mxu1 %v5747_v3  ;;  %8796 = vmatprep.mubr.msk.f32.mxu1 %vm9353_vm1, %v9352_v13 }
 0x754   :  { %8804 = vmatprep.subr.mxu1 %v9352_v13 }
 0x765   :  { %v5274_v6 = vpop.f32.mrb[78].mxu1 }
 0x766   :  { %v5285_v20 = vmul.f32 0.35355338, %v5274_v6  ;;  %v8768_v53 = vpop.f32.mrb[79].mxu1 }
 0x768   :  { %v5307_v26 = vsel %vm392_vm2, %v5285_v20, -inf }
 0x769   :  { %5308 = vmax.xlane.f32.xlu1 %v5307_v26 }
 0x77a   :  { %5898 = vrot.lane.b32.xlu1 %v9664_v63, %s9356_s7  ;;  %v5334_v63 = vsel %vm392_vm2, %v9064_v33, 0.0 }
 0x77b   :  { %v5040_v40 = vpop.f32.mrb[60].mxu0 }
 0x77c   :  { %v5282_v55 = vmul.f32 0.35355338, %v5040_v40  ;;  %v8753_v54 = vpop.f32.mrb[61].mxu0 }
 0x77e   :  { %v5298_v12 = vsel %vm392_vm2, %v5282_v55, -inf }
 0x77f   :  { %v5196_v22 = vpop.f32.mrb[62].mxu0  ;;  %5299 = vmax.xlane.f32.xlu0 %v5298_v12 }
 0x780   :  { %v5284_v34 = vmul.f32 0.35355338, %v5196_v22  ;;  %v8763_v21 = vpop.f32.mrb[63].mxu0 }
 0x782   :  { %v5304_v49 = vsel %vm392_vm2, %v5284_v34, -inf }
 0x783   :  { %5305 = vmax.xlane.f32.xlu0 %v5304_v49 }
 0x799   :  { %5822 = vrot.lane.b32.xlu0 %v9660_v61, %s9356_s7 }
 0x79e   :  { %5338 = vadd.xlane.f32.xlu1 %v5337_v9 }
 0x7b8   :  { %5335 = vadd.xlane.f32.xlu0 %v5334_v63 }
 0x7bc   :  { %5341 = vadd.xlane.f32.xlu0 %v5340_v38 }
 0x7bd   :  { %v5303_v29 = vpop.xlane.xlu1 %5302 }
 0x7be   :  { %v5315_v32 = vsub.f32 %v10314_v59, %v5303_v29  ;;  %v6007_v59 = vsel %vm3041_vm3, %v8013_v43, 0 }
 0x7c0   :  { %v5328_v5 = vmul.f32 1.442695, %v5315_v32  ;;  %5344 = vadd.xlane.f32.xlu0 %v5343_v24  ;;  %v9247_v24 = vld [vmem:[%s11094_s4] sm:$0xff]  }
 0x7c2   :  { %9071 = vpow2.f32 %v5328_v5  ;;  %v6091_v5 = vunpack.c.h.bf16 %v9247_v24 }
 0x7cc   :  { %v9072_v51 = vpop.eup %9071 }
 0x7cd   :  { %8797 = vmatmul.mubr.msk.f32.vlgmr.msra.gmra.mrb[84].mxu1 %vm392_vm2, %v9072_v51  ;;  %v5349_v61 = vsel %vm392_vm2, %v9072_v51, 0.0  ;;  %v6090_v51 = vunpack.c.l.bf16 %v9247_v24 }
 0x7ce   :  { %5350 = vadd.xlane.f32.xlu1 %v5349_v61  ;;  %8806 = vmatprep.mubr.msk.f32.mxu1 %vm9353_vm1, %v9352_v13  ;;  %v10381_v61 = vld [vmem:[%s11064_s9] ss:$0 sm:$0xff] }
 0x7f6   :  { %v5309_v36 = vpop.xlane.xlu1 %5308 }
 0x7f7   :  { %v5317_v42 = vsub.f32 %v5285_v20, %v5309_v36 }
 0x7f9   :  { %v5332_v25 = vmul.f32 1.442695, %v5317_v42 }
 0x7fa   :  { %v5899_v16 = vpop.permute.xlu1 %5898 }
 0x7fb   :  { %9073 = vpow2.f32 %v5332_v25  ;;  %8805 = vmatpush3.msra.mxu1 %v5899_v16 }
 0x805   :  { %v9074_v8 = vpop.eup %9073 }
 0x806   :  { %8807 = vmatmul.mubr.msk.f32.vlgmr.msra.gmra.mrb[86].mxu1 %vm392_vm2, %v9074_v8  ;;  %v5355_v44 = vsel %vm392_vm2, %v9074_v8, 0.0 }
 0x807   :  { %5356 = vadd.xlane.f32.xlu1 %v5355_v44  ;;  %8831 = vmatprep.mubr.msk.f32.mxu1 %vm9353_vm1, %v9352_v13 }
 0x80c   :  { %v5300_v50 = vpop.xlane.xlu0 %5299 }
 0x80d   :  { %v5314_v30 = vsub.f32 %v5282_v55, %v5300_v50  ;;  %v9248_v50 = vld [vmem:[%s11094_s4 + $0x8] sm:$0xff]  }
 0x80f   :  { %v5326_v52 = vmul.f32 1.442695, %v5314_v30  ;;  %v6093_v30 = vunpack.c.h.bf16 %v9248_v50 }
 0x810   :  { %v5306_v10 = vpop.xlane.xlu0 %5305 }
 0x811   :  { %9075 = vpow2.f32 %v5326_v52  ;;  %v5316_v28 = vsub.f32 %v5284_v34, %v5306_v10  ;;  %v6092_v52 = vunpack.c.l.bf16 %v9248_v50 }
 0x813   :  { %v5330_v45 = vmul.f32 1.442695, %v5316_v28 }
 0x814   :  { %v5823_v58 = vpop.permute.xlu0 %5822 }
 0x815   :  { %9077 = vpow2.f32 %v5330_v45 }
 0x819   :  { %v5438_v46 = vpop.f32.mrb[64].mxu0 }
 0x81a   :  { %v8773_v39 = vpop.f32.mrb[65].mxu0 }
 0x81b   :  { %v9076_v41 = vpop.eup %9075 }
 0x81c   :  { %8792 = vmatmul.mubr.msk.f32.vlgmr.msra.gmra.mrb[68].mxu0 %vm392_vm2, %v9076_v41  ;;  %v5346_v47 = vsel %vm392_vm2, %v9076_v41, 0.0  ;;  %v10394_v41 = vld [vmem:[%s11065_s10] ss:$0 sm:$0xff] }
 0x81d   :  { %8800 = vmatpush3.msra.mxu0 %v5823_v58  ;;  %5347 = vadd.xlane.f32.xlu0 %v5346_v47  ;;  %v5514_v57 = vpop.f32.mrb[80].mxu1 }
 0x81e   :  { %v8778_v60 = vpop.f32.mrb[81].mxu1  ;;  %8801 = vmatprep.mubr.msk.f32.mxu0 %vm9353_vm1, %v9352_v13  ;;  %8938 = vmatprep.subr.msk.bf16.mxu0 %vm3041_vm3, %v8013_v43 }
 0x81f   :  { %v9078_v62 = vpop.eup %9077 }
 0x820   :  { %8802 = vmatmul.mubr.msk.f32.vlgmr.msra.gmra.mrb[70].mxu0 %vm392_vm2, %v9078_v62  ;;  %v5352_v0 = vsel %vm392_vm2, %v9078_v62, 0.0 }
 0x821   :  { %v5590_v7 = vpop.f32.mrb[66].mxu0  ;;  %5353 = vadd.xlane.f32.xlu0 %v5352_v0  ;;  %8810 = vmatpush3.bf16.msra.mxu0 %v6007_v59 }
 0x822   :  { %v8783_v37 = vpop.f32.mrb[67].mxu0 }
 0x825   :  { %v5666_v3 = vpop.f32.mrb[82].mxu1 }
 0x826   :  { %v8788_v2 = vpop.f32.mrb[83].mxu1 }
 0x82b   :  { %v5339_v1 = vpop.xlane.xlu1 %5338 }
 0x82c   :  { %9079 = vrcp.f32 %v5339_v1 }
 0x836   :  { %v9080_v17 = vpop.eup %9079 }
 0x837   :  { %v5975_v27 = vmul.f32 %v9080_v17, %v5514_v57 }
 0x845   :  { %v5336_v14 = vpop.xlane.xlu0 %5335 }
 0x846   :  { %9081 = vrcp.f32 %v5336_v14 }
 0x849   :  { %v5342_v23 = vpop.xlane.xlu0 %5341 }
 0x84a   :  { %9083 = vrcp.f32 %v5342_v23 }
 0x84d   :  { %v5345_v4 = vpop.xlane.xlu0 %5344 }
 0x84e   :  { %9085 = vrcp.f32 %v5345_v4 }
 0x850   :  { %v9082_v19 = vpop.eup %9081 }
 0x851   :  { %v5974_v15 = vmul.f32 %v9082_v19, %v5438_v46 }
 0x853   :  { %8811 = vmatprep.mubr.msk.f32.mxu0 %vm392_vm2, %v5974_v15 }
 0x854   :  { %v9084_v56 = vpop.eup %9083  ;;  %8812 = vmatmul.mubr.msk.f32.vlgmr.msra.gmra.mrb[44].mxu0 %vm392_vm2, %v5975_v27 }
 0x855   :  { %v5976_v31 = vmul.f32 %v9084_v56, %v5590_v7 }
 0x857   :  { %8814 = vmatprep.mubr.msk.f32.mxu0 %vm392_vm2, %v5976_v31 }
 0x858   :  { %v9086_v33 = vpop.eup %9085 }
 0x859   :  { %v5977_v18 = vmul.f32 %v9086_v33, %v5666_v3 }
 0x85b   :  { %8815 = vmatmul.mubr.msk.f32.gmra.mrb[46].mxu0 %vm392_vm2, %v5977_v18  ;;  %v5351_v53 = vpop.xlane.xlu1 %5350 }
 0x894   :  { %v5357_v40 = vpop.xlane.xlu1 %5356 }
 0x8a0   :  { %v5818_v35 = vpop.f32.mrb[84].mxu1 }
 0x8a1   :  { %v8798_v11 = vpop.f32.mrb[85].mxu1 }
 0x8aa   :  { %v5348_v20 = vpop.xlane.xlu0 %5347 }
 0x8ab   :  { %9087 = vrcp.f32 %v5348_v20 }
 0x8ac   :  { %9089 = vrcp.f32 %v5351_v53 }
 0x8ae   :  { %v5354_v26 = vpop.xlane.xlu0 %5353 }
 0x8af   :  { %9091 = vrcp.f32 %v5354_v26 }
 0x8b0   :  { %9093 = vrcp.f32 %v5357_v40 }
 0x8b5   :  { %v9088_v55 = vpop.eup %9087 }
 0x8b6   :  { %v9090_v12 = vpop.eup %9089 }
 0x8b7   :  { %v5979_v21 = vmul.f32 %v9090_v12, %v5818_v35 }
 0x8b9   :  { %v9092_v49 = vpop.eup %9091 }
 0x8ba   :  { %v9094_v63 = vpop.eup %9093 }
 0x8d9   :  { %v5970_v48 = vpop.f32.mrb[86].mxu1 }
 0x8da   :  { %v8808_v6 = vpop.f32.mrb[87].mxu1  ;;  %v5981_v32 = vmul.f32 %v9094_v63, %v5970_v48 }
 0x8ef   :  { %v5742_v54 = vpop.f32.mrb[68].mxu0 }
 0x8f0   :  { %v5978_v22 = vmul.f32 %v9088_v55, %v5742_v54  ;;  %v8793_v34 = vpop.f32.mrb[69].mxu0 }
 0x8f2   :  { %8817 = vmatprep.mubr.msk.f32.mxu0 %vm392_vm2, %v5978_v22 }
 0x8f3   :  { %v5894_v9 = vpop.f32.mrb[70].mxu0  ;;  %8818 = vmatmul.mubr.msk.f32.gmra.mrb[48].mxu0 %vm392_vm2, %v5979_v21 }
 0x8f4   :  { %v5980_v38 = vmul.f32 %v9092_v49, %v5894_v9  ;;  %v8803_v29 = vpop.f32.mrb[71].mxu0 }
 0x8f6   :  { %8820 = vmatprep.mubr.msk.f32.mxu0 %vm392_vm2, %v5980_v38 }
 0x8f7   :  { %8821 = vmatmul.mubr.msk.f32.gmra.mrb[50].mxu0 %vm392_vm2, %v5981_v32 }
 0x8f8   :  { %8853 = vmatprep.mubr.msk.f32.mxu0 %vm9353_vm1, %v9352_v13 }
 0x927   :  { %v8813_v36 = vpop.f32.mrb[44].mxu0 }
 0x928   :  { %v6099_v42 = vadd.f32 %v8813_v36, %v6091_v5  ;;  %v6043_v25 = vpop.f32.mrb[45].mxu0 }
 0x929   :  { %v6098_v16 = vadd.f32 %v6090_v51, %v6043_v25 }
 0x92a   :  { %v6113_v8 = vadd.f32 %v10381_v61, %v6099_v42 }
 0x92b   :  { %v6112_v44 = vadd.f32 %v10381_v61, %v6098_v16 }
 0x92c   :  { %6123 = vst.msk [vmem:[#allocation2 + $0x8] sm:$0xff] %vm148_vm0, %v6113_v8 }
 0x92d   :  { %6122 = vst.msk [vmem:[#allocation2] sm:$0xff] %vm148_vm0, %v6112_v44 }
 0x92e   :  { %v8816_v10 = vpop.f32.mrb[46].mxu0 }
 0x92f   :  { %v6101_v28 = vadd.f32 %v8816_v10, %v6093_v30  ;;  %v6053_v45 = vpop.f32.mrb[47].mxu0 }
 0x930   :  { %v6100_v46 = vadd.f32 %v6092_v52, %v6053_v45 }
 0x931   :  { %v6115_v39 = vadd.f32 %v10381_v61, %v6101_v28 }
 0x932   :  { %v6114_v43 = vadd.f32 %v10381_v61, %v6100_v46 }
 0x933   :  { %6125 = vst.msk [vmem:[#allocation2 + $0x18] sm:$0xff] %vm148_vm0, %v6115_v39  ;;  %v6131_v58 = vld [vmem:[#allocation2 + $0x8] sm:$0xff] }
 0x934   :  { %6124 = vst.msk [vmem:[#allocation2 + $0x10] sm:$0xff] %vm148_vm0, %v6114_v43  ;;  %v6146_v47 = vmul.f32 %v10394_v41, %v6131_v58  ;;  %v6324_v57 = vsel %vm148_vm0, %v6131_v58, 0.0  ;;  %v6388_v60 = vsel %vm148_vm0, %v6131_v58, -inf  ;;  %v6438_v59 = vmul.f32 %v6131_v58, %v6131_v58  ;;  %v6130_v62 = vld [vmem:[#allocation2] sm:$0xff] }
 0x935   :  { %v6325_v0 = vrot.slane %v6324_v57, 4  ;;  %v6389_v7 = vrot.slane %v6388_v60, 4  ;;  %v6145_v37 = vmul.f32 %v10394_v41, %v6130_v62  ;;  %v6317_v3 = vsel %vm148_vm0, %v6130_v62, 0.0 }
 0x936   :  { %v6156_v2 = vsel %vm148_vm0, %v6146_v47, 0.0  ;;  %v6452_v1 = vsel %vm148_vm0, %v6438_v59, 0.0  ;;  %v6318_v14 = vrot.slane %v6317_v3, 4  ;;  %v6381_v23 = vsel %vm148_vm0, %v6130_v62, -inf }
 0x937   :  { %v6326_v4 = vadd.f32 %v6325_v0, %v6324_v57  ;;  %v6390_v17 = vmax.f32 %v6388_v60, %v6389_v7  ;;  %v6453_v19 = vrot.slane %v6452_v1, 4  ;;  %6157 = vadd.xlane.f32.xlu1 %v6156_v2  ;;  %v6153_v15 = vsel %vm148_vm0, %v6145_v37, 0.0 }
 0x938   :  { %v6319_v27 = vadd.f32 %v6318_v14, %v6317_v3  ;;  %v6382_v56 = vrot.slane %v6381_v23, 4  ;;  %v6437_v31 = vmul.f32 %v6130_v62, %v6130_v62  ;;  %6154 = vadd.xlane.f32.xlu0 %v6153_v15 }
 0x939   :  { %v6327_v33 = vrot.slane %v6326_v4, 2  ;;  %v6454_v18 = vadd.f32 %v6453_v19, %v6452_v1  ;;  %v6391_v35 = vrot.slane %v6390_v17, 2 }
 0x93a   :  { %v6320_v11 = vrot.slane %v6319_v27, 2  ;;  %v6383_v48 = vmax.f32 %v6381_v23, %v6382_v56  ;;  %v6445_v6 = vsel %vm148_vm0, %v6437_v31, 0.0  ;;  %v6133_v20 = vld [vmem:[#allocation2 + $0x18] sm:$0xff] }
 0x93b   :  { %v6328_v53 = vadd.f32 %v6327_v33, %v6326_v4  ;;  %v6455_v26 = vrot.slane %v6454_v18, 2  ;;  %v6446_v40 = vrot.slane %v6445_v6, 4  ;;  %v6148_v12 = vmul.f32 %v10394_v41, %v6133_v20  ;;  %v6132_v30 = vld [vmem:[#allocation2 + $0x10] sm:$0xff] }
 0x93c   :  { %v6321_v55 = vadd.f32 %v6320_v11, %v6319_v27  ;;  %v6384_v54 = vrot.slane %v6383_v48, 2  ;;  %v6338_v22 = vsel %vm148_vm0, %v6133_v20, 0.0  ;;  %v6392_v9 = vmax.f32 %v6390_v17, %v6391_v35 }
 0x93d   :  { %v6329_v34 = vrot.slane %v6328_v53, 1  ;;  %v6456_v21 = vadd.f32 %v6455_v26, %v6454_v18  ;;  %v6447_v49 = vadd.f32 %v6446_v40, %v6445_v6  ;;  %v6162_v38 = vsel %vm148_vm0, %v6148_v12, 0.0 }
 0x93e   :  { %v6322_v63 = vrot.slane %v6321_v55, 1  ;;  %v6339_v29 = vrot.slane %v6338_v22, 4  ;;  %6163 = vadd.xlane.f32.xlu1 %v6162_v38  ;;  %v6385_v36 = vmax.f32 %v6383_v48, %v6384_v54  ;;  %v6402_v25 = vsel %vm148_vm0, %v6133_v20, -inf }
 0x93f   :  { %v6330_v32 = vadd.f32 %v6329_v34, %v6328_v53  ;;  %v6457_v24 = vrot.slane %v6456_v21, 1  ;;  %v6448_v5 = vrot.slane %v6447_v49, 2  ;;  %v6403_v50 = vrot.slane %v6402_v25, 4 }
 0x940   :  { %v6323_v51 = vadd.f32 %v6322_v63, %v6321_v55  ;;  %v6340_v42 = vadd.f32 %v6339_v29, %v6338_v22  ;;  %v6393_v52 = vrot.slane %v6392_v9, 1  ;;  %v6440_v45 = vmul.f32 %v6133_v20, %v6133_v20 }
 0x941   :  { %v6374_v16 = vmul.f32 0.125, %v6330_v32  ;;  %v6458_v8 = vadd.f32 %v6457_v24, %v6456_v21  ;;  %v6449_v44 = vadd.f32 %v6448_v5, %v6447_v49  ;;  %v6404_v58 = vmax.f32 %v6402_v25, %v6403_v50 }
 0x942   :  { %v6373_v10 = vmul.f32 0.125, %v6323_v51  ;;  %v6341_v28 = vrot.slane %v6340_v42, 2  ;;  %v6386_v47 = vrot.slane %v6385_v36, 1  ;;  %v6466_v60 = vsel %vm148_vm0, %v6440_v45, 0.0 }
 0x943   :  { %v6502_v46 = vmul.f32 0.125, %v6458_v8  ;;  %v6510_v39 = vmul.f32 %v6374_v16, %v6374_v16  ;;  %v6450_v43 = vrot.slane %v6449_v44, 1  ;;  %v6147_v59 = vmul.f32 %v10394_v41, %v6132_v30 }
 0x944   :  { %v6342_v57 = vadd.f32 %v6341_v28, %v6340_v42  ;;  %v6509_v7 = vmul.f32 %v6373_v10, %v6373_v10  ;;  %v6467_v37 = vrot.slane %v6466_v60, 4  ;;  %v6331_v1 = vsel %vm148_vm0, %v6132_v30, 0.0 }
 0x945   :  { %v6518_v62 = vsub.f32 %v6502_v46, %v6510_v39  ;;  %v6451_v0 = vadd.f32 %v6450_v43, %v6449_v44  ;;  %v6159_v2 = vsel %vm148_vm0, %v6147_v59, 0.0  ;;  %v6395_v14 = vsel %vm148_vm0, %v6132_v30, -inf }
 0x946   :  { %v6343_v3 = vrot.slane %v6342_v57, 1  ;;  %v6405_v4 = vrot.slane %v6404_v58, 2  ;;  %v6468_v17 = vadd.f32 %v6467_v37, %v6466_v60  ;;  %6160 = vadd.xlane.f32.xlu0 %v6159_v2  ;;  %v6332_v15 = vrot.slane %v6331_v1, 4 }
 0x947   :  { %v6501_v23 = vmul.f32 0.125, %v6451_v0  ;;  %v6526_v19 = vmax.f32 %v6518_v62, 0.0  ;;  %v6396_v27 = vrot.slane %v6395_v14, 4  ;;  %v6439_v56 = vmul.f32 %v6132_v30, %v6132_v30 }
 0x948   :  { %v6394_v31 = vmax.f32 %v6392_v9, %v6393_v52  ;;  %v6387_v33 = vmax.f32 %v6385_v36, %v6386_v47  ;;  %v6469_v35 = vrot.slane %v6468_v17, 2  ;;  %v6344_v11 = vadd.f32 %v6343_v3, %v6342_v57 }
 0x949   :  { %v6517_v18 = vsub.f32 %v6501_v23, %v6509_v7  ;;  %v6333_v48 = vadd.f32 %v6332_v15, %v6331_v1  ;;  %v6397_v6 = vmax.f32 %v6395_v14, %v6396_v27  ;;  %v6459_v20 = vsel %vm148_vm0, %v6439_v56, 0.0  ;;  %v6545_v1 = vld [vmem:[%s11067_s12 + $0x20] sm:$0xff]  ;;  %v6546_v14 = vld [vmem:[%s11067_s12 + $0x28] sm:$0xff] }
 0x94a   :  { %v6406_v26 = vmax.f32 %v6404_v58, %v6405_v4  ;;  %v6470_v40 = vadd.f32 %v6469_v35, %v6468_v17  ;;  %v6460_v55 = vrot.slane %v6459_v20, 4  ;;  %v6534_v54 = vmul.f32 1.1428572, %v6526_v19  ;;  %v6547_v17 = vld [vmem:[%s11067_s12 + $0x30] sm:$0xff]  ;;  %v6548_v19 = vld [vmem:[%s11067_s12 + $0x38] sm:$0xff]  ;;  %v6723_v27 = vld [vmem:[%s11067_s12 + $0x40] sm:$0xff] }
 0x94b   :  { %v6525_v53 = vmax.f32 %v6517_v18, 0.0  ;;  %v6334_v12 = vrot.slane %v6333_v48, 2  ;;  %v6398_v22 = vrot.slane %v6397_v6, 2  ;;  %v6376_v9 = vmul.f32 0.125, %v6344_v11  ;;  %v6724_v56 = vld [vmem:[%s11067_s12 + $0x48] sm:$0xff]  ;;  %v6726_v18 = vld [vmem:[%s11067_s12 + $0x58] sm:$0xff] }
 0x94c   :  { %v6471_v21 = vrot.slane %v6470_v40, 1  ;;  %v6461_v49 = vadd.f32 %v6460_v55, %v6459_v20  ;;  %v6557_v29 = vsel %vm6237_vm4, %v6374_v16, %v6373_v10  ;;  %v6407_v32 = vrot.slane %v6406_v26, 1  ;;  %v9250_v55 = vld [vmem:[%s11094_s4 + $0x18] sm:$0xff]  }
 0x94d   :  { %v6533_v34 = vmul.f32 1.1428572, %v6525_v53  ;;  %v6335_v63 = vadd.f32 %v6334_v12, %v6333_v48  ;;  %v6399_v38 = vmax.f32 %v6397_v6, %v6398_v22  ;;  %v6644_v51 = vsel %vm6237_vm4, %v6394_v31, %v6387_v33  ;;  %v6725_v33 = vld [vmem:[%s11067_s12 + $0x50] sm:$0xff] }
 0x94e   :  { %v6472_v24 = vadd.f32 %v6471_v21, %v6470_v40  ;;  %v6462_v5 = vrot.slane %v6461_v49, 2  ;;  %v6512_v50 = vmul.f32 %v6376_v9, %v6376_v9  ;;  %v6408_v28 = vmax.f32 %v6406_v26, %v6407_v32  ;;  %v9249_v48 = vld [vmem:[%s11094_s4 + $0x10] sm:$0xff]  }
 0x94f   :  { %v6336_v36 = vrot.slane %v6335_v63, 1  ;;  %v6400_v42 = vrot.slane %v6399_v38, 1  ;;  %v6735_v25 = vsel %vm6237_vm4, %v6534_v54, %v6533_v34  ;;  %v8882_v23 = vpack.c.bf16 %v6546_v14, %v6545_v1 }
 0x950   :  { %v6463_v8 = vadd.f32 %v6462_v5, %v6461_v49  ;;  %v6504_v44 = vmul.f32 0.125, %v6472_v24  ;;  %v9357_v4 = vmov 0.0|0.0   ;;  %v8885_v15 = vpack.c.bf16 %v6548_v19, %v6547_v17 }
 0x951   :  { %v6337_v30 = vadd.f32 %v6336_v36, %v6335_v63  ;;  %v6401_v52 = vmax.f32 %v6399_v38, %v6400_v42  ;;  %8881 = vmatprep.subr.bf16.mxu1 %v9357_v4  ;;  %8893 = vmatprep.subr.bf16.mxu0 %v9357_v4  ;;  %v8894_v31 = vpack.c.bf16 %v6724_v56, %v6723_v27  ;;  %v9358_v11 = vmov 0   ;;  %v10497_v27 = vld [vmem:[%s11067_s12] sm:$0xff]  ;;  %v10502_v56 = vld [vmem:[%s11067_s12 + $0x8] sm:$0xff] }
 0x952   :  { %v6464_v45 = vrot.slane %v6463_v8, 1  ;;  %v6520_v43 = vsub.f32 %v6504_v44, %v6512_v50  ;;  %8883 = vmatpush3.bf16.msra.mxu1 %v8882_v23  ;;  %v8897_v35 = vpack.c.bf16 %v6726_v18, %v6725_v33  ;;  %8952 = vset.pattern.permute.xlu0 %v9358_v11  ;;  %v6095_v6 = vunpack.c.h.bf16 %v9249_v48 }
 0x953   :  { %v6375_v46 = vmul.f32 0.125, %v6337_v30  ;;  %v6645_v16 = vsel %vm6239_vm5, %v6401_v52, %v6644_v51  ;;  %8884 = vmatprep.subr.bf16.mxu1 %v9357_v4  ;;  %8895 = vmatpush3.bf16.msra.mxu0 %v8894_v31  ;;  %v6094_v20 = vunpack.c.l.bf16 %v9249_v48  ;;  %v6097_v54 = vunpack.c.h.bf16 %v9250_v55 }
 0x954   :  { %v6465_v10 = vadd.f32 %v6464_v45, %v6463_v8  ;;  %v10424_v39 = vsel %vm6241_vm6, %v6408_v28, %v6645_v16  ;;  %v6528_v62 = vmax.f32 %v6520_v43, 0.0  ;;  %8896 = vmatprep.subr.bf16.mxu0 %v9357_v4  ;;  %v6096_v22 = vunpack.c.l.bf16 %v9250_v55 }
 0x955   :  { %v6511_v58 = vmul.f32 %v6375_v46, %v6375_v46  ;;  %v6558_v47 = vsel %vm6239_vm5, %v6375_v46, %v6557_v29 }
 0x956   :  { %v6503_v57 = vmul.f32 0.125, %v6465_v10  ;;  %v10428_v60 = vsel %vm6241_vm6, %v6376_v9, %v6558_v47  ;;  %v6536_v37 = vmul.f32 1.1428572, %v6528_v62  ;;  %8886 = vmatpush3.bf16.msra.mxu1 %v8885_v15 }
 0x957   :  { %8887 = vmatprep.subr.bf16.mxu1 %v9357_v4  ;;  %8898 = vmatpush3.bf16.msra.mxu0 %v8897_v35 }
 0x958   :  { %v6519_v59 = vsub.f32 %v6503_v57, %v6511_v58  ;;  %8902 = vmatprep.subr.bf16.mxu0 %v9357_v4 }
 0x95a   :  { %v6527_v0 = vmax.f32 %v6519_v59, 0.0 }
 0x95c   :  { %v6535_v7 = vmul.f32 1.1428572, %v6527_v0 }
 0x95e   :  { %v6736_v3 = vsel %vm6239_vm5, %v6535_v7, %v6735_v25 }
 0x95f   :  { %v10432_v2 = vsel %vm6241_vm6, %v6536_v37, %v6736_v3 }
 0x9c6   :  { %v8819_v53 = vpop.f32.mrb[48].mxu0 }
 0x9c7   :  { %v6103_v26 = vadd.f32 %v8819_v53, %v6095_v6  ;;  %v6063_v40 = vpop.f32.mrb[49].mxu0 }
 0x9c8   :  { %v6102_v12 = vadd.f32 %v6094_v20, %v6063_v40  ;;  %v8888_v40 = vpack.c.bf16 %v10502_v56, %v10497_v27  ;;  %v6913_v27 = vld [vmem:[%s11070_s16] sm:$0xff]  ;;  %v6914_v56 = vld [vmem:[%s11070_s16 + $0x8] sm:$0xff] }
 0x9c9   :  { %v6117_v34 = vadd.f32 %v10381_v61, %v6103_v26 }
 0x9ca   :  { %v6116_v21 = vadd.f32 %v10381_v61, %v6102_v12  ;;  %v8822_v49 = vpop.f32.mrb[50].mxu0 }
 0x9cb   :  { %6127 = vst.msk [vmem:[#allocation2 + $0x28] sm:$0xff] %vm148_vm0, %v6117_v34  ;;  %v6105_v9 = vadd.f32 %v8822_v49, %v6097_v54  ;;  %v6073_v63 = vpop.f32.mrb[51].mxu0 }
 0x9cc   :  { %6126 = vst.msk [vmem:[#allocation2 + $0x20] sm:$0xff] %vm148_vm0, %v6116_v21  ;;  %v6104_v38 = vadd.f32 %v6096_v22, %v6073_v63 }
 0x9cd   :  { %v6119_v29 = vadd.f32 %v10381_v61, %v6105_v9 }
 0x9ce   :  { %v6118_v32 = vadd.f32 %v10381_v61, %v6104_v38 }
 0x9cf   :  { %6129 = vst.msk [vmem:[#allocation2 + $0x38] sm:$0xff] %vm148_vm0, %v6119_v29 }
 0x9d0   :  { %6128 = vst.msk [vmem:[#allocation2 + $0x30] sm:$0xff] %vm148_vm0, %v6118_v32 }
 0x9d2   :  { %v6135_v24 = vld [vmem:[#allocation2 + $0x28] sm:$0xff] }
 0x9d3   :  { %v6150_v5 = vmul.f32 %v10394_v41, %v6135_v24  ;;  %v6352_v51 = vsel %vm148_vm0, %v6135_v24, 0.0  ;;  %v6416_v36 = vsel %vm148_vm0, %v6135_v24, -inf  ;;  %v6442_v42 = vmul.f32 %v6135_v24, %v6135_v24  ;;  %v6134_v25 = vld [vmem:[#allocation2 + $0x20] sm:$0xff] }
 0x9d4   :  { %v6353_v8 = vrot.slane %v6352_v51, 4  ;;  %v6417_v44 = vrot.slane %v6416_v36, 4  ;;  %v6149_v50 = vmul.f32 %v10394_v41, %v6134_v25  ;;  %v6345_v30 = vsel %vm148_vm0, %v6134_v25, 0.0 }
 0x9d5   :  { %v6168_v61 = vsel %vm148_vm0, %v6150_v5, 0.0  ;;  %v6480_v52 = vsel %vm148_vm0, %v6442_v42, 0.0  ;;  %v6346_v28 = vrot.slane %v6345_v30, 4  ;;  %v6409_v45 = vsel %vm148_vm0, %v6134_v25, -inf }
 0x9d6   :  { %v6354_v46 = vadd.f32 %v6353_v8, %v6352_v51  ;;  %v6481_v16 = vrot.slane %v6480_v52, 4  ;;  %6169 = vadd.xlane.f32.xlu1 %v6168_v61  ;;  %v6165_v10 = vsel %vm148_vm0, %v6149_v50, 0.0  ;;  %v6137_v43 = vld [vmem:[#allocation2 + $0x38] sm:$0xff]  ;;  %v6410_v47 = vrot.slane %v6409_v45, 4 }
 0x9d7   :  { %v6347_v58 = vadd.f32 %v6346_v28, %v6345_v30  ;;  %v6441_v57 = vmul.f32 %v6134_v25, %v6134_v25  ;;  %6166 = vadd.xlane.f32.xlu0 %v6165_v10  ;;  %v6152_v59 = vmul.f32 %v10394_v41, %v6137_v43  ;;  %v10489_v0 = vmax.f32 %v6416_v36, %v6417_v44  ;;  %v6136_v18 = vld [vmem:[#allocation2 + $0x30] sm:$0xff] }
 0x9d8   :  { %v6355_v62 = vrot.slane %v6354_v46, 2  ;;  %v6482_v7 = vadd.f32 %v6481_v16, %v6480_v52  ;;  %v6366_v37 = vsel %vm148_vm0, %v6137_v43, 0.0  ;;  %v6411_v1 = vmax.f32 %v6409_v45, %v6410_v47 }
 0x9d9   :  { %v6348_v3 = vrot.slane %v6347_v58, 2  ;;  %v6473_v14 = vsel %vm148_vm0, %v6441_v57, 0.0  ;;  %v6174_v23 = vsel %vm148_vm0, %v6152_v59, 0.0  ;;  %v6367_v33 = vrot.slane %v6366_v37, 4 }
 0x9da   :  { %v6356_v17 = vadd.f32 %v6355_v62, %v6354_v46  ;;  %v6483_v19 = vrot.slane %v6482_v7, 2  ;;  %v6474_v15 = vrot.slane %v6473_v14, 4  ;;  %6175 = vadd.xlane.f32.xlu1 %v6174_v23  ;;  %v6412_v35 = vrot.slane %v6411_v1, 2 }
 0x9db   :  { %v6349_v31 = vadd.f32 %v6348_v3, %v6347_v58  ;;  %v6430_v6 = vsel %vm148_vm0, %v6137_v43, -inf  ;;  %v6419_v20 = vrot.slane %v10489_v0, 2  ;;  %v6444_v26 = vmul.f32 %v6137_v43, %v6137_v43 }
 0x9dc   :  { %v6475_v48 = vadd.f32 %v6474_v15, %v6473_v14  ;;  %v6357_v55 = vrot.slane %v6356_v17, 1  ;;  %v6484_v54 = vadd.f32 %v6483_v19, %v6482_v7  ;;  %v6151_v22 = vmul.f32 %v10394_v41, %v6136_v18 }
 0x9dd   :  { %v6350_v53 = vrot.slane %v6349_v31, 1  ;;  %v6368_v34 = vadd.f32 %v6367_v33, %v6366_v37  ;;  %v6431_v21 = vrot.slane %v6430_v6, 4  ;;  %v6494_v49 = vsel %vm148_vm0, %v6444_v26, 0.0 }
 0x9de   :  { %v6476_v12 = vrot.slane %v6475_v48, 2  ;;  %v6359_v9 = vsel %vm148_vm0, %v6136_v18, 0.0  ;;  %v6413_v63 = vmax.f32 %v6411_v1, %v6412_v35  ;;  %v6495_v29 = vrot.slane %v6494_v49, 4 }
 0x9df   :  { %v6171_v32 = vsel %vm148_vm0, %v6151_v22, 0.0  ;;  %v6351_v24 = vadd.f32 %v6350_v53, %v6349_v31  ;;  %v6360_v5 = vrot.slane %v6359_v9, 4  ;;  %v6423_v51 = vsel %vm148_vm0, %v6136_v18, -inf }
 0x9e0   :  { %v6477_v38 = vadd.f32 %v6476_v12, %v6475_v48  ;;  %v6443_v36 = vmul.f32 %v6136_v18, %v6136_v18  ;;  %6172 = vadd.xlane.f32.xlu0 %v6171_v32  ;;  %v6485_v42 = vrot.slane %v6484_v54, 1  ;;  %v6496_v25 = vadd.f32 %v6495_v29, %v6494_v49 }
 0x9e1   :  { %v6424_v8 = vrot.slane %v6423_v51, 4  ;;  %v6361_v44 = vadd.f32 %v6360_v5, %v6359_v9  ;;  %v6358_v30 = vadd.f32 %v6357_v55, %v6356_v17  ;;  %v6369_v61 = vrot.slane %v6368_v34, 2 }
 0x9e2   :  { %v6478_v41 = vrot.slane %v6477_v38, 1  ;;  %v6487_v50 = vsel %vm148_vm0, %v6443_v36, 0.0  ;;  %v6497_v28 = vrot.slane %v6496_v25, 2  ;;  %v6432_v16 = vmax.f32 %v6430_v6, %v6431_v21  ;;  %v6544_v36 = vld [vmem:[%s11067_s12 + $0x18] sm:$0xff] }
 0x9e3   :  { %v6425_v45 = vmax.f32 %v6423_v51, %v6424_v8  ;;  %v6488_v46 = vrot.slane %v6487_v50, 4  ;;  %v6362_v10 = vrot.slane %v6361_v44, 2  ;;  %v6370_v43 = vadd.f32 %v6369_v61, %v6368_v34  ;;  %v6543_v51 = vld [vmem:[%s11067_s12 + $0x10] sm:$0xff] }
 0x9e4   :  { %v6479_v52 = vadd.f32 %v6478_v41, %v6477_v38  ;;  %v6377_v58 = vmul.f32 0.125, %v6351_v24  ;;  %v6486_v47 = vadd.f32 %v6485_v42, %v6484_v54  ;;  %v6378_v62 = vmul.f32 0.125, %v6358_v30 }
 0x9e5   :  { %v6426_v57 = vrot.slane %v6425_v45, 2  ;;  %v6489_v59 = vadd.f32 %v6488_v46, %v6487_v50  ;;  %v6414_v7 = vrot.slane %v6413_v63, 1  ;;  %v6498_v37 = vadd.f32 %v6497_v28, %v6496_v25 }
 0x9e6   :  { %v6363_v3 = vadd.f32 %v6362_v10, %v6361_v44  ;;  %v6371_v1 = vrot.slane %v6370_v43, 1  ;;  %v6420_v14 = vmax.f32 %v10489_v0, %v6419_v20  ;;  %v6505_v23 = vmul.f32 0.125, %v6479_v52 }
 0x9e7   :  { %v6490_v17 = vrot.slane %v6489_v59, 2  ;;  %v6513_v19 = vmul.f32 %v6377_v58, %v6377_v58  ;;  %v6560_v33 = vsel %vm6243_vm7, %v6377_v58, %v10428_v60  ;;  %v6427_v18 = vmax.f32 %v6425_v45, %v6426_v57 }
 0x9e8   :  { %v6364_v15 = vrot.slane %v6363_v3, 1  ;;  %v6372_v31 = vadd.f32 %v6371_v1, %v6370_v43  ;;  %v6506_v35 = vmul.f32 0.125, %v6486_v47  ;;  %v6514_v6 = vmul.f32 %v6378_v62, %v6378_v62  ;;  %v6915_v1 = vld [vmem:[%s11070_s16 + $0x10] sm:$0xff] }
 0x9e9   :  { %v6491_v48 = vadd.f32 %v6490_v17, %v6489_v59  ;;  %v6433_v53 = vrot.slane %v6432_v16, 2  ;;  %v6415_v26 = vmax.f32 %v6413_v63, %v6414_v7  ;;  %v6499_v12 = vrot.slane %v6498_v37, 1 }
 0x9ea   :  { %v6365_v55 = vadd.f32 %v6364_v15, %v6363_v3  ;;  %v6380_v54 = vmul.f32 0.125, %v6372_v31  ;;  %v6561_v0 = vsel %vm6245_vm8, %v6378_v62, %v6560_v33  ;;  %v6421_v20 = vrot.slane %v6420_v14, 1  ;;  %v6825_v15 = vld [vmem:[%s11069_s14 + $0x8] sm:$0xff] }
 0x9eb   :  { %v6492_v22 = vrot.slane %v6491_v48, 1  ;;  %v6521_v34 = vsub.f32 %v6505_v23, %v6513_v19  ;;  %v6428_v9 = vrot.slane %v6427_v18, 1  ;;  %v6500_v38 = vadd.f32 %v6499_v12, %v6498_v37  ;;  %v6824_v19 = vld [vmem:[%s11069_s14] sm:$0xff] }
 0x9ec   :  { %v6379_v21 = vmul.f32 0.125, %v6365_v55  ;;  %v6516_v49 = vmul.f32 %v6380_v54, %v6380_v54  ;;  %v6434_v29 = vmax.f32 %v6432_v16, %v6433_v53  ;;  %v6522_v32 = vsub.f32 %v6506_v35, %v6514_v6  ;;  %v6155_v6 = vpop.xlane.xlu0 %6154 }
 0x9ed   :  { %v6493_v60 = vadd.f32 %v6492_v22, %v6491_v48  ;;  %v6529_v24 = vmax.f32 %v6521_v34, 0.0  ;;  %v6508_v42 = vmul.f32 0.125, %v6500_v38  ;;  %v6429_v44 = vmax.f32 %v6427_v18, %v6428_v9 }
 0x9ee   :  { %v6515_v5 = vmul.f32 %v6379_v21, %v6379_v21  ;;  %v6562_v63 = vsel %vm6247_vm9, %v6379_v21, %v6561_v0  ;;  %v6647_v50 = vsel %vm6243_vm7, %v6415_v26, %v10424_v39  ;;  %v6530_v61 = vmax.f32 %v6522_v32, 0.0  ;;  %v6158_v26 = vpop.xlane.xlu1 %6157 }
 0x9ef   :  { %v6563_v41 = vsel %vm6249_vm10, %v6380_v54, %v6562_v63  ;;  %v6507_v25 = vmul.f32 0.125, %v6493_v60  ;;  %v6537_v8 = vmul.f32 1.1428572, %v6529_v24  ;;  %v6524_v30 = vsub.f32 %v6508_v42, %v6516_v49 }
 0x9f0   :  { %8832 = vmatmul.mubr.msk.f32.vlgmr.msra.gmra.mrb[88].mxu1 %vm148_vm0, %v6563_v41  ;;  %v8891_v52 = vpack.c.bf16 %v6544_v36, %v6543_v51  ;;  %v6422_v28 = vmax.f32 %v6420_v14, %v6421_v20  ;;  %v6435_v45 = vrot.slane %v6434_v29, 1  ;;  %v6538_v47 = vmul.f32 1.1428572, %v6530_v61  ;;  %v6916_v14 = vld [vmem:[%s11070_s16 + $0x18] sm:$0xff]  ;;  %v6161_v53 = vpop.xlane.xlu0 %6160 }
 0x9f1   :  { %8889 = vmatpush3.bf16.msra.mxu1 %v8888_v40  ;;  %8842 = vmatprep.mubr.msk.f32.mxu1 %vm9353_vm1, %v9352_v13  ;;  %v6523_v46 = vsub.f32 %v6507_v25, %v6515_v5  ;;  %v6532_v16 = vmax.f32 %v6524_v30, 0.0  ;;  %v6738_v39 = vsel %vm6243_vm7, %v6537_v8, %v10432_v2  ;;  %v8169_v40 = vld [vmem:[#allocation6] ss:$0 sm:$0xff]  ;;  %v8903_v37 = vpack.c.bf16 %v6914_v56, %v6913_v27  ;;  %v8173_v56 = vld [vmem:[%s11068_s13] ss:$0 sm:$0xff] }
 0x9f2   :  { %8890 = vmatprep.subr.bf16.mxu1 %v9357_v4  ;;  %v6648_v10 = vsel %vm6245_vm8, %v6422_v28, %v6647_v50  ;;  %v6436_v57 = vmax.f32 %v6434_v29, %v6435_v45  ;;  %v6739_v7 = vsel %vm6245_vm8, %v6538_v47, %v6738_v39  ;;  %v8906_v17 = vpack.c.bf16 %v6916_v14, %v6915_v1  ;;  %v6164_v54 = vpop.xlane.xlu1 %6163  ;;  %v6995_v47 = vld [vmem:[%s11072_s18] sm:$0xff] }
 0x9f3   :  { %v6531_v43 = vmax.f32 %v6523_v46, 0.0  ;;  %v6649_v58 = vsel %vm6247_vm9, %v6429_v44, %v6648_v10  ;;  %v6540_v62 = vmul.f32 1.1428572, %v6532_v16  ;;  %v6203_v31 = vlaneseq }
 0x9f4   :  { %v6650_v2 = vsel %vm6249_vm10, %v6436_v57, %v6649_v58  ;;  %v8900_v33 = vpack.c.bf16 %v6825_v15, %v6824_v19  ;;  %v9359_v35 = vmov -1e+30   ;;  %v6996_v57 = vld [vmem:[%s11072_s18 + $0x8] sm:$0xff]  ;;  %s11099_s18 = sld [smem:[#allocation19_spill]] }
 0x9f5   :  { %8892 = vmatpush3.bf16.msra.mxu1 %v8891_v52  ;;  %v6539_v59 = vmul.f32 1.1428572, %v6531_v43  ;;  %v10571_v18 = vshrl.u32 %v6203_v31, 7  ;;  %v6204_v12 = vand.u32 127, %v6203_v31 }
 0x9f6   :  { %6184 = vperm.xlu0 %8952, %v8169_v40   ;;  %8899 = vmatprep.subr.bf16.mxu1 %v9357_v4 }
 0x9f7   :  { %v6740_v3 = vsel %vm6247_vm9, %v6539_v59, %v6739_v7  ;;  %vm7159_vm11 = vcmp.eq.s32.totalorder %v10571_v18, 0  ;;  %v6207_v0 = vsub.s32 %v6204_v12, %v10571_v18  ;;  %vm7406_vm15 = vcmp.eq.s32.totalorder %v10571_v18, 5 }
 0x9f8   :  { %8843 = vmatmul.mubr.msk.f32.vlgmr.msra.gmra.mrb[90].mxu1 %vm148_vm0, %v6650_v2  ;;  %v6741_v23 = vsel %vm6249_vm10, %v6540_v62, %v6740_v3  ;;  %v10577_v48 = vsel %vm7159_vm11, 0.0, %v9359_v35  ;;  %v8909_v62 = vpack.c.bf16 %v6996_v57, %v6995_v47  ;;  %vm7187_vm3 = vcmp.lt.s32.totalorder %v10571_v18, 1 }
 0x9f9   :  { %8854 = vmatmul.mubr.msk.f32.vlgmr.msra.gmra.mrb[72].mxu0 %vm148_vm0, %v6741_v23  ;;  %8860 = vmatprep.mubr.msk.f32.mxu1 %vm9353_vm1, %v9352_v13  ;;  %7161 = vst.msk [vmem:[#allocation3] sm:$0xff] %vm392_vm2, %v10577_v48 }
 0x9fa   :  { %8904 = vmatpush3.bf16.msra.mxu0 %v8903_v37  ;;  %8871 = vmatprep.mubr.msk.f32.mxu0 %vm9353_vm1, %v9352_v13  ;;  %v8176_v37 = vld [vmem:[%s11071_s17] ss:$0 sm:$0xff] }
 0x9fb   :  { %8905 = vmatprep.subr.bf16.mxu0 %v9357_v4  ;;  %8901 = vmatpush3.bf16.msra.mxu1 %v8900_v33 }
 0x9fc   :  { %8908 = vmatprep.subr.bf16.mxu1 %v9357_v4 }
 0x9fe   :  { %8907 = vmatpush3.bf16.msra.mxu0 %v8906_v17 }
 0xa01   :  { %8872 = vmatmul.mubr.msk.f32.vlgmr.msra.gmra.mrb[74].mxu0 %vm148_vm0, %v6563_v41  ;;  %vm7467_vm0 = vcmp.eq.s32.totalorder %v10571_v18, 7 }
 0xa63   :  { %v6170_v22 = vpop.xlane.xlu1 %6169 }
 0xa64   :  { %v6167_v55 = vpop.xlane.xlu0 %6166 }
 0xa67   :  { %v6176_v5 = vpop.xlane.xlu1 %6175 }
 0xa6d   :  { %v6173_v4 = vpop.xlane.xlu0 %6172 }
 0xa75   :  { %v6185_v20 = vpop.permute.xlu0 %6184 }
 0xa76   :  { %v6187_v34 = vadd.f32 %v6185_v20, %v6155_v6  ;;  %v6188_v21 = vadd.f32 %v6185_v20, %v6158_v26  ;;  %v6189_v49 = vadd.f32 %v6185_v20, %v6161_v53  ;;  %v6190_v9 = vadd.f32 %v6185_v20, %v6164_v54  ;;  %v10609_v26 = vld [vmem:[%s11099_s18] sm:$0x1] }
 0xa77   :  { %v6191_v38 = vadd.f32 %v6185_v20, %v6167_v55  ;;  %v6192_v29 = vadd.f32 %v6185_v20, %v6170_v22  ;;  %v6193_v63 = vadd.f32 %v6185_v20, %v6173_v4  ;;  %v6194_v51 = vadd.f32 %v6185_v20, %v6176_v5 }
 0xa78   :  { %v6208_v60 = vrot.slane %v6187_v34, %v6207_v0  ;;  %v6212_v32 = vrot.slane %v6188_v21, %v6207_v0  ;;  %v6216_v24 = vrot.slane %v6189_v49, %v6207_v0  ;;  %v6220_v36 = vrot.slane %v6190_v9, %v6207_v0 }
 0xa79   :  { %v6224_v41 = vrot.slane %v6191_v38, %v6207_v0  ;;  %v6228_v8 = vrot.slane %v6192_v29, %v6207_v0  ;;  %v6232_v50 = vrot.slane %v6193_v63, %v6207_v0  ;;  %v6236_v61 = vrot.slane %v6194_v51, %v6207_v0 }
 0xa7a   :  { %v6238_v42 = vsel %vm6237_vm4, %v6212_v32, %v6208_v60  ;;  %v10604_v53 = vsub.s32 0, %v10571_v18  ;;  %v7164_v32 = vrot.slane %v10577_v48, 7  ;;  %v10621_v5 = vsel %vm7406_vm15, 0.0, %v9359_v35 }
 0xa7b   :  { %v6240_v25 = vsel %vm6239_vm5, %v6216_v24, %v6238_v42  ;;  %vm7562_vm5 = vcmp.le.s32.totalorder %v10609_v26, 6 }
 0xa7c   :  { %v6242_v44 = vsel %vm6241_vm6, %v6220_v36, %v6240_v25  ;;  %v6311_v12 = vrot.slane %v10609_v26, %v10604_v53  ;;  %v7165_v24 = vsel %vm7159_vm11, -1e+30, %v7164_v32  ;;  %vm7218_vm6 = vcmp.lt.s32.totalorder %v10571_v18, 2 }
 0xa7d   :  { %v6244_v30 = vsel %vm6243_vm7, %v6224_v41, %v6242_v44  ;;  %v7468_v41 = vrot.slane %v10621_v5, 1 }
 0xa7e   :  { %v6246_v52 = vsel %vm6245_vm8, %v6228_v8, %v6244_v30  ;;  %vm6312_vm14 = vcmp.lt.s32.totalorder %v10571_v18, %v6311_v12  ;;  %vm7561_vm8 = vcmp.le.s32.totalorder %v10571_v18, 6 }
 0xa7f   :  { %v6248_v28 = vsel %vm6247_vm9, %v6232_v50, %v6246_v52  ;;  %v7469_v35 = vsel %vm7467_vm0, -1e+30, %v7468_v41  ;;  %v7563_v41 = vsel %vm7562_vm5, 1, %v9358_v11 }
 0xa80   :  { %v6250_v45 = vsel %vm6249_vm10, %v6236_v61, %v6248_v28 }
 0xa81   :  { %6252 = vxpose.xlu1.b32.start.end [1/1] (short) (narrow) %v6250_v45, 8 }
 0xac3   :  { %v6632_v46 = vpop.f32.mrb[88].mxu1 }
 0xac4   :  { %v8833_v16 = vpop.f32.mrb[89].mxu1 }
 0xacb   :  { %v6719_v10 = vpop.f32.mrb[90].mxu1 }
 0xacc   :  { %v6720_v43 = vadd.f32 %v6719_v10, %v6632_v46  ;;  %v8844_v39 = vpop.f32.mrb[91].mxu1  ;;  %v6810_v27 = vpop.f32.mrb[72].mxu0 }
 0xacd   :  { %v8855_v40 = vpop.f32.mrb[73].mxu0 }
 0xace   :  { %v6814_v58 = vadd.f32 %v6810_v27, %v6720_v43 }
 0xad0   :  { %v6822_v59 = vadd.f32 %v8173_v56, %v6814_v58 }
 0xad2   :  { %v6823_v7 = vmax.f32 %v6822_v59, 0.0 }
 0xad4   :  { %v6990_v2 = vpop.f32.mrb[74].mxu0  ;;  %8861 = vmatmul.mubr.msk.f32.vlgmr.msra.gmra.mrb[92].mxu1 %vm6833_vm12, %v6823_v7 }
 0xad5   :  { %v6991_v3 = vadd.f32 %v8176_v37, %v6990_v2  ;;  %v8873_v1 = vpop.f32.mrb[75].mxu0  ;;  %8910 = vmatpush3.bf16.msra.mxu1 %v8909_v62  ;;  %8878 = vmatprep.mubr.msk.f32.mxu1 %vm9353_vm1, %v9352_v13  ;;  %vm7188_vm1 = vcmp.le.s32.totalorder %v10571_v18, 5 }
 0xad6   :  { %vm7189_vm4 = vmand %vm7187_vm3, %vm7188_vm1 }
 0xad7   :  { %v6994_v14 = vmax.f32 %v6991_v3, 0.0  ;;  %vm7219_vm7 = vmand %vm7218_vm6, %vm7188_vm1  ;;  %vm7701_vm6 = vcmp.le.s32.totalorder %v10609_v26, 4 }
 0xad9   :  { %8879 = vmatmul.mubr.msk.f32.vlgmr.msra.gmra.mrb[94].mxu1 %vm6833_vm12, %v6994_v14 }
 0xb01   :  { %v6268_v23 = vpop.trf.xlu1 }
 0xb02   :  { %v6284_v17 = vand.u32 2147483647, %v6268_v23  ;;  %v6299_v54 = vsub.f32 0.0, %v6268_v23  ;;  %v6297_v20 = vmin.f32 %v6268_v23, 0.0 }
 0xb04   :  { %v6285_v19 = vsub.f32 0.0, %v6284_v17  ;;  %v6300_v34 = vmin.f32 %v6299_v54, 0.0 }
 0xb06   :  { %v6286_v15 = vmul.f32 1.442695, %v6285_v19 }
 0xb08   :  { %9095 = vpow2.f32 %v6286_v15 }
 0xb12   :  { %v9096_v31 = vpop.eup %9095 }
 0xb13   :  { %v6288_v33 = vadd.f32 1.0, %v9096_v31  ;;  %v6291_v6 = vmul.f32 -0.5, %v9096_v31  ;;  %v6294_v55 = vand.u32 2147483647, %v9096_v31 }
 0xb15   :  { %9097 = vlog2.f32 %v6288_v33  ;;  %v6292_v13 = vadd.f32 1.0, %v6291_v6  ;;  %vm6295_vm13 = vcmp.lt.f32.partialorder %v6294_v55, 0.0004427343 }
 0xb17   :  { %v6293_v0 = vmul.f32 %v9096_v31, %v6292_v13 }
 0xb1f   :  { %v9098_v4 = vpop.eup %9097 }
 0xb20   :  { %v6290_v22 = vmul.f32 0.6931472, %v9098_v4 }
 0xb22   :  { %v6296_v21 = vsel %vm6295_vm13, %v6293_v0, %v6290_v22  ;;  %vm7631_vm13 = vcmp.le.s32.totalorder %v10609_v26, 5 }
 0xb23   :  { %v6298_v49 = vsub.f32 %v6297_v20, %v6296_v21  ;;  %v6301_v9 = vsub.f32 %v6300_v34, %v6296_v21 }
 0xb25   :  { %v6302_v38 = vmul.f32 1.442695, %v6298_v49  ;;  %v6313_v29 = vsel %vm6312_vm14, %v6298_v49, -1e+30  ;;  %v6315_v60 = vsel %vm6312_vm14, %v6301_v9, 0.0  ;;  %vm7248_vm14 = vcmp.lt.s32.totalorder %v10571_v18, 3 }
 0xb26   :  { %6314 = vst.msk [vmem:[#allocation4] sm:$0xff] %vm392_vm2, %v6313_v29  ;;  %6316 = vst.msk [vmem:[#allocation5] sm:$0xff] %vm392_vm2, %v6315_v60 }
 0xb27   :  { %9099 = vpow2.f32 %v6302_v38  ;;  %vm7249_vm15 = vmand %vm7248_vm14, %vm7188_vm1 }
 0xb2d   :  { %v8181_v63 = vld [vmem:[#allocation4] ss:$0 sm:$0xff]  ;;  %v8180_v51 = vld [vmem:[#allocation5] ss:$0 sm:$0xff]  ;;  %v10626_v30 = vld [vmem:[#allocation5 + $0x7] ss:$0 sm:$0xff] }
 0xb2e   :  { %v7170_v36 = vadd.f32 %v8180_v51, %v10577_v48  ;;  %v7175_v42 = vadd.f32 %v8181_v63, %v7165_v24  ;;  %v9255_v61 = vld [vmem:[#allocation4 + $0x7] ss:$0 sm:$0xff]  ;;  %v7474_v48 = vadd.f32 %v10626_v30, %v10621_v5  ;;  %v8183_v1 = vld [vmem:[#allocation4 + $0x1] ss:$0 sm:$0xff]  ;;  %v10638_v14 = vld [vmem:[#allocation5 + $0x1] ss:$0 sm:$0xff] }
 0xb2f   :  { %v7479_v45 = vadd.f32 %v9255_v61, %v7469_v35  ;;  %v9256_v6 = vld [vmem:[#allocation4 + $0x6] ss:$0 sm:$0xff]  ;;  %v10648_v4 = vld [vmem:[#allocation5 + $0x6] ss:$0 sm:$0xff] }
 0xb30   :  { %v7176_v25 = vmax.f32 %v7170_v36, %v7175_v42 }
 0xb31   :  { %v9100_v8 = vpop.eup %9099  ;;  %v7480_v46 = vmax.f32 %v7474_v48, %v7479_v45 }
 0xb32   :  { %v7177_v44 = vsub.f32 %v7170_v36, %v7176_v25  ;;  %v7180_v50 = vsub.f32 %v7175_v42, %v7176_v25  ;;  %6304 = vst.msk [vmem:[#allocation14] sm:$0xff] %vm392_vm2, %v9100_v8 }
 0xb33   :  { %v7481_v16 = vsub.f32 %v7474_v48, %v7480_v46  ;;  %v7484_v10 = vsub.f32 %v7479_v45, %v7480_v46  ;;  %v10662_v48 = vld [vmem:[#allocation5 + $0x2] ss:$0 sm:$0xff] }
 0xb34   :  { %v7178_v52 = vmul.f32 1.442695, %v7177_v44  ;;  %v7181_v28 = vmul.f32 1.442695, %v7180_v50 }
 0xb35   :  { %v7482_v43 = vmul.f32 1.442695, %v7481_v16  ;;  %v7485_v39 = vmul.f32 1.442695, %v7484_v10 }
 0xb36   :  { %9101 = vpow2.f32 %v7178_v52 }
 0xb37   :  { %9103 = vpow2.f32 %v7181_v28  ;;  %v8185_v28 = vld [vmem:[#allocation4 + $0x2] ss:$0 sm:$0xff] }
 0xb38   :  { %9105 = vpow2.f32 %v7482_v43 }
 0xb39   :  { %9107 = vpow2.f32 %v7485_v39 }
 0xb40   :  { %v9102_v27 = vpop.eup %9101 }
 0xb41   :  { %v9104_v56 = vpop.eup %9103 }
 0xb42   :  { %v7183_v40 = vadd.f32 %v9104_v56, %v9102_v27  ;;  %v9106_v58 = vpop.eup %9105  ;;  %v9257_v27 = vld [vmem:[#allocation4 + $0x5] ss:$0 sm:$0xff] }
 0xb43   :  { %v9108_v47 = vpop.eup %9107 }
 0xb44   :  { %9109 = vlog2.f32 %v7183_v40  ;;  %v7487_v57 = vadd.f32 %v9108_v47, %v9106_v58 }
 0xb46   :  { %9111 = vlog2.f32 %v7487_v57  ;;  %v10672_v57 = vld [vmem:[#allocation5 + $0x5] ss:$0 sm:$0xff] }
 0xb4e   :  { %v9110_v59 = vpop.eup %9109 }
 0xb4f   :  { %v7185_v62 = vmul.f32 0.6931472, %v9110_v59 }
 0xb50   :  { %v9112_v3 = vpop.eup %9111 }
 0xb51   :  { %v7186_v7 = vadd.f32 %v7185_v62, %v7176_v25  ;;  %v7489_v17 = vmul.f32 0.6931472, %v9112_v3  ;;  %v7567_v25 = vrot.slane %v7563_v41, %v10604_v53 }
 0xb53   :  { %v7190_v37 = vsel %vm7189_vm4, %v7186_v7, -1e+30  ;;  %v7490_v31 = vadd.f32 %v7489_v17, %v7480_v46  ;;  %vm7568_vm9 = vcmp.eq.s32.totalorder %v7567_v25, 1 }
 0xb54   :  { %7192 = vst.msk [vmem:[#allocation3 + $0x8] sm:$0xff] %vm392_vm2, %v7190_v37  ;;  %v7195_v2 = vrot.slane %v7190_v37, 7  ;;  %v7201_v19 = vadd.f32 %v10638_v14, %v7190_v37  ;;  %vm7569_vm10 = vmor %vm7561_vm8, %vm7568_vm9  ;;  %vm7700_vm9 = vcmp.le.s32.totalorder %v10571_v18, 4 }
 0xb55   :  { %v10645_v13 = vsel %vm7188_vm1, %v7490_v31, -1e+30  ;;  %vm7570_vm12 = vmand %vm7188_vm1, %vm7569_vm10 }
 0xb56   :  { %v7196_v23 = vsel %vm7159_vm11, -1e+30, %v7195_v2  ;;  %v7538_v12 = vrot.slane %v10645_v13, 1  ;;  %v7544_v34 = vadd.f32 %v10648_v4, %v10645_v13 }
 0xb57   :  { %v7206_v15 = vadd.f32 %v8183_v1, %v7196_v23 }
 0xb58   :  { %v7539_v20 = vsel %vm7467_vm0, -1e+30, %v7538_v12  ;;  %v7632_v12 = vsel %vm7631_vm13, 1, %v9358_v11 }
 0xb59   :  { %v7207_v33 = vmax.f32 %v7201_v19, %v7206_v15  ;;  %v7549_v21 = vadd.f32 %v9256_v6, %v7539_v20 }
 0xb5b   :  { %v7208_v55 = vsub.f32 %v7201_v19, %v7207_v33  ;;  %v7211_v54 = vsub.f32 %v7206_v15, %v7207_v33  ;;  %v7550_v49 = vmax.f32 %v7544_v34, %v7549_v21 }
 0xb5d   :  { %v7209_v22 = vmul.f32 1.442695, %v7208_v55  ;;  %v7212_v0 = vmul.f32 1.442695, %v7211_v54  ;;  %v7551_v9 = vsub.f32 %v7544_v34, %v7550_v49  ;;  %v7554_v38 = vsub.f32 %v7549_v21, %v7550_v49 }
 0xb5f   :  { %9113 = vpow2.f32 %v7209_v22  ;;  %v7552_v29 = vmul.f32 1.442695, %v7551_v9  ;;  %v7555_v60 = vmul.f32 1.442695, %v7554_v38  ;;  %v7636_v22 = vrot.slane %v7632_v12, %v10604_v53 }
 0xb60   :  { %9115 = vpow2.f32 %v7212_v0 }
 0xb61   :  { %9117 = vpow2.f32 %v7552_v29  ;;  %vm7637_vm3 = vcmp.eq.s32.totalorder %v7636_v22, 1  ;;  %v8187_v29 = vld [vmem:[#allocation4 + $0x3] ss:$0 sm:$0xff] }
 0xb62   :  { %9119 = vpow2.f32 %v7555_v60  ;;  %vm7638_vm4 = vmor %vm7188_vm1, %vm7637_vm3  ;;  %v10687_v60 = vld [vmem:[#allocation5 + $0x3] ss:$0 sm:$0xff]  ;;  %vm7308_vm3 = vcmp.lt.s32.totalorder %v10571_v18, 5 }
 0xb63   :  { %vm7639_vm5 = vmand %vm7188_vm1, %vm7638_vm4 }
 0xb64   :  { %vm7309_vm4 = vmand %vm7308_vm3, %vm7188_vm1 }
 0xb69   :  { %v9114_v32 = vpop.eup %9113 }
 0xb6a   :  { %v9116_v24 = vpop.eup %9115 }
 0xb6b   :  { %v7214_v63 = vadd.f32 %v9116_v24, %v9114_v32  ;;  %v9118_v51 = vpop.eup %9117 }
 0xb6c   :  { %v9120_v36 = vpop.eup %9119 }
 0xb6d   :  { %9121 = vlog2.f32 %v7214_v63  ;;  %v7557_v42 = vadd.f32 %v9120_v36, %v9118_v51 }
 0xb6f   :  { %9123 = vlog2.f32 %v7557_v42 }
 0xb77   :  { %v9122_v8 = vpop.eup %9121 }
 0xb78   :  { %v7216_v44 = vmul.f32 0.6931472, %v9122_v8  ;;  %v8178_v8 = vld [vmem:[#allocation8] ss:$0 sm:$0xff] }
 0xb79   :  { %v9124_v52 = vpop.eup %9123 }
 0xb7a   :  { %v7217_v50 = vadd.f32 %v7216_v44, %v7207_v33  ;;  %v7559_v46 = vmul.f32 0.6931472, %v9124_v52 }
 0xb7c   :  { %v7220_v61 = vsel %vm7219_vm7, %v7217_v50, -1e+30  ;;  %v7560_v43 = vadd.f32 %v7559_v46, %v7550_v49  ;;  %v8174_v49 = vld [vmem:[#allocation7] ss:$0 sm:$0xff]  ;;  %vm7278_vm7 = vcmp.lt.s32.totalorder %v10571_v18, 4 }
 0xb7d   :  { %7222 = vst.msk [vmem:[#allocation3 + $0x10] sm:$0xff] %vm392_vm2, %v7220_v61  ;;  %v7225_v35 = vrot.slane %v7220_v61, 7  ;;  %v7231_v16 = vadd.f32 %v10662_v48, %v7220_v61  ;;  %v10694_v61 = vld [vmem:[#allocation4 + $0x4] sm:$0x1]  ;;  %vm7279_vm8 = vmand %vm7278_vm7, %vm7188_vm1 }
 0xb7e   :  { %v10669_v56 = vsel %vm7570_vm12, %v7560_v43, -1e+30 }
 0xb7f   :  { %v7226_v45 = vsel %vm7159_vm11, -1e+30, %v7225_v35  ;;  %v7608_v47 = vrot.slane %v10669_v56, 1  ;;  %v7614_v37 = vadd.f32 %v10672_v57, %v10669_v56 }
 0xb80   :  { %v7236_v10 = vadd.f32 %v8185_v28, %v7226_v45 }
 0xb81   :  { %v7609_v7 = vsel %vm7467_vm0, -1e+30, %v7608_v47 }
 0xb82   :  { %v7237_v39 = vmax.f32 %v7231_v16, %v7236_v10  ;;  %v7619_v2 = vadd.f32 %v9257_v27, %v7609_v7 }
 0xb84   :  { %v7238_v40 = vsub.f32 %v7231_v16, %v7237_v39  ;;  %v7241_v58 = vsub.f32 %v7236_v10, %v7237_v39  ;;  %v7620_v3 = vmax.f32 %v7614_v37, %v7619_v2 }
 0xb86   :  { %v7239_v59 = vmul.f32 1.442695, %v7238_v40  ;;  %v7242_v62 = vmul.f32 1.442695, %v7241_v58  ;;  %v7621_v1 = vsub.f32 %v7614_v37, %v7620_v3  ;;  %v7624_v23 = vsub.f32 %v7619_v2, %v7620_v3  ;;  %v8188_v58 = vld [vmem:[#allocation5 + $0x4] ss:$0 sm:$0xff] }
 0xb87   :  { %v7687_v40 = vrot.slane %v10694_v61, %v10604_v53 }
 0xb88   :  { %9125 = vpow2.f32 %v7239_v59  ;;  %v7622_v17 = vmul.f32 1.442695, %v7621_v1  ;;  %v7625_v19 = vmul.f32 1.442695, %v7624_v23 }
 0xb89   :  { %9127 = vpow2.f32 %v7242_v62 }
 0xb8a   :  { %9129 = vpow2.f32 %v7622_v17 }
 0xb8b   :  { %9131 = vpow2.f32 %v7625_v19 }
 0xb92   :  { %v9126_v15 = vpop.eup %9125 }
 0xb93   :  { %v9128_v31 = vpop.eup %9127 }
 0xb94   :  { %v7244_v33 = vadd.f32 %v9128_v31, %v9126_v15  ;;  %v9130_v6 = vpop.eup %9129 }
 0xb95   :  { %v9132_v55 = vpop.eup %9131 }
 0xb96   :  { %9133 = vlog2.f32 %v7244_v33  ;;  %v7627_v54 = vadd.f32 %v9132_v55, %v9130_v6 }
 0xb98   :  { %9135 = vlog2.f32 %v7627_v54 }
 0xba0   :  { %v9134_v0 = vpop.eup %9133 }
 0xba1   :  { %v7246_v20 = vmul.f32 0.6931472, %v9134_v0 }
 0xba2   :  { %v9136_v38 = vpop.eup %9135 }
 0xba3   :  { %v7247_v34 = vadd.f32 %v7246_v20, %v7237_v39  ;;  %v7629_v36 = vmul.f32 0.6931472, %v9136_v38 }
 0xba5   :  { %v7250_v21 = vsel %vm7249_vm15, %v7247_v34, -1e+30  ;;  %v7630_v44 = vadd.f32 %v7629_v36, %v7620_v3  ;;  %vm7771_vm15 = vcmp.le.s32.totalorder %v10609_v26, 3 }
 0xba6   :  { %7252 = vst.msk [vmem:[#allocation3 + $0x18] sm:$0xff] %vm392_vm2, %v7250_v21  ;;  %v7255_v9 = vrot.slane %v7250_v21, 7  ;;  %v7261_v42 = vadd.f32 %v10687_v60, %v7250_v21  ;;  %v7702_v21 = vsel %vm7701_vm6, 1, %v9358_v11 }
 0xba7   :  { %v6903_v32 = vpop.f32.mrb[92].mxu1  ;;  %v10696_v28 = vsel %vm7639_vm5, %v7630_v44, -1e+30  ;;  %v7706_v38 = vrot.slane %v7702_v21, %v10604_v53  ;;  %vm7770_vm5 = vcmp.le.s32.totalorder %v10571_v18, 3 }
 0xba8   :  { %v7256_v24 = vsel %vm7159_vm11, -1e+30, %v7255_v9  ;;  %v6904_v63 = vadd.f32 %v8174_v49, %v6903_v32  ;;  %v8862_v51 = vpop.f32.mrb[93].mxu1  ;;  %v7677_v43 = vrot.slane %v10696_v28, 1  ;;  %v7683_v62 = vadd.f32 %v8188_v58, %v10696_v28 }
 0xba9   :  { %v7266_v41 = vadd.f32 %v8187_v29, %v7256_v24  ;;  %vm7707_vm10 = vcmp.eq.s32.totalorder %v7706_v38, 1 }
 0xbaa   :  { %v6907_v25 = vsub.f32 0.0, %v6904_v63  ;;  %v7678_v59 = vsel %vm7467_vm0, -1e+30, %v7677_v43  ;;  %vm7708_vm13 = vmor %vm7700_vm9, %vm7707_vm10  ;;  %vm7413_vm9 = vcmp.ge.s32.totalorder %v10571_v18, 1 }
 0xbab   :  { %v7267_v50 = vmax.f32 %v7261_v42, %v7266_v41  ;;  %v7688_v7 = vadd.f32 %v7687_v40, %v7678_v59  ;;  %vm7709_vm14 = vmand %vm7188_vm1, %vm7708_vm13  ;;  %v10720_v40 = vld [vmem:[#allocation4 + $0x3] sm:$0x1]  ;;  %vm7338_vm13 = vcmp.lt.s32.totalorder %v10571_v18, 6 }
 0xbac   :  { %v6908_v35 = vmul.f32 1.442695, %v6907_v25  ;;  %v7073_v52 = vpop.f32.mrb[94].mxu1  ;;  %vm10763_vm10 = vmand %vm7413_vm9, %vm7188_vm1 }
 0xbad   :  { %v7268_v45 = vsub.f32 %v7261_v42, %v7267_v50  ;;  %v7271_v46 = vsub.f32 %v7266_v41, %v7267_v50  ;;  %v10698_v16 = vadd.f32 %v8178_v8, %v7073_v52  ;;  %v8880_v10 = vpop.f32.mrb[95].mxu1  ;;  %v7689_v2 = vmax.f32 %v7683_v62, %v7688_v7  ;;  %v8189_v52 = vld [vmem:[#allocation4 + $0x4] ss:$0 sm:$0xff] }
 0xbae   :  { %9137 = vpow2.f32 %v6908_v35 }
 0xbaf   :  { %v7269_v39 = vmul.f32 1.442695, %v7268_v45  ;;  %v7272_v27 = vmul.f32 1.442695, %v7271_v46  ;;  %v7078_v47 = vand.u32 2147483647, %v10698_v16  ;;  %v7690_v1 = vsub.f32 %v7683_v62, %v7689_v2 }
 0xbb0   :  { %v7693_v23 = vsub.f32 %v7688_v7, %v7689_v2  ;;  %v7077_v8 = vmax.f32 %v10698_v16, 0.0 }
 0xbb1   :  { %9139 = vpow2.f32 %v7269_v39  ;;  %v7079_v37 = vsub.f32 0.0, %v7078_v47  ;;  %v7691_v17 = vmul.f32 1.442695, %v7690_v1 }
 0xbb2   :  { %9141 = vpow2.f32 %v7272_v27  ;;  %v7694_v19 = vmul.f32 1.442695, %v7693_v23 }
 0xbb3   :  { %v7080_v3 = vmul.f32 1.442695, %v7079_v37 }
 0xbb5   :  { %9143 = vpow2.f32 %v7080_v3 }
 0xbb6   :  { %9145 = vpow2.f32 %v7691_v17 }
 0xbb7   :  { %9147 = vpow2.f32 %v7694_v19 }
 0xbb8   :  { %v9138_v15 = vpop.eup %9137 }
 0xbb9   :  { %v6910_v31 = vadd.f32 1.0, %v9138_v15 }
 0xbbb   :  { %v9140_v33 = vpop.eup %9139  ;;  %9149 = vrcp.f32 %v6910_v31 }
 0xbbc   :  { %v9142_v6 = vpop.eup %9141 }
 0xbbd   :  { %v7274_v55 = vadd.f32 %v9142_v6, %v9140_v33 }
 0xbbf   :  { %9151 = vlog2.f32 %v7274_v55  ;;  %v9144_v54 = vpop.eup %9143 }
 0xbc0   :  { %v7082_v12 = vadd.f32 1.0, %v9144_v54  ;;  %v9146_v22 = vpop.eup %9145  ;;  %v7085_v49 = vmul.f32 -0.5, %v9144_v54  ;;  %v7088_v24 = vand.u32 2147483647, %v9144_v54 }
 0xbc1   :  { %v9148_v0 = vpop.eup %9147 }
 0xbc2   :  { %9153 = vlog2.f32 %v7082_v12  ;;  %v7696_v34 = vadd.f32 %v9148_v0, %v9146_v22  ;;  %v7086_v32 = vadd.f32 1.0, %v7085_v49  ;;  %vm7089_vm12 = vcmp.lt.f32.partialorder %v7088_v24, 0.0004427343 }
 0xbc4   :  { %9155 = vlog2.f32 %v7696_v34  ;;  %v7087_v41 = vmul.f32 %v9144_v54, %v7086_v32 }
 0xbc5   :  { %v9150_v20 = vpop.eup %9149 }
 0xbc6   :  { %7092 = vxpose.xlu1.b32.start.end [1/1] (short) (narrow) %v9150_v20, 8 }
 0xbc9   :  { %v9152_v9 = vpop.eup %9151 }
 0xbca   :  { %v7276_v29 = vmul.f32 0.6931472, %v9152_v9 }
 0xbcc   :  { %v7277_v63 = vadd.f32 %v7276_v29, %v7267_v50  ;;  %v9154_v51 = vpop.eup %9153  ;;  %v8191_v29 = vld [vmem:[#allocation4 + $0x5] ss:$0 sm:$0xff] }
 0xbcd   :  { %v7084_v42 = vmul.f32 0.6931472, %v9154_v51 }
 0xbce   :  { %v7280_v36 = vsel %vm7279_vm8, %v7277_v63, -1e+30  ;;  %v9156_v35 = vpop.eup %9155 }
 0xbcf   :  { %7282 = vst.msk [vmem:[#allocation3 + $0x20] sm:$0xff] %vm392_vm2, %v7280_v36  ;;  %v7285_v25 = vrot.slane %v7280_v36, 7  ;;  %v7090_v44 = vsel %vm7089_vm12, %v7087_v41, %v7084_v42  ;;  %v7291_v46 = vadd.f32 %v8188_v58, %v7280_v36  ;;  %v7698_v43 = vmul.f32 0.6931472, %v9156_v35 }
 0xbd0   :  { %v7091_v45 = vadd.f32 %v7090_v44, %v7077_v8  ;;  %v7757_v58 = vrot.slane %v10720_v40, %v10604_v53  ;;  %v7713_v44 = vld [vmem:[#allocation3 + $0x18] sm:$0xff]  ;;  %vm7841_vm12 = vcmp.le.s32.totalorder %v10609_v26, 2 }
 0xbd1   :  { %v7286_v50 = vsel %vm7159_vm11, -1e+30, %v7285_v25  ;;  %v7699_v27 = vadd.f32 %v7698_v43, %v7689_v2 }
 0xbd2   :  { %v7296_v10 = vadd.f32 %v8189_v52, %v7286_v50  ;;  %7126 = vxpose.xlu0.b32.start.end [1/1] (short) (narrow) %v7091_v45, 8  ;;  %v10748_v52 = vld [vmem:[#allocation4 + $0x2] sm:$0x1] }
 0xbd3   :  { %v10722_v59 = vsel %vm7709_vm14, %v7699_v27, -1e+30  ;;  %v7827_v27 = vrot.slane %v10748_v52, %v10604_v53  ;;  %vm7339_vm14 = vmand %vm7338_vm13, %vm7188_vm1 }
 0xbd4   :  { %v7297_v39 = vmax.f32 %v7291_v46, %v7296_v10  ;;  %v7747_v62 = vrot.slane %v10722_v59, 1  ;;  %v7753_v2 = vadd.f32 %v10687_v60, %v10722_v59  ;;  %v7772_v60 = vsel %vm7771_vm15, 1, %v9358_v11 }
 0xbd5   :  { %v7776_v20 = vrot.slane %v7772_v60, %v10604_v53  ;;  %vm7840_vm15 = vcmp.le.s32.totalorder %v10571_v18, 2 }
 0xbd6   :  { %v7298_v16 = vsub.f32 %v7291_v46, %v7297_v39  ;;  %v7301_v47 = vsub.f32 %v7296_v10, %v7297_v39  ;;  %v7748_v3 = vsel %vm7467_vm0, -1e+30, %v7747_v62  ;;  %v7643_v42 = vld [vmem:[#allocation3 + $0x20] sm:$0xff]  ;;  %v7714_v46 = vrot.slane %v7713_v44, 7  ;;  %v7783_v10 = vld [vmem:[#allocation3 + $0x10] sm:$0xff] }
 0xbd7   :  { %v7758_v1 = vadd.f32 %v7757_v58, %v7748_v3  ;;  %vm7777_vm6 = vcmp.eq.s32.totalorder %v7776_v20, 1 }
 0xbd8   :  { %v7299_v7 = vmul.f32 1.442695, %v7298_v16  ;;  %v7302_v37 = vmul.f32 1.442695, %v7301_v47  ;;  %vm7778_vm7 = vmor %vm7770_vm5, %vm7777_vm6  ;;  %v7784_v47 = vrot.slane %v7783_v10, 7 }
 0xbd9   :  { %v7759_v23 = vmax.f32 %v7753_v2, %v7758_v1  ;;  %vm7779_vm8 = vmand %vm7188_vm1, %vm7778_vm7 }
 0xbda   :  { %9157 = vpow2.f32 %v7299_v7 }
 0xbdb   :  { %9159 = vpow2.f32 %v7302_v37  ;;  %v7760_v17 = vsub.f32 %v7753_v2, %v7759_v23  ;;  %v7763_v19 = vsub.f32 %v7758_v1, %v7759_v23  ;;  %v7715_v37 = vsel %vm7159_vm11, -1e+30, %v7714_v46 }
 0xbdc   :  { %v7716_v2 = vadd.f32 %v7715_v37, %v10722_v59 }
 0xbdd   :  { %v7761_v15 = vmul.f32 1.442695, %v7760_v17  ;;  %v7764_v31 = vmul.f32 1.442695, %v7763_v19 }
 0xbdf   :  { %9161 = vpow2.f32 %v7761_v15  ;;  %v7785_v15 = vsel %vm7159_vm11, -1e+30, %v7784_v47 }
 0xbe0   :  { %9163 = vpow2.f32 %v7764_v31  ;;  %v10778_v31 = vsel %vm10763_vm10, %v7716_v2, -1e+30 }
 0xbe1   :  { %v7718_v60 = vsel %vm392_vm2, %v10778_v31, -inf }
 0xbe4   :  { %v9158_v33 = vpop.eup %9157 }
 0xbe5   :  { %v9160_v6 = vpop.eup %9159 }
 0xbe6   :  { %v7304_v55 = vadd.f32 %v9160_v6, %v9158_v33 }
 0xbe8   :  { %9165 = vlog2.f32 %v7304_v55 }
 0xbe9   :  { %v9162_v54 = vpop.eup %9161 }
 0xbea   :  { %v9164_v12 = vpop.eup %9163 }
 0xbeb   :  { %v7766_v22 = vadd.f32 %v9164_v12, %v9162_v54 }
 0xbed   :  { %9167 = vlog2.f32 %v7766_v22 }
 0xbf2   :  { %v9166_v0 = vpop.eup %9165 }
 0xbf3   :  { %v7306_v34 = vmul.f32 0.6931472, %v9166_v0 }
 0xbf5   :  { %v7307_v21 = vadd.f32 %v7306_v34, %v7297_v39 }
 0xbf7   :  { %v7310_v49 = vsel %vm7309_vm4, %v7307_v21, -1e+30  ;;  %v9168_v38 = vpop.eup %9167 }
 0xbf8   :  { %7312 = vst.msk [vmem:[#allocation3 + $0x28] sm:$0xff] %vm392_vm2, %v7310_v49  ;;  %v7315_v9 = vrot.slane %v7310_v49, 7  ;;  %v7321_v24 = vadd.f32 %v10672_v57, %v7310_v49  ;;  %v7768_v51 = vmul.f32 0.6931472, %v9168_v38  ;;  %v7644_v57 = vrot.slane %v7643_v42, 7 }
 0xbfa   :  { %v7316_v32 = vsel %vm7159_vm11, -1e+30, %v7315_v9  ;;  %v7769_v41 = vadd.f32 %v7768_v51, %v7759_v23  ;;  %v7645_v16 = vsel %vm7159_vm11, -1e+30, %v7644_v57 }
 0xbfb   :  { %v7326_v63 = vadd.f32 %v8191_v29, %v7316_v32  ;;  %v7646_v23 = vadd.f32 %v7645_v16, %v10696_v28 }
 0xbfc   :  { %v7780_v35 = vsel %vm7779_vm8, %v7769_v41, -1e+30 }
 0xbfd   :  { %v10744_v36 = vmax.f32 %v7321_v24, %v7326_v63  ;;  %v7817_v39 = vrot.slane %v7780_v35, 1  ;;  %v7823_v58 = vadd.f32 %v10662_v48, %v7780_v35  ;;  %v7786_v33 = vadd.f32 %v7785_v15, %v7780_v35  ;;  %v7853_v15 = vld [vmem:[#allocation3 + $0x8] sm:$0xff] }
 0xbfe   :  { %v10782_v28 = vsel %vm10763_vm10, %v7646_v23, -1e+30 }
 0xbff   :  { %v7328_v25 = vsub.f32 %v7321_v24, %v10744_v36  ;;  %v7331_v8 = vsub.f32 %v7326_v63, %v10744_v36  ;;  %v7574_v43 = vld [vmem:[#allocation3 + $0x28] sm:$0xff]  ;;  %v7818_v62 = vsel %vm7467_vm0, -1e+30, %v7817_v39  ;;  %v7648_v20 = vsel %vm392_vm2, %v10782_v28, -inf }
 0xc00   :  { %v7575_v7 = vrot.slane %v7574_v43, 7  ;;  %v7828_v3 = vadd.f32 %v7827_v27, %v7818_v62  ;;  %v10791_v34 = vsel %vm10763_vm10, %v7786_v33, -1e+30  ;;  %v7649_v49 = vrot.slane %v7648_v20, 4 }
 0xc01   :  { %v7329_v50 = vmul.f32 1.442695, %v7328_v25  ;;  %v7332_v45 = vmul.f32 1.442695, %v7331_v8  ;;  %v7788_v9 = vsel %vm392_vm2, %v10791_v34, -inf }
 0xc02   :  { %v10768_v17 = vmax.f32 %v7823_v58, %v7828_v3  ;;  %v7576_v19 = vsel %vm7159_vm11, -1e+30, %v7575_v7  ;;  %v7789_v32 = vrot.slane %v7788_v9, 4  ;;  %v7650_v24 = vmax.f32 %v7648_v20, %v7649_v49 }
 0xc03   :  { %9169 = vpow2.f32 %v7329_v50  ;;  %v7577_v12 = vadd.f32 %v7576_v19, %v10669_v56  ;;  %v7719_v56 = vrot.slane %v7718_v60, 4  ;;  %v7842_v50 = vsel %vm7841_vm12, 1, %v9358_v11 }
 0xc04   :  { %9171 = vpow2.f32 %v7332_v45  ;;  %v7830_v48 = vsub.f32 %v7823_v58, %v10768_v17  ;;  %v7833_v59 = vsub.f32 %v7828_v3, %v10768_v17  ;;  %v7790_v25 = vmax.f32 %v7788_v9, %v7789_v32  ;;  %v8193_v3 = vld [vmem:[#allocation4 + $0x6] ss:$0 sm:$0xff] }
 0xc05   :  { %v10795_v21 = vsel %vm10763_vm10, %v7577_v12, -1e+30  ;;  %v7720_v29 = vmax.f32 %v7718_v60, %v7719_v56  ;;  %v7651_v8 = vrot.slane %v7650_v24, 2  ;;  %v7846_v43 = vrot.slane %v7842_v50, %v10604_v53 }
 0xc06   :  { %v7831_v6 = vmul.f32 1.442695, %v7830_v48  ;;  %v7834_v55 = vmul.f32 1.442695, %v7833_v59  ;;  %v7579_v38 = vsel %vm392_vm2, %v10795_v21, -inf  ;;  %v7791_v10 = vrot.slane %v7790_v25, 2 }
 0xc07   :  { %v7580_v63 = vrot.slane %v7579_v38, 4  ;;  %v7721_v41 = vrot.slane %v7720_v29, 2  ;;  %v7652_v27 = vmax.f32 %v7650_v24, %v7651_v8  ;;  %vm7847_vm3 = vcmp.eq.s32.totalorder %v7846_v43, 1  ;;  %v10830_v24 = vld [vmem:[#allocation4 + $0x1] sm:$0x1] }
 0xc08   :  { %9173 = vpow2.f32 %v7831_v6  ;;  %v7792_v37 = vmax.f32 %v7790_v25, %v7791_v10  ;;  %vm7848_vm4 = vmor %vm7840_vm15, %vm7847_vm3 }
 0xc09   :  { %9175 = vpow2.f32 %v7834_v55  ;;  %v7581_v45 = vmax.f32 %v7579_v38, %v7580_v63  ;;  %v7722_v46 = vmax.f32 %v7720_v29, %v7721_v41  ;;  %v7653_v58 = vrot.slane %v7652_v27, 1  ;;  %vm7849_vm5 = vmand %vm7188_vm1, %vm7848_vm4 }
 0xc0a   :  { %v7793_v59 = vrot.slane %v7792_v37, 1 }
 0xc0b   :  { %v7582_v16 = vrot.slane %v7581_v45, 2  ;;  %v7723_v7 = vrot.slane %v7722_v46, 1  ;;  %v10817_v55 = vmax.f32 %v7652_v27, %v7653_v58 }
 0xc0c   :  { %v10825_v49 = vmax.f32 %v7792_v37, %v7793_v59 }
 0xc0d   :  { %v9170_v54 = vpop.eup %9169  ;;  %v7583_v23 = vmax.f32 %v7581_v45, %v7582_v16  ;;  %v10813_v48 = vmax.f32 %v7722_v46, %v7723_v7  ;;  %v7655_v32 = vsub.f32 %v10782_v28, %v10817_v55  ;;  %v7897_v45 = vrot.slane %v10830_v24, %v10604_v53 }
 0xc0e   :  { %v9172_v22 = vpop.eup %9171  ;;  %v7795_v28 = vsub.f32 %v10791_v34, %v10825_v49 }
 0xc0f   :  { %v7334_v0 = vadd.f32 %v9172_v22, %v9170_v54  ;;  %v7584_v54 = vrot.slane %v7583_v23, 1  ;;  %v7854_v22 = vrot.slane %v7853_v15, 7  ;;  %v7725_v56 = vsub.f32 %v10778_v31, %v10813_v48 }
 0xc11   :  { %9177 = vlog2.f32 %v7334_v0  ;;  %v7855_v31 = vsel %vm7159_vm11, -1e+30, %v7854_v22  ;;  %v7726_v25 = vmul.f32 1.442695, %v7725_v56 }
 0xc12   :  { %v9174_v51 = vpop.eup %9173 }
 0xc13   :  { %v9176_v42 = vpop.eup %9175 }
 0xc14   :  { %v7836_v44 = vadd.f32 %v9176_v42, %v9174_v51  ;;  %v10834_v51 = vmax.f32 %v7583_v23, %v7584_v54 }
 0xc16   :  { %9179 = vlog2.f32 %v7836_v44 }
 0xc1b   :  { %v9178_v35 = vpop.eup %9177 }
 0xc1c   :  { %v7336_v57 = vmul.f32 0.6931472, %v9178_v35  ;;  %v7656_v35 = vmul.f32 1.442695, %v7655_v32 }
 0xc1e   :  { %v7337_v39 = vadd.f32 %v7336_v57, %v10744_v36  ;;  %v7586_v57 = vsub.f32 %v10795_v21, %v10834_v51 }
 0xc20   :  { %v7340_v47 = vsel %vm7339_vm14, %v7337_v39, -1e+30  ;;  %v9180_v33 = vpop.eup %9179 }
 0xc21   :  { %7342 = vst.msk [vmem:[#allocation3 + $0x30] sm:$0xff] %vm392_vm2, %v7340_v47  ;;  %v7345_v62 = vrot.slane %v7340_v47, 7  ;;  %v7351_v19 = vadd.f32 %v10648_v4, %v7340_v47  ;;  %v7838_v12 = vmul.f32 0.6931472, %v9180_v33 }
 0xc23   :  { %v7346_v2 = vsel %vm7159_vm11, -1e+30, %v7345_v62  ;;  %v7839_v9 = vadd.f32 %v7838_v12, %v10768_v17 }
 0xc24   :  { %v7356_v36 = vadd.f32 %v8193_v3, %v7346_v2 }
 0xc25   :  { %v7850_v42 = vsel %vm7849_vm5, %v7839_v9, -1e+30 }
 0xc26   :  { %v10815_v6 = vmax.f32 %v7351_v19, %v7356_v36  ;;  %v7856_v17 = vadd.f32 %v7855_v31, %v7850_v42  ;;  %v7887_v8 = vrot.slane %v7850_v42, 1 }
 0xc28   :  { %v7358_v60 = vsub.f32 %v7351_v19, %v10815_v6  ;;  %v7361_v4 = vsub.f32 %v7356_v36, %v10815_v6  ;;  %v7504_v0 = vld [vmem:[#allocation3 + $0x30] sm:$0xff]  ;;  %v7857_v50 = vsel %vm10763_vm10, %v7856_v17, -1e+30  ;;  %v7888_v46 = vsel %vm7467_vm0, -1e+30, %v7887_v8 }
 0xc29   :  { %v7505_v20 = vrot.slane %v7504_v0, 7  ;;  %v7858_v34 = vsel %vm392_vm2, %v7857_v50, -inf }
 0xc2a   :  { %v7359_v38 = vmul.f32 1.442695, %v7358_v60  ;;  %v7362_v29 = vmul.f32 1.442695, %v7361_v4 }
 0xc2b   :  { %v7506_v63 = vsel %vm7159_vm11, -1e+30, %v7505_v20 }
 0xc2c   :  { %9181 = vpow2.f32 %v7359_v38  ;;  %v7507_v41 = vadd.f32 %v7506_v63, %v10645_v13 }
 0xc2d   :  { %9183 = vpow2.f32 %v7362_v29 }
 0xc2e   :  { %v7508_v44 = vsel %vm10763_vm10, %v7507_v41, -1e+30 }
 0xc2f   :  { %v7509_v13 = vsel %vm392_vm2, %v7508_v44, -inf }
 0xc30   :  { %9269 = shalt.err (!%p9266_p4)
}
 0xc31   :  { %s9270_s7 = scalar_lea.hbm %s11076_s23, 128 }
 0xc32   :  { %p9271_p5 = scmp.ne.s32.totalorder %s11076_s23, %s9270_s7  ;;  %p9274_p6 = scmp.lt.u32.totalorder %s9270_s7, %s11076_s23 }
 0xc34   :  { %p9276_p7 = pnand %p9274_p6, %p9271_p5 }
 0xc36   :  { %9279 = shalt.err (!%p9276_p7)
}
 0xc37   :  { %7995 = dma.vmem_to_hbm [thread:$0]  %s7993_s2, 128, %s11076_s23, [#allocation15]   ;;  %v7510_v21 = vrot.slane %v7509_v13, 4  ;;  %v7859_v10 = vrot.slane %v7858_v34, 4  ;;  %v7893_v43 = vadd.f32 %v10638_v14, %v7850_v42  ;;  %v7898_v39 = vadd.f32 %v7897_v45, %v7888_v46  ;;  %v9182_v23 = vpop.eup %9181 }
 0xc38   :  { %v7796_v27 = vmul.f32 1.442695, %v7795_v28  ;;  %9185 = vpow2.f32 %v7726_v25  ;;  %v7587_v7 = vmul.f32 1.442695, %v7586_v57  ;;  %v9184_v59 = vpop.eup %9183  ;;  %vm7911_vm0 = vcmp.le.s32.totalorder %v10609_v26, 1  ;;  %s9361_s23 = smov [#allocation11]  }
 0xc39   :  { %v7511_v16 = vmax.f32 %v7509_v13, %v7510_v21  ;;  %v7860_v47 = vmax.f32 %v7858_v34, %v7859_v10  ;;  %v10866_v62 = vmax.f32 %v7893_v43, %v7898_v39  ;;  %9187 = vpow2.f32 %v7656_v35  ;;  %s7972_s16 = sshll.u32 %s9361_s23, 4  ;;  %s9362_s3 = smov [#allocation13]   ;;  %s10921_s16 = int_to_ptr.vmem [resolvable:$true] %s7972_s16 }
 0xc3a   :  { %9189 = vpow2.f32 %v7796_v27  ;;  %v7364_v33 = vadd.f32 %v9184_v59, %v9182_v23  ;;  %vm7368_vm6 = vcmp.lt.s32.totalorder %v10571_v18, 7  ;;  %v7912_v28 = vsel %vm7911_vm0, 1, %v9358_v11  ;;  %s7982_s0 = sshll.u32 %s9362_s3, 4  ;;  %s9280_s30 = scalar_lea.vmem %s10921_s16, 16  ;;  %s10926_s0 = int_to_ptr.vmem [resolvable:$true] %s7982_s0 }
 0xc3b   :  { %v7512_v37 = vrot.slane %v7511_v16, 2  ;;  %v7861_v58 = vrot.slane %v7860_v47, 2  ;;  %v7900_v3 = vsub.f32 %v7893_v43, %v10866_v62  ;;  %v7903_v2 = vsub.f32 %v7898_v39, %v10866_v62  ;;  %vm7369_vm7 = vmand %vm7368_vm6, %vm7188_vm1  ;;  %p9281_p8 = scmp.ne.s32.totalorder %s10921_s16, %s9280_s30  ;;  %s9284_s14 = scalar_lea.vmem %s10921_s16, 32 }
 0xc3c   :  { %9191 = vpow2.f32 %v7587_v7  ;;  %vm7124_vm8 = vcmask 57344   ;;  %v7916_v13 = vrot.slane %v7912_v28, %v10604_v53  ;;  %vm7910_vm9 = vcmp.le.s32.totalorder %v10571_v18, 1  ;;  %v8195_v53 = vld [vmem:[#allocation4 + $0x7] ss:$0 sm:$0xff]  ;;  %p9285_p9 = scmp.lt.s32.totalorder %s10921_s16, %s10921_s16  ;;  %p9286_p10 = scmp.lt.s32.totalorder %s9284_s14, %s9280_s30 }
 0xc3d   :  { %v7513_v19 = vmax.f32 %v7511_v16, %v7512_v37  ;;  %v7862_v36 = vmax.f32 %v7860_v47, %v7861_v58  ;;  %v7901_v14 = vmul.f32 1.442695, %v7900_v3  ;;  %v7904_v15 = vmul.f32 1.442695, %v7903_v2  ;;  %v7922_v58 = vld [vmem:[#allocation3] sm:$0xff] }
 0xc3e   :  { %vm10890_vm12 = vcmp.eq.s32.totalorder %v7916_v13, 1  ;;  %p9287_p11 = por %p9286_p10, %p9285_p9 }
 0xc3f   :  { %v7514_v54 = vrot.slane %v7513_v19, 1  ;;  %v7863_v12 = vrot.slane %v7862_v36, 1  ;;  %9193 = vpow2.f32 %v7901_v14  ;;  %vm10903_vm13 = vmor %vm7910_vm9, %vm10890_vm12 }
 0xc40   :  { %9195 = vpow2.f32 %v7904_v15  ;;  %vm10917_vm14 = vmand %vm7188_vm1, %vm10903_vm13  ;;  %p9288_p12 = pnand %p9287_p11, %p9281_p8 }
 0xc41   :  { %9197 = vlog2.f32 %v7364_v33  ;;  %v10870_v22 = vmax.f32 %v7513_v19, %v7514_v54  ;;  %v10872_v60 = vmax.f32 %v7862_v36, %v7863_v12  ;;  %v7923_v54 = vrot.slane %v7922_v58, 7 }
 0xc42   :  { %v9186_v4 = vpop.eup %9185 }
 0xc43   :  { %v7516_v0 = vsub.f32 %v7508_v44, %v10870_v22  ;;  %v7865_v20 = vsub.f32 %v7857_v50, %v10872_v60  ;;  %v9188_v56 = vpop.eup %9187  ;;  %v7728_v32 = vsel %vm392_vm2, %v9186_v4, 0.0  ;;  %v7924_v28 = vsel %vm7159_vm11, -1e+30, %v7923_v54 }
 0xc44   :  { %v9190_v29 = vpop.eup %9189  ;;  %v7658_v41 = vsel %vm392_vm2, %v9188_v56, 0.0  ;;  %v7729_v17 = vrot.slane %v7728_v32, 4 }
 0xc45   :  { %v7517_v9 = vmul.f32 1.442695, %v7516_v0  ;;  %v7866_v38 = vmul.f32 1.442695, %v7865_v20  ;;  %v7798_v8 = vsel %vm392_vm2, %v9190_v29, 0.0  ;;  %v7659_v45 = vrot.slane %v7658_v41, 4 }
 0xc46   :  { %v9192_v63 = vpop.eup %9191  ;;  %v7108_v26 = vpop.trf.xlu1  ;;  %v7730_v34 = vadd.f32 %v7729_v17, %v7728_v32  ;;  %v7799_v46 = vrot.slane %v7798_v8, 4 }
 0xc47   :  { %9199 = vpow2.f32 %v7517_v9  ;;  %v7589_v50 = vsel %vm392_vm2, %v9192_v63, 0.0  ;;  %7125 = vst.msk [vmem:[#allocation13] sm:$0x1] %vm7124_vm8, %v7108_v26  ;;  %v7660_v27 = vadd.f32 %v7659_v45, %v7658_v41 }
 0xc48   :  { %9201 = vpow2.f32 %v7866_v38  ;;  %v7590_v21 = vrot.slane %v7589_v50, 4  ;;  %v7731_v7 = vrot.slane %v7730_v34, 2  ;;  %v7800_v37 = vadd.f32 %v7799_v46, %v7798_v8 }
 0xc49   :  { %v9194_v42 = vpop.eup %9193  ;;  %v7661_v33 = vrot.slane %v7660_v27, 2 }
 0xc4a   :  { %v9196_v31 = vpop.eup %9195  ;;  %v7591_v23 = vadd.f32 %v7590_v21, %v7589_v50  ;;  %v7801_v0 = vrot.slane %v7800_v37, 2  ;;  %v10909_v9 = vadd.f32 %v7731_v7, %v7730_v34 }
 0xc4b   :  { %v9198_v25 = vpop.eup %9197  ;;  %v7906_v44 = vadd.f32 %v9196_v31, %v9194_v42  ;;  %v7662_v17 = vadd.f32 %v7661_v33, %v7660_v27 }
 0xc4c   :  { %v7366_v35 = vmul.f32 0.6931472, %v9198_v25  ;;  %v7592_v56 = vrot.slane %v7591_v23, 2  ;;  %v7802_v50 = vadd.f32 %v7801_v0, %v7800_v37 }
 0xc4d   :  { %9203 = vlog2.f32 %v7906_v44 }
 0xc4e   :  { %v7367_v57 = vadd.f32 %v7366_v35, %v10815_v6  ;;  %v7593_v13 = vadd.f32 %v7592_v56, %v7591_v23 }
 0xc50   :  { %v7370_v10 = vsel %vm7369_vm7, %v7367_v57, -1e+30  ;;  %v7733_v57 = vrot.slane %v10909_v9, 1 }
 0xc51   :  { %v9200_v43 = vpop.eup %9199  ;;  %7372 = vst.msk [vmem:[#allocation3 + $0x38] sm:$0xff] %vm392_vm2, %v7370_v10  ;;  %v7375_v39 = vrot.slane %v7370_v10, 7  ;;  %v7381_v36 = vadd.f32 %v10626_v30, %v7370_v10 }
 0xc52   :  { %v9202_v16 = vpop.eup %9201  ;;  %v7519_v6 = vsel %vm392_vm2, %v9200_v43, 0.0  ;;  %v7142_v35 = vpop.trf.xlu0 }
 0xc53   :  { %v7376_v3 = vsel %vm7159_vm11, -1e+30, %v7375_v39  ;;  %v7520_v2 = vrot.slane %v7519_v6, 4  ;;  %v7868_v19 = vsel %vm392_vm2, %v9202_v16, 0.0  ;;  %7158 = vst.msk [vmem:[#allocation11] sm:$0x1] %vm7124_vm8, %v7142_v35 }
 0xc54   :  { %v7386_v14 = vadd.f32 %v8195_v53, %v7376_v3  ;;  %v7869_v15 = vrot.slane %v7868_v19, 4 }
 0xc55   :  { %v7521_v59 = vadd.f32 %v7520_v2, %v7519_v6 }
 0xc56   :  { %v10907_v4 = vmax.f32 %v7381_v36, %v7386_v14  ;;  %v7870_v20 = vadd.f32 %v7869_v15, %v7868_v19 }
 0xc57   :  { %v9204_v30 = vpop.eup %9203  ;;  %v7522_v63 = vrot.slane %v7521_v59, 2 }
 0xc58   :  { %v7388_v38 = vsub.f32 %v7381_v36, %v10907_v4  ;;  %v7391_v29 = vsub.f32 %v7386_v14, %v10907_v4  ;;  %v7410_v32 = vld [vmem:[#allocation3 + $0x38] sm:$0xff]  ;;  %v7908_v42 = vmul.f32 0.6931472, %v9204_v30  ;;  %v7871_v25 = vrot.slane %v7870_v20, 2 }
 0xc59   :  { %v7411_v41 = vrot.slane %v7410_v32, 7 }
 0xc5a   :  { %v7389_v8 = vmul.f32 1.442695, %v7388_v38  ;;  %v7392_v44 = vmul.f32 1.442695, %v7391_v29  ;;  %v7909_v26 = vadd.f32 %v7908_v42, %v10866_v62 }
 0xc5b   :  { %v7412_v45 = vsel %vm7159_vm11, -1e+30, %v7411_v41 }
 0xc5c   :  { %9205 = vpow2.f32 %v7389_v8 }
 0xc5d   :  { %9291 = shalt.err (!%p9288_p12)
}
 0xc5e   :  { %s9292_s25 = scalar_lea.hbm %s11074_s21, 16 }
 0xc5f   :  { %p9293_p13 = scmp.ne.s32.totalorder %s11074_s21, %s9292_s25  ;;  %p9296_p0 = scmp.lt.u32.totalorder %s9292_s25, %s11074_s21 }
 0xc61   :  { %p9298_p1 = pnand %p9296_p0, %p9293_p13 }
 0xc63   :  { %9301 = shalt.err (!%p9298_p1)
}
 0xc64   :  { %7975 = dma.vmem_to_hbm [thread:$0]  %s10921_s16, 16, %s11074_s21, [#allocation12]   ;;  %v7415_v62 = vadd.f32 %v7412_v45, %v10621_v5  ;;  %v7523_v34 = vadd.f32 %v7522_v63, %v7521_v59  ;;  %v7920_v46 = vsel %vm10917_vm14, %v7909_v26, -1e+30  ;;  %9207 = vpow2.f32 %v7392_v44 }
 0xc65   :  { %v7663_v21 = vrot.slane %v7662_v17, 1  ;;  %v7872_v10 = vadd.f32 %v7871_v25, %v7870_v20  ;;  %v7925_v43 = vadd.f32 %v7924_v28, %v7920_v46  ;;  %s9302_s26 = scalar_lea.vmem %s10926_s0, 16  ;;  %s9306_s2 = scalar_lea.vmem %s10926_s0, 32 }
 0xc66   :  { %p9303_p2 = scmp.ne.s32.totalorder %s10926_s0, %s9302_s26  ;;  %p9307_p3 = scmp.lt.s32.totalorder %s10926_s0, %s10926_s0 }
 0xc67   :  { %p9308_p4 = scmp.lt.s32.totalorder %s9306_s2, %s9302_s26 }
 0xc69   :  { %p9309_p5 = por %p9308_p4, %p9307_p3 }
 0xc6b   :  { %p9310_p6 = pnand %p9309_p5, %p9303_p2 }
 0xc6d   :  { %9313 = shalt.err (!%p9310_p6)
}
 0xc6e   :  { %s9314_s27 = scalar_lea.hbm %s11075_s22, 16 }
 0xc6f   :  { %p9315_p7 = scmp.ne.s32.totalorder %s11075_s22, %s9314_s27  ;;  %p9318_p8 = scmp.lt.u32.totalorder %s9314_s27, %s11075_s22 }
 0xc71   :  { %p9320_p9 = pnand %p9318_p8, %p9315_p7 }
 0xc73   :  { %9323 = shalt.err (!%p9320_p9)
}
 0xc74   :  { %7985 = dma.vmem_to_hbm [thread:$0]  %s10926_s0, 16, %s11075_s22, [#allocation12]   ;;  %v7416_v5 = vsel %vm10763_vm10, %v7415_v62, -1e+30  ;;  %v7803_v39 = vrot.slane %v7802_v50, 1  ;;  %v7594_v16 = vrot.slane %v7593_v13, 1  ;;  %v7734_v7 = vadd.f32 %v7733_v57, %v10909_v9  ;;  %v9206_v54 = vpop.eup %9205 }
 0xc75   :  { %v7417_v27 = vsel %vm392_vm2, %v7416_v5, -inf  ;;  %v7926_v47 = vsel %vm10763_vm10, %v7925_v43, -1e+30  ;;  %v7524_v6 = vrot.slane %v7523_v34, 1  ;;  %v7664_v58 = vadd.f32 %v7663_v21, %v7662_v17  ;;  %v9208_v0 = vpop.eup %9207 }
 0xc76   :  { %v7418_v53 = vrot.slane %v7417_v27, 4  ;;  %v7927_v37 = vsel %vm392_vm2, %v7926_v47, -inf  ;;  %v7873_v3 = vrot.slane %v7872_v10, 1  ;;  %v7804_v19 = vadd.f32 %v7803_v39, %v7802_v50 }
 0xc77   :  { %v7928_v2 = vrot.slane %v7927_v37, 4  ;;  %v7595_v36 = vadd.f32 %v7594_v16, %v7593_v13  ;;  %v7525_v59 = vadd.f32 %v7524_v6, %v7523_v34  ;;  %9209 = vlog2.f32 %v7734_v7 }
 0xc78   :  { %v7419_v23 = vmax.f32 %v7417_v27, %v7418_v53  ;;  %9211 = vlog2.f32 %v7664_v58  ;;  %v7874_v33 = vadd.f32 %v7873_v3, %v7872_v10  ;;  %v7394_v30 = vadd.f32 %v9208_v0, %v9206_v54 }
 0xc79   :  { %v7929_v14 = vmax.f32 %v7927_v37, %v7928_v2  ;;  %9213 = vlog2.f32 %v7804_v19  ;;  %v9363_v35 = vmov 1966171168  }
 0xc7a   :  { %v7420_v15 = vrot.slane %v7419_v23, 2  ;;  %9215 = vlog2.f32 %v7595_v36  ;;  %v7446_v50 = vunpack.c.l.s4 %v9363_v35  ;;  %v9251_v36 = vld [vmem:[#allocation4 + $0x6] sm:$0x1] }
 0xc7b   :  { %v7930_v1 = vrot.slane %v7929_v14, 2  ;;  %9217 = vlog2.f32 %v7525_v59 }
 0xc7c   :  { %v7421_v12 = vmax.f32 %v7419_v23, %v7420_v15  ;;  %9219 = vlog2.f32 %v7874_v33  ;;  %v7447_v43 = vunpack.c.0.s8 %v7446_v50 }
 0xc7d   :  { %v7931_v20 = vmax.f32 %v7929_v14, %v7930_v1  ;;  %9221 = vlog2.f32 %v7394_v30  ;;  %v9252_v14 = vld [vmem:[#allocation4 + $0x5] sm:$0x1] }
 0xc7e   :  { %v7422_v56 = vrot.slane %v7421_v12, 1  ;;  %v7450_v3 = vsub.s32 %v7447_v43, %v10571_v18 }
 0xc7f   :  { %v7932_v9 = vrot.slane %v7931_v20, 1 }
 0xc80   :  { %v10978_v38 = vmax.f32 %v7421_v12, %v7422_v56 }
 0xc81   :  { %v10980_v29 = vmax.f32 %v7931_v20, %v7932_v9  ;;  %v9210_v42 = vpop.eup %9209 }
 0xc82   :  { %v7424_v32 = vsub.f32 %v7416_v5, %v10978_v38  ;;  %v9212_v41 = vpop.eup %9211  ;;  %v7736_v26 = vmul.f32 0.6931472, %v9210_v42 }
 0xc83   :  { %v7934_v63 = vsub.f32 %v7926_v47, %v10980_v29  ;;  %v9214_v25 = vpop.eup %9213  ;;  %v7666_v13 = vmul.f32 0.6931472, %v9212_v41 }
 0xc84   :  { %v7425_v31 = vmul.f32 1.442695, %v7424_v32  ;;  %v9216_v28 = vpop.eup %9215  ;;  %v7806_v46 = vmul.f32 0.6931472, %v9214_v25  ;;  %v7737_v5 = vadd.f32 %v7736_v26, %v10813_v48 }
 0xc85   :  { %v7935_v17 = vmul.f32 1.442695, %v7934_v63  ;;  %v9218_v8 = vpop.eup %9217  ;;  %v7597_v34 = vmul.f32 0.6931472, %v9216_v28  ;;  %v7667_v47 = vadd.f32 %v7666_v13, %v10817_v55 }
 0xc86   :  { %9223 = vpow2.f32 %v7425_v31  ;;  %v9220_v44 = vpop.eup %9219  ;;  %v7527_v62 = vmul.f32 0.6931472, %v9218_v8  ;;  %v7807_v7 = vadd.f32 %v7806_v46, %v10825_v49  ;;  %v9253_v46 = vld [vmem:[%s11099_s18] sm:$0x1]  ;;  %s9364_s18 = smov [#allocation9]  }
 0xc87   :  { %9225 = vpow2.f32 %v7935_v17  ;;  %v9222_v45 = vpop.eup %9221  ;;  %v7876_v21 = vmul.f32 0.6931472, %v9220_v44  ;;  %v7598_v16 = vadd.f32 %v7597_v34, %v10834_v51  ;;  %v7668_v15 = vadd.f32 %v7667_v47, %v10694_v61  ;;  %s7962_s29 = sshll.u32 %s9364_s18, 4  ;;  %s7963_s29 = int_to_ptr.vmem [resolvable:$true] %s7962_s29 }
 0xc88   :  { %v7396_v57 = vmul.f32 0.6931472, %v9222_v45  ;;  %v7528_v27 = vadd.f32 %v7527_v62, %v10870_v22  ;;  %v7738_v22 = vadd.f32 %v7737_v5, %v10720_v40  ;;  %vm7601_vm10 = vcmp.gt.s32.totalorder %v9253_v46, 5  ;;  %s9324_s23 = scalar_lea.vmem %s7963_s29, 128  ;;  %p9329_p11 = scmp.lt.s32.totalorder %s7963_s29, %s7963_s29 }
 0xc89   :  { %v7877_v37 = vadd.f32 %v7876_v21, %v10872_v60  ;;  %v7599_v60 = vadd.f32 %v9252_v14, %v7598_v16  ;;  %vm7670_vm15 = vcmp.gt.s32.totalorder %v9253_v46, 4  ;;  %vm7740_vm5 = vcmp.gt.s32.totalorder %v9253_v46, 3  ;;  %p9325_p10 = scmp.ne.s32.totalorder %s7963_s29, %s9324_s23  ;;  %p9330_p12 = scmp.lt.s32.totalorder %s9324_s23, %s9324_s23 }
 0xc8a   :  { %v7397_v10 = vadd.f32 %v7396_v57, %v10907_v4  ;;  %v7529_v49 = vadd.f32 %v9251_v36, %v7528_v27  ;;  %vm7810_vm6 = vcmp.gt.s32.totalorder %v9253_v46, 2  ;;  %vm7880_vm7 = vcmp.gt.s32.totalorder %v9253_v46, 1  ;;  %v7921_v36 = vld [vmem:[#allocation4] sm:$0x1] }
 0xc8b   :  { %v7878_v18 = vadd.f32 %v7877_v37, %v10830_v24  ;;  %vm7442_vm14 = vcmp.gt.s32.totalorder %v9253_v46, 7  ;;  %p9331_p13 = por %p9330_p12, %p9329_p11 }
 0xc8c   :  { %v7400_v39 = vsel %vm7188_vm1, %v7397_v10, -1e+30  ;;  %vm7531_vm1 = vcmp.gt.s32.totalorder %v9253_v46, 6 }
 0xc8d   :  { %vm7403_vm11 = vcmp.gt.f32.partialorder %v7400_v39, -5e+29  ;;  %v7404_v6 = vsub.f32 0.0, %v7400_v39  ;;  %p9332_p0 = pnand %p9331_p13, %p9325_p10 }
 0xc8e   :  { %v7443_v48 = vsel %vm7403_vm11, 1, %v9358_v11  ;;  %v7808_v11 = vadd.f32 %v7807_v7, %v10748_v52 }
 0xc8f   :  { %v7405_v2 = vsel %vm7403_vm11, %v7404_v6, 0.0  ;;  %v7444_v23 = vcombine.high %v7443_v48, %v7443_v48 }
 0xc90   :  { %v9224_v53 = vpop.eup %9223  ;;  %v10998_v19 = vrot.slane %v7405_v2, 5 }
 0xc91   :  { %v9226_v4 = vpop.eup %9225  ;;  %v7427_v58 = vsel %vm392_vm2, %v9224_v53, 0.0  ;;  %v7451_v20 = vrot.slane %v7444_v23, %v7450_v3 }
 0xc92   :  { %v7428_v51 = vrot.slane %v7427_v58, 4  ;;  %v7937_v55 = vsel %vm392_vm2, %v9226_v4, 0.0  ;;  %v7530_v40 = vadd.f32 %v7529_v49, %v10998_v19  ;;  %v7600_v1 = vadd.f32 %v7599_v60, %v10998_v19 }
 0xc93   :  { %v7938_v33 = vrot.slane %v7937_v55, 4  ;;  %v7669_v54 = vadd.f32 %v7668_v15, %v10998_v19  ;;  %v7739_v12 = vadd.f32 %v7738_v22, %v10998_v19  ;;  %v7809_v30 = vadd.f32 %v7808_v11, %v10998_v19  ;;  %v9254_v22 = vld [vmem:[#allocation4 + $0x7] sm:$0x1] }
 0xc94   :  { %v7429_v59 = vadd.f32 %v7428_v51, %v7427_v58  ;;  %v7879_v61 = vadd.f32 %v7878_v18, %v10998_v19  ;;  %v7533_v56 = vmin.f32 %v7530_v40, 0.0  ;;  %v7603_v9 = vmin.f32 %v7600_v1, 0.0 }
 0xc95   :  { %v7672_v52 = vmin.f32 %v7669_v54, 0.0  ;;  %v7742_v32 = vmin.f32 %v7739_v12, 0.0  ;;  %v7812_v63 = vmin.f32 %v7809_v30, 0.0  ;;  %v7939_v25 = vadd.f32 %v7938_v33, %v7937_v55 }
 0xc96   :  { %v7430_v0 = vrot.slane %v7429_v59, 2  ;;  %v7882_v42 = vmin.f32 %v7879_v61, 0.0  ;;  %v7534_v31 = vmul.f32 1.442695, %v7533_v56  ;;  %v7604_v41 = vmul.f32 1.442695, %v7603_v9 }
 0xc97   :  { %v7673_v17 = vmul.f32 1.442695, %v7672_v52  ;;  %v7452_v8 = vcombine.high %v7451_v20, %v7451_v20  ;;  %v7743_v44 = vmul.f32 1.442695, %v7742_v32  ;;  %v7940_v35 = vrot.slane %v7939_v25, 2 }
 0xc98   :  { %v7431_v24 = vadd.f32 %v7430_v0, %v7429_v59  ;;  %9227 = vpow2.f32 %v7534_v31  ;;  %v7813_v26 = vmul.f32 1.442695, %v7812_v63  ;;  %v7883_v45 = vmul.f32 1.442695, %v7882_v42 }
 0xc99   :  { %9229 = vpow2.f32 %v7604_v41  ;;  %v7941_v13 = vadd.f32 %v7940_v35, %v7939_v25  ;;  %v11009_v57 = vrot.slane %v7452_v8, %v7450_v3 }
 0xc9a   :  { %v7432_v28 = vrot.slane %v7431_v24, 1  ;;  %9231 = vpow2.f32 %v7673_v17 }
 0xc9b   :  { %v7942_v62 = vrot.slane %v7941_v13, 1  ;;  %vm7460_vm2 = vcmp.ne.s32.totalorder %v11009_v57, 0 }
 0xc9c   :  { %v7433_v50 = vadd.f32 %v7432_v28, %v7431_v24  ;;  %vm7532_vm3 = vmand %vm7531_vm1, %vm7460_vm2  ;;  %vm7949_vm1 = vcmp.gt.s32.totalorder %v9253_v46, 0 }
 0xc9d   :  { %v7943_v34 = vadd.f32 %v7942_v62, %v7941_v13  ;;  %vm7602_vm4 = vmand %vm7601_vm10, %vm7460_vm2 }
 0xc9e   :  { %9233 = vlog2.f32 %v7433_v50  ;;  %vm7671_vm0 = vmand %vm7670_vm15, %vm7460_vm2 }
 0xc9f   :  { %9235 = vpow2.f32 %v7743_v44  ;;  %vm7741_vm9 = vmand %vm7740_vm5, %vm7460_vm2 }
 0xca0   :  { %9237 = vpow2.f32 %v7813_v26  ;;  %vm7811_vm12 = vmand %vm7810_vm6, %vm7460_vm2 }
 0xca1   :  { %9239 = vpow2.f32 %v7883_v45  ;;  %vm7881_vm13 = vmand %vm7880_vm7, %vm7460_vm2 }
 0xca2   :  { %9241 = vlog2.f32 %v7943_v34  ;;  %v9228_v21 = vpop.eup %9227  ;;  %vm7461_vm11 = vmand %vm7442_vm14, %vm7460_vm2 }
 0xca3   :  { %v9230_v10 = vpop.eup %9229  ;;  %v7536_v43 = vsel %vm7532_vm3, %v9228_v21, 0.0  ;;  %vm7950_vm10 = vmand %vm7949_vm1, %vm7460_vm2 }
 0xca4   :  { %v9232_v5 = vpop.eup %9231  ;;  %7537 = vst.msk [vmem:[#allocation9 + $0x6] sm:$0x1] %vm7124_vm8, %v7536_v43  ;;  %v7606_v39 = vsel %vm7602_vm4, %v9230_v10, 0.0 }
 0xca5   :  { %7607 = vst.msk [vmem:[#allocation9 + $0x5] sm:$0x1] %vm7124_vm8, %v7606_v39  ;;  %v7675_v16 = vsel %vm7671_vm0, %v9232_v5, 0.0 }
 0xca6   :  { %7676 = vst.msk [vmem:[#allocation9 + $0x4] sm:$0x1] %vm7124_vm8, %v7675_v16 }
 0xca8   :  { %v9234_v27 = vpop.eup %9233 }
 0xca9   :  { %v9236_v47 = vpop.eup %9235  ;;  %v7435_v53 = vmul.f32 0.6931472, %v9234_v27 }
 0xcaa   :  { %v9238_v6 = vpop.eup %9237  ;;  %v7745_v7 = vsel %vm7741_vm9, %v9236_v47, 0.0 }
 0xcab   :  { %v9240_v37 = vpop.eup %9239  ;;  %v7436_v4 = vadd.f32 %v7435_v53, %v10978_v38  ;;  %7746 = vst.msk [vmem:[#allocation9 + $0x3] sm:$0x1] %vm7124_vm8, %v7745_v7  ;;  %v7815_v58 = vsel %vm7811_vm12, %v9238_v6, 0.0 }
 0xcac   :  { %7816 = vst.msk [vmem:[#allocation9 + $0x2] sm:$0x1] %vm7124_vm8, %v7815_v58  ;;  %v7885_v48 = vsel %vm7881_vm13, %v9240_v37, 0.0  ;;  %v9242_v3 = vpop.eup %9241 }
 0xcad   :  { %v7437_v2 = vadd.f32 %v9254_v22, %v7436_v4  ;;  %7886 = vst.msk [vmem:[#allocation9 + $0x1] sm:$0x1] %vm7124_vm8, %v7885_v48  ;;  %v7945_v51 = vmul.f32 0.6931472, %v9242_v3 }
 0xcaf   :  { %v7441_v23 = vadd.f32 %v10998_v19, %v7437_v2  ;;  %v7946_v55 = vadd.f32 %v7945_v51, %v10980_v29 }
 0xcb1   :  { %v7462_v38 = vmin.f32 %v7441_v23, 0.0  ;;  %v7947_v49 = vadd.f32 %v7946_v55, %v7921_v36 }
 0xcb3   :  { %v7463_v14 = vmul.f32 1.442695, %v7462_v38  ;;  %v7948_v60 = vadd.f32 %v7947_v49, %v10998_v19 }
 0xcb5   :  { %9243 = vpow2.f32 %v7463_v14  ;;  %v7951_v15 = vmin.f32 %v7948_v60, 0.0 }
 0xcb7   :  { %v7952_v59 = vmul.f32 1.442695, %v7951_v15 }
 0xcb9   :  { %9245 = vpow2.f32 %v7952_v59 }
 0xcbf   :  { %v9244_v11 = vpop.eup %9243 }
 0xcc0   :  { %v7465_v18 = vsel %vm7461_vm11, %v9244_v11, 0.0 }
 0xcc1   :  { %7466 = vst.msk [vmem:[#allocation9 + $0x7] sm:$0x1] %vm7124_vm8, %v7465_v18 }
 0xcc3   :  { %v9246_v29 = vpop.eup %9245 }
 0xcc4   :  { %v7954_v19 = vsel %vm7950_vm10, %v9246_v29, 0.0 }
 0xcc5   :  { %7955 = vst.msk [vmem:[#allocation9] sm:$0x1] %vm7124_vm8, %v7954_v19 }
 0xcc6   :  { %9335 = shalt.err (!%p9332_p0)
}
 0xcc7   :  { %s9336_s0 = scalar_lea.hbm %s11073_s20, 128 }
 0xcc8   :  { %p9337_p1 = scmp.ne.s32.totalorder %s11073_s20, %s9336_s0  ;;  %p9340_p2 = scmp.lt.u32.totalorder %s9336_s0, %s11073_s20 }
 0xcca   :  { %p9342_p3 = pnand %p9340_p2, %p9337_p1 }
 0xccc   :  { %9345 = shalt.err (!%p9342_p3)
}
 0xccd   :  { %7965 = dma.vmem_to_hbm [thread:$0]  %s7963_s29, 128, %s11073_s20, [#allocation10]  }
 0xcce   :  { %9346 = dma.done.wait [#allocation10], 128  }
 0xccf   :  { %9347 = vsyncadd [#allocation10], 4294967168 }
 0xcd0   :  { %9348 = dma.done.wait [#allocation12], 32  }
 0xcd1   :  { %9349 = vsyncadd [#allocation12], 4294967264 }
 0xcd2   :  { %9350 = dma.done.wait [#allocation15], 128  }
 0xcd3   :  { %9351 = vsyncadd [#allocation15], 4294967168 }
 0xcd4   :  { %8008 = vsyncpa [#allocation10], 1 }
 0xcd5   :  { %8009 = vsyncpa [#allocation12], 1 }
 0xcd6   :  { %8010 = vsyncpa [#allocation15], 1 }

</bundles_post_ra>
